<compile_context>
chip_gen: v5e
topology: v5e:2x2
jax: 0.10.0
libtpu: 0.0.40
codegen_flags: <defaults>
</compile_context>

<pallas_src>
import functools

import jax
import jax.numpy as jnp
import numpy as np
from jax import lax
from jax.experimental import pallas as pl
from jax.experimental.pallas import tpu as pltpu

OP_CONV3x3 = 0
OP_AVG_POOL3x3 = 1


def _round_up(x, m):
    return (x + m - 1) // m * m


# ----------------------- kernel 1: 1x1 conv + folded BN ---------------------- #

def _conv1x1_bn_kernel(x_ref, w_ref, s_ref, b_ref, o_ref):
    acc = jnp.dot(x_ref[...], w_ref[...], preferred_element_type=jnp.float32)
    o_ref[...] = (acc * s_ref[...] + b_ref[...]).astype(o_ref.dtype)


def conv1x1_bn(x_nhwc, w_oihw, scale, bias, stride):
    """ConvNet(op_type='pre_ops_cell'): Conv2d(1x1, stride, bias=False) -> BN (folded)."""
    if stride > 1:
        # 1x1 conv with stride only reads these pixels; XLA fuses this with the
        # NCHW->NHWC transpose feeding the kernel operand.
        x_nhwc = x_nhwc[:, ::stride, ::stride, :]
    b, h, w, cin = x_nhwc.shape
    cout = w_oihw.shape[0]
    n = b * h * w
    tr = min(512, _round_up(n, 8))               # row tile (multiple of 8 sublanes)
    n_pad = _round_up(n, tr)
    x2 = x_nhwc.reshape(n, cin).astype(jnp.bfloat16)
    if n_pad != n:
        x2 = jnp.pad(x2, ((0, n_pad - n), (0, 0)))
    w_mat = w_oihw[:, :, 0, 0].T.astype(jnp.bfloat16)                  # (Cin, Cout)

    out = pl.pallas_call(
        _conv1x1_bn_kernel,
        out_shape=jax.ShapeDtypeStruct((n_pad, cout), jnp.bfloat16),
        grid=(n_pad // tr,),
        in_specs=[
            pl.BlockSpec((tr, cin), lambda i: (i, 0)),                 # row-tiled acts
            pl.BlockSpec((cin, cout), lambda i: (0, 0)),               # resident weight
            pl.BlockSpec((1, cout), lambda i: (0, 0)),                 # resident scale
            pl.BlockSpec((1, cout), lambda i: (0, 0)),                 # resident bias
        ],
        out_specs=pl.BlockSpec((tr, cout), lambda i: (i, 0)),
        compiler_params=pltpu.CompilerParams(dimension_semantics=("parallel",)),
        cost_estimate=pl.CostEstimate(
            flops=2 * n_pad * cin * cout,
            transcendentals=0,
            bytes_accessed=int(2 * n_pad * (cin + cout) + 2 * cin * cout + 8 * cout)),
    )(x2, w_mat, scale.reshape(1, -1).astype(jnp.float32),
      bias.reshape(1, -1).astype(jnp.float32))
    return out[:n].reshape(b, h, w, cout)


# ----------------- kernel 2: fused node (op_x + op_y + add) ------------------ #

def _pad_and_split(x_bf16, stride):
    """Zero-pad (pad=1) and, for stride 2, split once into the 4 (H,W)-parity phases so
    that every 3x3 tap becomes a *contiguous* (Ho, Wo) window of one phase tensor.
    Returns (list_of_phase_arrays, taps) with taps[k] = (phase_idx, dh, dw), k = kh*3+kw."""
    xp = jnp.pad(x_bf16, ((0, 0), (1, 1), (1, 1), (0, 0)))
    if stride == 1:
        taps = [(0, kh, kw) for kh in range(3) for kw in range(3)]
        return [xp], taps
    assert stride == 2
    phases = [xp[:, ph::2, pw::2, :] for ph in range(2) for pw in range(2)]
    taps = [(2 * (kh % 2) + (kw % 2), kh // 2, kw // 2)
            for kh in range(3) for kw in range(3)]
    return phases, taps


def _pool_inv_count(h, w, stride):
    """Static 1/count map for AvgPool2d(3, stride, pad=1, count_include_pad=False)."""
    ho = (h - 1) // stride + 1
    wo = (w - 1) // stride + 1
    oh = np.arange(ho) * stride
    ow = np.arange(wo) * stride
    cnt = np.zeros((ho, wo), np.float32)
    for kh in range(3):
        for kw in range(3):
            hv = ((oh + kh - 1) >= 0) & ((oh + kh - 1) < h)
            wv = ((ow + kw - 1) >= 0) & ((ow + kw - 1) < w)
            cnt += hv[:, None].astype(np.float32) * wv[None, :].astype(np.float32)
    return jnp.asarray((1.0 / cnt)[:, :, None])            # (Ho, Wo, 1) f32


def _prep_op(x, op_id, stride, p):
    """Build the kernel inputs + static config for one node op."""
    phases, taps = _pad_and_split(x.astype(jnp.bfloat16), stride)
    cfg = dict(op=op_id, taps=taps, n_phases=len(phases))
    inputs = list(phases)
    batched = [True] * len(phases)
    if op_id == OP_CONV3x3:
        w = p['w']                                          # OIHW (Cout, Cin, 3, 3)
        cout, cin = w.shape[0], w.shape[1]
        wk = jnp.transpose(w, (2, 3, 1, 0)).reshape(9, cin, cout)     # k = kh*3+kw
        inputs += [wk.astype(jnp.bfloat16),
                   p['scale'].reshape(1, 1, -1).astype(jnp.float32),
                   p['bias'].reshape(1, 1, -1).astype(jnp.float32)]
        batched += [False, False, False]
    elif op_id == OP_AVG_POOL3x3:
        inputs += [_pool_inv_count(x.shape[1], x.shape[2], stride)]
        batched += [False]
    else:
        raise ValueError(f"unknown op id {op_id}")
    cfg['n_refs'] = len(inputs)
    return cfg, inputs, batched


def _op_body(cfg, refs, ho, wo):
    """In-kernel body of a single node op; returns a (Ho, Wo, C) f32 value."""
    phase_refs = refs[:cfg['n_phases']]
    extra = refs[cfg['n_phases']:]
    taps = cfg['taps']

    def tap_slice(k):
        p, dh, dw = taps[k]
        return phase_refs[p][0, dh:dh + ho, dw:dw + wo, :]  # contiguous (Ho, Wo, C)

    if cfg['op'] == OP_CONV3x3:
        w_ref, s_ref, b_ref = extra
        cin, cout = w_ref.shape[1], w_ref.shape[2]
        acc = jnp.zeros((ho, wo, cout), jnp.float32)
        for k in range(9):                                  # 9 shifted matmuls, f32 acc
            xk = jnp.maximum(tap_slice(k), 0)               # ReLU on un-expanded data
            wk = jnp.broadcast_to(w_ref[k][None], (ho, cin, cout))
            acc = acc + lax.dot_general(
                xk, wk, (((2,), (1,)), ((0,), (0,))),
                preferred_element_type=jnp.float32)
        return acc * s_ref[...] + b_ref[...]                # folded BN epilogue
    else:                                                   # avg pool, count_include_pad=False
        inv_ref, = extra
        c = phase_refs[0].shape[-1]
        acc = jnp.zeros((ho, wo, c), jnp.float32)
        for k in range(9):
            acc = acc + tap_slice(k).astype(jnp.float32)
        return acc * inv_ref[...]


def _make_node_kernel(x_cfg, y_cfg, ho, wo):
    nx = x_cfg['n_refs']

    def kernel(*refs):
        o_ref = refs[-1]
        x_out = _op_body(x_cfg, refs[:nx], ho, wo)
        y_out = _op_body(y_cfg, refs[nx:-1], ho, wo)
        o_ref[...] = (x_out + y_out)[None].astype(o_ref.dtype)   # fused add + store
    return kernel


def node_forward(x, x_op, x_stride, x_params, y, y_op, y_stride, y_params, channels):
    b = x.shape[0]
    hox, wox = (x.shape[1] - 1) // x_stride + 1, (x.shape[2] - 1) // x_stride + 1
    hoy, woy = (y.shape[1] - 1) // y_stride + 1, (y.shape[2] - 1) // y_stride + 1
    # TODO(synk): general consistent_dim() (nearest interpolate) fallback if the two op
    # outputs ever differed in spatial size; in cellDown (transpose=False) they never do.
    assert (hox, wox) == (hoy, woy)
    ho, wo = hox, wox

    x_cfg, x_in, x_b = _prep_op(x, x_op, x_stride, x_params)
    y_cfg, y_in, y_b = _prep_op(y, y_op, y_stride, y_params)
    inputs = x_in + y_in
    batched = x_b + y_b

    def make_spec(a, is_batched):
        nd = a.ndim
        if is_batched:      # per-batch activation block
            return pl.BlockSpec((1,) + a.shape[1:], lambda i, nd=nd: (i,) + (0,) * (nd - 1))
        return pl.BlockSpec(a.shape, lambda i, nd=nd: (0,) * nd)   # resident block

    in_specs = [make_spec(a, f) for a, f in zip(inputs, batched)]

    flops = 0
    for cfg in (x_cfg, y_cfg):
        if cfg['op'] == OP_CONV3x3:
            flops += 2 * b * ho * wo * 9 * channels * channels
    bytes_accessed = int(sum(int(np.prod(a.shape)) * a.dtype.itemsize for a in inputs)
                         + b * ho * wo * channels * 2)

    return pl.pallas_call(
        _make_node_kernel(x_cfg, y_cfg, ho, wo),
        out_shape=jax.ShapeDtypeStruct((b, ho, wo, channels), jnp.bfloat16),
        grid=(b,),
        in_specs=in_specs,
        out_specs=pl.BlockSpec((1, ho, wo, channels), lambda i: (i, 0, 0, 0)),
        compiler_params=pltpu.CompilerParams(dimension_semantics=("parallel",)),
        cost_estimate=pl.CostEstimate(flops=flops, transcendentals=0,
                                      bytes_accessed=bytes_accessed),
    )(*inputs)


# ------------------------------ cellDown forward ----------------------------- #

def cell_down_forward(params, arch, s0_nchw, s1_nchw):
    s0 = jnp.transpose(s0_nchw, (0, 2, 3, 1))               # NCHW -> NHWC (C on lanes)
    s1 = jnp.transpose(s1_nchw, (0, 2, 3, 1))
    p0, p1 = params['pre0'], params['pre1']
    s0 = conv1x1_bn(s0, p0['w'], p0['scale'], p0['bias'], stride=2)
    s1 = conv1x1_bn(s1, p1['w'], p1['scale'], p1['bias'], stride=1)
    states = [s0, s1]
    nodes = len(arch) // 4
    channels = s0.shape[-1]
    stride = 2
    for i in range(nodes):
        x_id, x_op, y_id, y_op = arch[4 * i: 4 * i + 4]
        x_stride = stride if x_id in (0, 1) else 1
        y_stride = stride if y_id in (0, 1) else 1
        out = node_forward(states[x_id], x_op, x_stride, params[f'node{i}_x'],
                           states[y_id], y_op, y_stride, params[f'node{i}_y'],
                           channels)
        states.append(out)
    out = jnp.concatenate(states[-nodes:], axis=-1)         # concat over channels
    return jnp.transpose(out, (0, 3, 1, 2)).astype(jnp.float32)   # back to NCHW


# --------------------------------- parameters -------------------------------- #

def _fold_bn(gamma, beta, mean, var, eps=1e-5):
    scale = gamma / jnp.sqrt(var + eps)
    return scale, beta - mean * scale


def init_params(key, ch_prev_2, ch_prev, channels, arch):
    nodes = len(arch) // 4
    keys = jax.random.split(key, 4 + 4 * nodes)

    def conv_bn(k, cin, cout, ksz):
        k1, k2, k3 = jax.random.split(k, 3)
        w = 0.1 * jax.random.normal(k1, (cout, cin, ksz, ksz), jnp.float32)   # OIHW
        gamma = 1.0 + 0.1 * jax.random.normal(k2, (cout,), jnp.float32)
        beta = 0.1 * jax.random.normal(k3, (cout,), jnp.float32)
        scale, bias = _fold_bn(gamma, beta, jnp.zeros((cout,)), jnp.ones((cout,)))
        return {'w': w, 'scale': scale, 'bias': bias}

    params = {
        'pre0': conv_bn(keys[0], ch_prev_2, channels, 1),
        'pre1': conv_bn(keys[1], ch_prev, channels, 1),
    }
    for i in range(nodes):
        x_op, y_op = arch[4 * i + 1], arch[4 * i + 3]
        params[f'node{i}_x'] = conv_bn(keys[2 + 2 * i], channels, channels, 3) if x_op == OP_CONV3x3 else None
        params[f'node{i}_y'] = conv_bn(keys[3 + 2 * i], channels, channels, 3) if y_op == OP_CONV3x3 else None
    return params


# --------------------------- pure-JAX f32 reference --------------------------- #

def ref_cell_down(params, arch, s0, s1):
    dn = ('NCHW', 'OIHW', 'NCHW')

    def bn(x, s, b):
        return x * s[None, :, None, None] + b[None, :, None, None]

    def conv1x1(x, p, stride):
        return bn(lax.conv_general_dilated(x, p['w'], (stride, stride), 'VALID',
                                           dimension_numbers=dn), p['scale'], p['bias'])

    def conv3x3(x, p, stride):
        return bn(lax.conv_general_dilated(jnp.maximum(x, 0.0), p['w'], (stride, stride),
                                           ((1, 1), (1, 1)), dimension_numbers=dn),
                  p['scale'], p['bias'])

    def avgpool(x, stride):
        win, strd = (1, 1, 3, 3), (1, 1, stride, stride)
        pad = ((0, 0), (0, 0), (1, 1), (1, 1))
        summed = lax.reduce_window(x, 0.0, lax.add, win, strd, pad)
        cnt = lax.reduce_window(jnp.ones_like(x), 0.0, lax.add, win, strd, pad)
        return summed / cnt

    def op(op_id, x, p, stride):
        return conv3x3(x, p, stride) if op_id == OP_CONV3x3 else avgpool(x, stride)

    s0 = conv1x1(s0, params['pre0'], 2)
    s1 = conv1x1(s1, params['pre1'], 1)
    states = [s0, s1]
    nodes = len(arch) // 4
    for i in range(nodes):
        x_id, x_op, y_id, y_op = arch[4 * i: 4 * i + 4]
        xs = 2 if x_id in (0, 1) else 1
        ys = 2 if y_id in (0, 1) else 1
        x = op(x_op, states[x_id], params[f'node{i}_x'], xs)
        y = op(y_op, states[y_id], params[f'node{i}_y'], ys)
        states.append(x + y)            # consistent_dim is identity for this module
    return jnp.concatenate(states[-nodes:], axis=1)


# ------------------------------------ main ------------------------------------ #

if __name__ == "__main__":
    key = jax.random.PRNGKey(0)
    k0, k1, kp = jax.random.split(key, 3)

    B, ch_prev_2, ch_prev, channels = 2, 4, 6, 8
    H = W = 16
    # arch of 2 nodes: [x_id, x_op, y_id, y_op] * nodes
    arch = [0, OP_CONV3x3, 1, OP_AVG_POOL3x3,
            2, OP_CONV3x3, 1, OP_CONV3x3]

    s0 = jax.random.normal(k0, (B, ch_prev_2, H, W), jnp.float32)           # NCHW
    s1 = jax.random.normal(k1, (B, ch_prev, H // 2, W // 2), jnp.float32)   # NCHW

    params = init_params(kp, ch_prev_2, ch_prev, channels, arch)

    fwd = jax.jit(functools.partial(cell_down_forward, params, arch))
    out = jax.block_until_ready(fwd(s0, s1))
    assert out.shape == (B, (len(arch) // 4) * channels, H // 4, W // 4), out.shape

    # bf16 activation/weight streams (f32 accumulation) vs. an all-f32 reference:
    # use a tolerance sized for bf16 rounding, still far below real-bug error scales.
    ref = ref_cell_down(params, arch, s0, s1)
    np.testing.assert_allclose(np.asarray(out), np.asarray(ref), rtol=5e-2, atol=5e-2)

    print("KERNEL_OK")
</pallas_src>

<mosaic_0001>
module attributes {stable_mosaic.version = 11 : i64} {
  func.func @_conv1x1_bn_kernel(%arg0: i32, %arg1: memref<128x6xbf16, #tpu.memory_space<vmem>>, %arg2: memref<6x8xbf16, #tpu.memory_space<vmem>>, %arg3: memref<1x8xf32, #tpu.memory_space<vmem>>, %arg4: memref<1x8xf32, #tpu.memory_space<vmem>>, %arg5: memref<128x8xbf16, #tpu.memory_space<vmem>>) attributes {dimension_semantics = [#tpu.dimension_semantics<parallel>], iteration_bounds = array<i64: 1>, scalar_prefetch = 0 : i64, scratch_operands = 0 : i64, tpu.core_type = #tpu.core_type<tc>, window_params = [{transform_indices = @transform_0, window_bounds = array<i64: 128, 6>}, {pipeline_mode = #tpu.pipeline_mode<synchronous>, transform_indices = @transform_1, window_bounds = array<i64: 6, 8>}, {pipeline_mode = #tpu.pipeline_mode<synchronous>, transform_indices = @transform_2, window_bounds = array<i64: 1, 8>}, {pipeline_mode = #tpu.pipeline_mode<synchronous>, transform_indices = @transform_3, window_bounds = array<i64: 1, 8>}, {transform_indices = @transform_4, window_bounds = array<i64: 128, 8>}]} {
    %c0 = arith.constant 0 : index
    %c0_0 = arith.constant 0 : index
    %0 = vector.load %arg1[%c0, %c0_0] : memref<128x6xbf16, #tpu.memory_space<vmem>>, vector<128x6xbf16>
    %c0_1 = arith.constant 0 : index
    %c0_2 = arith.constant 0 : index
    %1 = vector.load %arg2[%c0_1, %c0_2] : memref<6x8xbf16, #tpu.memory_space<vmem>>, vector<6x8xbf16>
    %cst = arith.constant dense<0.000000e+00> : vector<128x8xf32>
    %2 = tpu.matmul %0, %1, %cst {dimension_numbers = #tpu.dot_dimension_numbers<[1], [0], [0], [1], [0, 0, 1, 1], [], []>} : vector<128x6xbf16>, vector<6x8xbf16>, vector<128x8xf32> -> vector<128x8xf32>
    %c0_3 = arith.constant 0 : index
    %c0_4 = arith.constant 0 : index
    %3 = vector.load %arg3[%c0_3, %c0_4] : memref<1x8xf32, #tpu.memory_space<vmem>>, vector<1x8xf32>
    %4 = vector.broadcast %3 : vector<1x8xf32> to vector<128x8xf32>
    %5 = arith.mulf %2, %4 : vector<128x8xf32>
    %c0_5 = arith.constant 0 : index
    %c0_6 = arith.constant 0 : index
    %6 = vector.load %arg4[%c0_5, %c0_6] : memref<1x8xf32, #tpu.memory_space<vmem>>, vector<1x8xf32>
    %7 = vector.broadcast %6 : vector<1x8xf32> to vector<128x8xf32>
    %8 = arith.addf %5, %7 : vector<128x8xf32>
    %9 = arith.truncf %8 : vector<128x8xf32> to vector<128x8xbf16>
    %c0_7 = arith.constant 0 : index
    %c0_8 = arith.constant 0 : index
    %10 = vector.load %arg5[%c0_7, %c0_8] : memref<128x8xbf16, #tpu.memory_space<vmem>>, vector<128x8xbf16>
    tpu.vector_store %arg5[%c0_7, %c0_8], %9 {strides = array<i32>} : memref<128x8xbf16, #tpu.memory_space<vmem>>, vector<128x8xbf16>,
    return
  }
  func.func @transform_0(%arg0: i32) -> (i32, i32) {
    %c0_i32 = arith.constant 0 : i32
    %c0_i32_0 = arith.constant 0 : i32
    return %arg0, %c0_i32 : i32, i32
  }
  func.func @transform_1(%arg0: i32) -> (i32, i32) {
    %c0_i32 = arith.constant 0 : i32
    %c0_i32_0 = arith.constant 0 : i32
    %c0_i32_1 = arith.constant 0 : i32
    return %c0_i32, %c0_i32_0 : i32, i32
  }
  func.func @transform_2(%arg0: i32) -> (i32, i32) {
    %c0_i32 = arith.constant 0 : i32
    %c0_i32_0 = arith.constant 0 : i32
    %c0_i32_1 = arith.constant 0 : i32
    return %c0_i32, %c0_i32_0 : i32, i32
  }
  func.func @transform_3(%arg0: i32) -> (i32, i32) {
    %c0_i32 = arith.constant 0 : i32
    %c0_i32_0 = arith.constant 0 : i32
    %c0_i32_1 = arith.constant 0 : i32
    return %c0_i32, %c0_i32_0 : i32, i32
  }
  func.func @transform_4(%arg0: i32) -> (i32, i32) {
    %c0_i32 = arith.constant 0 : i32
    %c0_i32_0 = arith.constant 0 : i32
    return %arg0, %c0_i32 : i32, i32
  }
}

module attributes {stable_mosaic.version = 11 : i64} {
  func.func @_conv1x1_bn_kernel(%arg0: i32, %arg1: memref<128x4xbf16, #tpu.memory_space<vmem>>, %arg2: memref<4x8xbf16, #tpu.memory_space<vmem>>, %arg3: memref<1x8xf32, #tpu.memory_space<vmem>>, %arg4: memref<1x8xf32, #tpu.memory_space<vmem>>, %arg5: memref<128x8xbf16, #tpu.memory_space<vmem>>) attributes {dimension_semantics = [#tpu.dimension_semantics<parallel>], iteration_bounds = array<i64: 1>, scalar_prefetch = 0 : i64, scratch_operands = 0 : i64, tpu.core_type = #tpu.core_type<tc>, window_params = [{transform_indices = @transform_0, window_bounds = array<i64: 128, 4>}, {pipeline_mode = #tpu.pipeline_mode<synchronous>, transform_indices = @transform_1, window_bounds = array<i64: 4, 8>}, {pipeline_mode = #tpu.pipeline_mode<synchronous>, transform_indices = @transform_2, window_bounds = array<i64: 1, 8>}, {pipeline_mode = #tpu.pipeline_mode<synchronous>, transform_indices = @transform_3, window_bounds = array<i64: 1, 8>}, {transform_indices = @transform_4, window_bounds = array<i64: 128, 8>}]} {
    %c0 = arith.constant 0 : index
    %c0_0 = arith.constant 0 : index
    %0 = vector.load %arg1[%c0, %c0_0] : memref<128x4xbf16, #tpu.memory_space<vmem>>, vector<128x4xbf16>
    %c0_1 = arith.constant 0 : index
    %c0_2 = arith.constant 0 : index
    %1 = vector.load %arg2[%c0_1, %c0_2] : memref<4x8xbf16, #tpu.memory_space<vmem>>, vector<4x8xbf16>
    %cst = arith.constant dense<0.000000e+00> : vector<128x8xf32>
    %2 = tpu.matmul %0, %1, %cst {dimension_numbers = #tpu.dot_dimension_numbers<[1], [0], [0], [1], [0, 0, 1, 1], [], []>} : vector<128x4xbf16>, vector<4x8xbf16>, vector<128x8xf32> -> vector<128x8xf32>
    %c0_3 = arith.constant 0 : index
    %c0_4 = arith.constant 0 : index
    %3 = vector.load %arg3[%c0_3, %c0_4] : memref<1x8xf32, #tpu.memory_space<vmem>>, vector<1x8xf32>
    %4 = vector.broadcast %3 : vector<1x8xf32> to vector<128x8xf32>
    %5 = arith.mulf %2, %4 : vector<128x8xf32>
    %c0_5 = arith.constant 0 : index
    %c0_6 = arith.constant 0 : index
    %6 = vector.load %arg4[%c0_5, %c0_6] : memref<1x8xf32, #tpu.memory_space<vmem>>, vector<1x8xf32>
    %7 = vector.broadcast %6 : vector<1x8xf32> to vector<128x8xf32>
    %8 = arith.addf %5, %7 : vector<128x8xf32>
    %9 = arith.truncf %8 : vector<128x8xf32> to vector<128x8xbf16>
    %c0_7 = arith.constant 0 : index
    %c0_8 = arith.constant 0 : index
    %10 = vector.load %arg5[%c0_7, %c0_8] : memref<128x8xbf16, #tpu.memory_space<vmem>>, vector<128x8xbf16>
    tpu.vector_store %arg5[%c0_7, %c0_8], %9 {strides = array<i32>} : memref<128x8xbf16, #tpu.memory_space<vmem>>, vector<128x8xbf16>,
    return
  }
  func.func @transform_0(%arg0: i32) -> (i32, i32) {
    %c0_i32 = arith.constant 0 : i32
    %c0_i32_0 = arith.constant 0 : i32
    return %arg0, %c0_i32 : i32, i32
  }
  func.func @transform_1(%arg0: i32) -> (i32, i32) {
    %c0_i32 = arith.constant 0 : i32
    %c0_i32_0 = arith.constant 0 : i32
    %c0_i32_1 = arith.constant 0 : i32
    return %c0_i32, %c0_i32_0 : i32, i32
  }
  func.func @transform_2(%arg0: i32) -> (i32, i32) {
    %c0_i32 = arith.constant 0 : i32
    %c0_i32_0 = arith.constant 0 : i32
    %c0_i32_1 = arith.constant 0 : i32
    return %c0_i32, %c0_i32_0 : i32, i32
  }
  func.func @transform_3(%arg0: i32) -> (i32, i32) {
    %c0_i32 = arith.constant 0 : i32
    %c0_i32_0 = arith.constant 0 : i32
    %c0_i32_1 = arith.constant 0 : i32
    return %c0_i32, %c0_i32_0 : i32, i32
  }
  func.func @transform_4(%arg0: i32) -> (i32, i32) {
    %c0_i32 = arith.constant 0 : i32
    %c0_i32_0 = arith.constant 0 : i32
    return %arg0, %c0_i32 : i32, i32
  }
}

module attributes {stable_mosaic.version = 11 : i64} {
  func.func @kernel(%arg0: i32, %arg1: memref<1x5x5x8xbf16, #tpu.memory_space<vmem>>, %arg2: memref<1x5x5x8xbf16, #tpu.memory_space<vmem>>, %arg3: memref<1x5x5x8xbf16, #tpu.memory_space<vmem>>, %arg4: memref<1x5x5x8xbf16, #tpu.memory_space<vmem>>, %arg5: memref<9x8x8xbf16, #tpu.memory_space<vmem>>, %arg6: memref<1x1x8xf32, #tpu.memory_space<vmem>>, %arg7: memref<1x1x8xf32, #tpu.memory_space<vmem>>, %arg8: memref<1x5x5x8xbf16, #tpu.memory_space<vmem>>, %arg9: memref<1x5x5x8xbf16, #tpu.memory_space<vmem>>, %arg10: memref<1x5x5x8xbf16, #tpu.memory_space<vmem>>, %arg11: memref<1x5x5x8xbf16, #tpu.memory_space<vmem>>, %arg12: memref<4x4x1xf32, #tpu.memory_space<vmem>>, %arg13: memref<1x4x4x8xbf16, #tpu.memory_space<vmem>>) attributes {dimension_semantics = [#tpu.dimension_semantics<parallel>], iteration_bounds = array<i64: 2>, scalar_prefetch = 0 : i64, scratch_operands = 0 : i64, tpu.core_type = #tpu.core_type<tc>, window_params = [{transform_indices = @transform_0, window_bounds = array<i64: 1, 5, 5, 8>}, {transform_indices = @transform_1, window_bounds = array<i64: 1, 5, 5, 8>}, {transform_indices = @transform_2, window_bounds = array<i64: 1, 5, 5, 8>}, {transform_indices = @transform_3, window_bounds = array<i64: 1, 5, 5, 8>}, {pipeline_mode = #tpu.pipeline_mode<synchronous>, transform_indices = @transform_4, window_bounds = array<i64: 9, 8, 8>}, {pipeline_mode = #tpu.pipeline_mode<synchronous>, transform_indices = @transform_5, window_bounds = array<i64: 1, 1, 8>}, {pipeline_mode = #tpu.pipeline_mode<synchronous>, transform_indices = @transform_6, window_bounds = array<i64: 1, 1, 8>}, {transform_indices = @transform_7, window_bounds = array<i64: 1, 5, 5, 8>}, {transform_indices = @transform_8, window_bounds = array<i64: 1, 5, 5, 8>}, {transform_indices = @transform_9, window_bounds = array<i64: 1, 5, 5, 8>}, {transform_indices = @transform_10, window_bounds = array<i64: 1, 5, 5, 8>}, {pipeline_mode = #tpu.pipeline_mode<synchronous>, transform_indices = @transform_11, window_bounds = array<i64: 4, 4, 1>}, {transform_indices = @transform_12, window_bounds = array<i64: 1, 4, 4, 8>}]} {
    %cst = arith.constant 0.000000e+00 : f32
    %0 = vector.broadcast %cst : f32 to vector<4x4x8xf32>
    %c0 = arith.constant 0 : index
    %c0_0 = arith.constant 0 : index
    %c0_1 = arith.constant 0 : index
    %c0_2 = arith.constant 0 : index
    %1 = vector.load %arg1[%c0, %c0_0, %c0_1, %c0_2] : memref<1x5x5x8xbf16, #tpu.memory_space<vmem>>, vector<1x4x4x8xbf16>
    %2 = vector.shape_cast %1 : vector<1x4x4x8xbf16> to vector<4x4x8xbf16>
    %cst_3 = arith.constant 0.000000e+00 : bf16
    %3 = vector.broadcast %cst_3 : bf16 to vector<4x4x8xbf16>
    %4 = arith.maximumf %2, %3 : vector<4x4x8xbf16>
    %c0_4 = arith.constant 0 : index
    %c0_5 = arith.constant 0 : index
    %c0_6 = arith.constant 0 : index
    %5 = vector.load %arg5[%c0_4, %c0_5, %c0_6] : memref<9x8x8xbf16, #tpu.memory_space<vmem>>, vector<1x8x8xbf16>
    %6 = vector.shape_cast %5 : vector<1x8x8xbf16> to vector<8x8xbf16>
    %7 = vector.shape_cast %6 : vector<8x8xbf16> to vector<1x8x8xbf16>
    %8 = vector.shape_cast %7 : vector<1x8x8xbf16> to vector<1x8x8xbf16>
    %9 = vector.broadcast %8 : vector<1x8x8xbf16> to vector<4x8x8xbf16>
    %cst_7 = arith.constant dense<0.000000e+00> : vector<4x4x8xf32>
    %10 = tpu.matmul %4, %9, %cst_7 {dimension_numbers = #tpu.dot_dimension_numbers<[2], [1], [1], [2], [0, 0, 0, 1, 1, 2], [0], [0]>} : vector<4x4x8xbf16>, vector<4x8x8xbf16>, vector<4x4x8xf32> -> vector<4x4x8xf32>
    %11 = arith.addf %0, %10 : vector<4x4x8xf32>
    %c0_8 = arith.constant 0 : index
    %c0_9 = arith.constant 0 : index
    %c0_10 = arith.constant 0 : index
    %c0_11 = arith.constant 0 : index
    %12 = vector.load %arg2[%c0_8, %c0_9, %c0_10, %c0_11] : memref<1x5x5x8xbf16, #tpu.memory_space<vmem>>, vector<1x4x4x8xbf16>
    %13 = vector.shape_cast %12 : vector<1x4x4x8xbf16> to vector<4x4x8xbf16>
    %cst_12 = arith.constant 0.000000e+00 : bf16
    %14 = vector.broadcast %cst_12 : bf16 to vector<4x4x8xbf16>
    %15 = arith.maximumf %13, %14 : vector<4x4x8xbf16>
    %c1 = arith.constant 1 : index
    %c0_13 = arith.constant 0 : index
    %c0_14 = arith.constant 0 : index
    %16 = vector.load %arg5[%c1, %c0_13, %c0_14] : memref<9x8x8xbf16, #tpu.memory_space<vmem>>, vector<1x8x8xbf16>
    %17 = vector.shape_cast %16 : vector<1x8x8xbf16> to vector<8x8xbf16>
    %18 = vector.shape_cast %17 : vector<8x8xbf16> to vector<1x8x8xbf16>
    %19 = vector.shape_cast %18 : vector<1x8x8xbf16> to vector<1x8x8xbf16>
    %20 = vector.broadcast %19 : vector<1x8x8xbf16> to vector<4x8x8xbf16>
    %cst_15 = arith.constant dense<0.000000e+00> : vector<4x4x8xf32>
    %21 = tpu.matmul %15, %20, %cst_15 {dimension_numbers = #tpu.dot_dimension_numbers<[2], [1], [1], [2], [0, 0, 0, 1, 1, 2], [0], [0]>} : vector<4x4x8xbf16>, vector<4x8x8xbf16>, vector<4x4x8xf32> -> vector<4x4x8xf32>
    %22 = arith.addf %11, %21 : vector<4x4x8xf32>
    %c0_16 = arith.constant 0 : index
    %c0_17 = arith.constant 0 : index
    %c1_18 = arith.constant 1 : index
    %c0_19 = arith.constant 0 : index
    %23 = vector.load %arg1[%c0_16, %c0_17, %c1_18, %c0_19] : memref<1x5x5x8xbf16, #tpu.memory_space<vmem>>, vector<1x4x4x8xbf16>
    %24 = vector.shape_cast %23 : vector<1x4x4x8xbf16> to vector<4x4x8xbf16>
    %cst_20 = arith.constant 0.000000e+00 : bf16
    %25 = vector.broadcast %cst_20 : bf16 to vector<4x4x8xbf16>
    %26 = arith.maximumf %24, %25 : vector<4x4x8xbf16>
    %c2 = arith.constant 2 : index
    %c0_21 = arith.constant 0 : index
    %c0_22 = arith.constant 0 : index
    %27 = vector.load %arg5[%c2, %c0_21, %c0_22] : memref<9x8x8xbf16, #tpu.memory_space<vmem>>, vector<1x8x8xbf16>
    %28 = vector.shape_cast %27 : vector<1x8x8xbf16> to vector<8x8xbf16>
    %29 = vector.shape_cast %28 : vector<8x8xbf16> to vector<1x8x8xbf16>
    %30 = vector.shape_cast %29 : vector<1x8x8xbf16> to vector<1x8x8xbf16>
    %31 = vector.broadcast %30 : vector<1x8x8xbf16> to vector<4x8x8xbf16>
    %cst_23 = arith.constant dense<0.000000e+00> : vector<4x4x8xf32>
    %32 = tpu.matmul %26, %31, %cst_23 {dimension_numbers = #tpu.dot_dimension_numbers<[2], [1], [1], [2], [0, 0, 0, 1, 1, 2], [0], [0]>} : vector<4x4x8xbf16>, vector<4x8x8xbf16>, vector<4x4x8xf32> -> vector<4x4x8xf32>
    %33 = arith.addf %22, %32 : vector<4x4x8xf32>
    %c0_24 = arith.constant 0 : index
    %c0_25 = arith.constant 0 : index
    %c0_26 = arith.constant 0 : index
    %c0_27 = arith.constant 0 : index
    %34 = vector.load %arg3[%c0_24, %c0_25, %c0_26, %c0_27] : memref<1x5x5x8xbf16, #tpu.memory_space<vmem>>, vector<1x4x4x8xbf16>
    %35 = vector.shape_cast %34 : vector<1x4x4x8xbf16> to vector<4x4x8xbf16>
    %cst_28 = arith.constant 0.000000e+00 : bf16
    %36 = vector.broadcast %cst_28 : bf16 to vector<4x4x8xbf16>
    %37 = arith.maximumf %35, %36 : vector<4x4x8xbf16>
    %c3 = arith.constant 3 : index
    %c0_29 = arith.constant 0 : index
    %c0_30 = arith.constant 0 : index
    %38 = vector.load %arg5[%c3, %c0_29, %c0_30] : memref<9x8x8xbf16, #tpu.memory_space<vmem>>, vector<1x8x8xbf16>
    %39 = vector.shape_cast %38 : vector<1x8x8xbf16> to vector<8x8xbf16>
    %40 = vector.shape_cast %39 : vector<8x8xbf16> to vector<1x8x8xbf16>
    %41 = vector.shape_cast %40 : vector<1x8x8xbf16> to vector<1x8x8xbf16>
    %42 = vector.broadcast %41 : vector<1x8x8xbf16> to vector<4x8x8xbf16>
    %cst_31 = arith.constant dense<0.000000e+00> : vector<4x4x8xf32>
    %43 = tpu.matmul %37, %42, %cst_31 {dimension_numbers = #tpu.dot_dimension_numbers<[2], [1], [1], [2], [0, 0, 0, 1, 1, 2], [0], [0]>} : vector<4x4x8xbf16>, vector<4x8x8xbf16>, vector<4x4x8xf32> -> vector<4x4x8xf32>
    %44 = arith.addf %33, %43 : vector<4x4x8xf32>
    %c0_32 = arith.constant 0 : index
    %c0_33 = arith.constant 0 : index
    %c0_34 = arith.constant 0 : index
    %c0_35 = arith.constant 0 : index
    %45 = vector.load %arg4[%c0_32, %c0_33, %c0_34, %c0_35] : memref<1x5x5x8xbf16, #tpu.memory_space<vmem>>, vector<1x4x4x8xbf16>
    %46 = vector.shape_cast %45 : vector<1x4x4x8xbf16> to vector<4x4x8xbf16>
    %cst_36 = arith.constant 0.000000e+00 : bf16
    %47 = vector.broadcast %cst_36 : bf16 to vector<4x4x8xbf16>
    %48 = arith.maximumf %46, %47 : vector<4x4x8xbf16>
    %c4 = arith.constant 4 : index
    %c0_37 = arith.constant 0 : index
    %c0_38 = arith.constant 0 : index
    %49 = vector.load %arg5[%c4, %c0_37, %c0_38] : memref<9x8x8xbf16, #tpu.memory_space<vmem>>, vector<1x8x8xbf16>
    %50 = vector.shape_cast %49 : vector<1x8x8xbf16> to vector<8x8xbf16>
    %51 = vector.shape_cast %50 : vector<8x8xbf16> to vector<1x8x8xbf16>
    %52 = vector.shape_cast %51 : vector<1x8x8xbf16> to vector<1x8x8xbf16>
    %53 = vector.broadcast %52 : vector<1x8x8xbf16> to vector<4x8x8xbf16>
    %cst_39 = arith.constant dense<0.000000e+00> : vector<4x4x8xf32>
    %54 = tpu.matmul %48, %53, %cst_39 {dimension_numbers = #tpu.dot_dimension_numbers<[2], [1], [1], [2], [0, 0, 0, 1, 1, 2], [0], [0]>} : vector<4x4x8xbf16>, vector<4x8x8xbf16>, vector<4x4x8xf32> -> vector<4x4x8xf32>
    %55 = arith.addf %44, %54 : vector<4x4x8xf32>
    %c0_40 = arith.constant 0 : index
    %c0_41 = arith.constant 0 : index
    %c1_42 = arith.constant 1 : index
    %c0_43 = arith.constant 0 : index
    %56 = vector.load %arg3[%c0_40, %c0_41, %c1_42, %c0_43] : memref<1x5x5x8xbf16, #tpu.memory_space<vmem>>, vector<1x4x4x8xbf16>
    %57 = vector.shape_cast %56 : vector<1x4x4x8xbf16> to vector<4x4x8xbf16>
    %cst_44 = arith.constant 0.000000e+00 : bf16
    %58 = vector.broadcast %cst_44 : bf16 to vector<4x4x8xbf16>
    %59 = arith.maximumf %57, %58 : vector<4x4x8xbf16>
    %c5 = arith.constant 5 : index
    %c0_45 = arith.constant 0 : index
    %c0_46 = arith.constant 0 : index
    %60 = vector.load %arg5[%c5, %c0_45, %c0_46] : memref<9x8x8xbf16, #tpu.memory_space<vmem>>, vector<1x8x8xbf16>
    %61 = vector.shape_cast %60 : vector<1x8x8xbf16> to vector<8x8xbf16>
    %62 = vector.shape_cast %61 : vector<8x8xbf16> to vector<1x8x8xbf16>
    %63 = vector.shape_cast %62 : vector<1x8x8xbf16> to vector<1x8x8xbf16>
    %64 = vector.broadcast %63 : vector<1x8x8xbf16> to vector<4x8x8xbf16>
    %cst_47 = arith.constant dense<0.000000e+00> : vector<4x4x8xf32>
    %65 = tpu.matmul %59, %64, %cst_47 {dimension_numbers = #tpu.dot_dimension_numbers<[2], [1], [1], [2], [0, 0, 0, 1, 1, 2], [0], [0]>} : vector<4x4x8xbf16>, vector<4x8x8xbf16>, vector<4x4x8xf32> -> vector<4x4x8xf32>
    %66 = arith.addf %55, %65 : vector<4x4x8xf32>
    %c0_48 = arith.constant 0 : index
    %c1_49 = arith.constant 1 : index
    %c0_50 = arith.constant 0 : index
    %c0_51 = arith.constant 0 : index
    %67 = vector.load %arg1[%c0_48, %c1_49, %c0_50, %c0_51] : memref<1x5x5x8xbf16, #tpu.memory_space<vmem>>, vector<1x4x4x8xbf16>
    %68 = vector.shape_cast %67 : vector<1x4x4x8xbf16> to vector<4x4x8xbf16>
    %cst_52 = arith.constant 0.000000e+00 : bf16
    %69 = vector.broadcast %cst_52 : bf16 to vector<4x4x8xbf16>
    %70 = arith.maximumf %68, %69 : vector<4x4x8xbf16>
    %c6 = arith.constant 6 : index
    %c0_53 = arith.constant 0 : index
    %c0_54 = arith.constant 0 : index
    %71 = vector.load %arg5[%c6, %c0_53, %c0_54] : memref<9x8x8xbf16, #tpu.memory_space<vmem>>, vector<1x8x8xbf16>
    %72 = vector.shape_cast %71 : vector<1x8x8xbf16> to vector<8x8xbf16>
    %73 = vector.shape_cast %72 : vector<8x8xbf16> to vector<1x8x8xbf16>
    %74 = vector.shape_cast %73 : vector<1x8x8xbf16> to vector<1x8x8xbf16>
    %75 = vector.broadcast %74 : vector<1x8x8xbf16> to vector<4x8x8xbf16>
    %cst_55 = arith.constant dense<0.000000e+00> : vector<4x4x8xf32>
    %76 = tpu.matmul %70, %75, %cst_55 {dimension_numbers = #tpu.dot_dimension_numbers<[2], [1], [1], [2], [0, 0, 0, 1, 1, 2], [0], [0]>} : vector<4x4x8xbf16>, vector<4x8x8xbf16>, vector<4x4x8xf32> -> vector<4x4x8xf32>
    %77 = arith.addf %66, %76 : vector<4x4x8xf32>
    %c0_56 = arith.constant 0 : index
    %c1_57 = arith.constant 1 : index
    %c0_58 = arith.constant 0 : index
    %c0_59 = arith.constant 0 : index
    %78 = vector.load %arg2[%c0_56, %c1_57, %c0_58, %c0_59] : memref<1x5x5x8xbf16, #tpu.memory_space<vmem>>, vector<1x4x4x8xbf16>
    %79 = vector.shape_cast %78 : vector<1x4x4x8xbf16> to vector<4x4x8xbf16>
    %cst_60 = arith.constant 0.000000e+00 : bf16
    %80 = vector.broadcast %cst_60 : bf16 to vector<4x4x8xbf16>
    %81 = arith.maximumf %79, %80 : vector<4x4x8xbf16>
    %c7 = arith.constant 7 : index
    %c0_61 = arith.constant 0 : index
    %c0_62 = arith.constant 0 : index
    %82 = vector.load %arg5[%c7, %c0_61, %c0_62] : memref<9x8x8xbf16, #tpu.memory_space<vmem>>, vector<1x8x8xbf16>
    %83 = vector.shape_cast %82 : vector<1x8x8xbf16> to vector<8x8xbf16>
    %84 = vector.shape_cast %83 : vector<8x8xbf16> to vector<1x8x8xbf16>
    %85 = vector.shape_cast %84 : vector<1x8x8xbf16> to vector<1x8x8xbf16>
    %86 = vector.broadcast %85 : vector<1x8x8xbf16> to vector<4x8x8xbf16>
    %cst_63 = arith.constant dense<0.000000e+00> : vector<4x4x8xf32>
    %87 = tpu.matmul %81, %86, %cst_63 {dimension_numbers = #tpu.dot_dimension_numbers<[2], [1], [1], [2], [0, 0, 0, 1, 1, 2], [0], [0]>} : vector<4x4x8xbf16>, vector<4x8x8xbf16>, vector<4x4x8xf32> -> vector<4x4x8xf32>
    %88 = arith.addf %77, %87 : vector<4x4x8xf32>
    %c0_64 = arith.constant 0 : index
    %c1_65 = arith.constant 1 : index
    %c1_66 = arith.constant 1 : index
    %c0_67 = arith.constant 0 : index
    %89 = vector.load %arg1[%c0_64, %c1_65, %c1_66, %c0_67] : memref<1x5x5x8xbf16, #tpu.memory_space<vmem>>, vector<1x4x4x8xbf16>
    %90 = vector.shape_cast %89 : vector<1x4x4x8xbf16> to vector<4x4x8xbf16>
    %cst_68 = arith.constant 0.000000e+00 : bf16
    %91 = vector.broadcast %cst_68 : bf16 to vector<4x4x8xbf16>
    %92 = arith.maximumf %90, %91 : vector<4x4x8xbf16>
    %c8 = arith.constant 8 : index
    %c0_69 = arith.constant 0 : index
    %c0_70 = arith.constant 0 : index
    %93 = vector.load %arg5[%c8, %c0_69, %c0_70] : memref<9x8x8xbf16, #tpu.memory_space<vmem>>, vector<1x8x8xbf16>
    %94 = vector.shape_cast %93 : vector<1x8x8xbf16> to vector<8x8xbf16>
    %95 = vector.shape_cast %94 : vector<8x8xbf16> to vector<1x8x8xbf16>
    %96 = vector.shape_cast %95 : vector<1x8x8xbf16> to vector<1x8x8xbf16>
    %97 = vector.broadcast %96 : vector<1x8x8xbf16> to vector<4x8x8xbf16>
    %cst_71 = arith.constant dense<0.000000e+00> : vector<4x4x8xf32>
    %98 = tpu.matmul %92, %97, %cst_71 {dimension_numbers = #tpu.dot_dimension_numbers<[2], [1], [1], [2], [0, 0, 0, 1, 1, 2], [0], [0]>} : vector<4x4x8xbf16>, vector<4x8x8xbf16>, vector<4x4x8xf32> -> vector<4x4x8xf32>
    %99 = arith.addf %88, %98 : vector<4x4x8xf32>
    %c0_72 = arith.constant 0 : index
    %c0_73 = arith.constant 0 : index
    %c0_74 = arith.constant 0 : index
    %100 = vector.load %arg6[%c0_72, %c0_73, %c0_74] : memref<1x1x8xf32, #tpu.memory_space<vmem>>, vector<1x1x8xf32>
    %101 = vector.broadcast %100 : vector<1x1x8xf32> to vector<4x4x8xf32>
    %102 = arith.mulf %99, %101 : vector<4x4x8xf32>
    %c0_75 = arith.constant 0 : index
    %c0_76 = arith.constant 0 : index
    %c0_77 = arith.constant 0 : index
    %103 = vector.load %arg7[%c0_75, %c0_76, %c0_77] : memref<1x1x8xf32, #tpu.memory_space<vmem>>, vector<1x1x8xf32>
    %104 = vector.broadcast %103 : vector<1x1x8xf32> to vector<4x4x8xf32>
    %105 = arith.addf %102, %104 : vector<4x4x8xf32>
    %cst_78 = arith.constant 0.000000e+00 : f32
    %106 = vector.broadcast %cst_78 : f32 to vector<4x4x8xf32>
    %c0_79 = arith.constant 0 : index
    %c0_80 = arith.constant 0 : index
    %c0_81 = arith.constant 0 : index
    %c0_82 = arith.constant 0 : index
    %107 = vector.load %arg8[%c0_79, %c0_80, %c0_81, %c0_82] : memref<1x5x5x8xbf16, #tpu.memory_space<vmem>>, vector<1x4x4x8xbf16>
    %108 = vector.shape_cast %107 : vector<1x4x4x8xbf16> to vector<4x4x8xbf16>
    %109 = arith.extf %108 : vector<4x4x8xbf16> to vector<4x4x8xf32>
    %110 = arith.addf %106, %109 : vector<4x4x8xf32>
    %c0_83 = arith.constant 0 : index
    %c0_84 = arith.constant 0 : index
    %c0_85 = arith.constant 0 : index
    %c0_86 = arith.constant 0 : index
    %111 = vector.load %arg9[%c0_83, %c0_84, %c0_85, %c0_86] : memref<1x5x5x8xbf16, #tpu.memory_space<vmem>>, vector<1x4x4x8xbf16>
    %112 = vector.shape_cast %111 : vector<1x4x4x8xbf16> to vector<4x4x8xbf16>
    %113 = arith.extf %112 : vector<4x4x8xbf16> to vector<4x4x8xf32>
    %114 = arith.addf %110, %113 : vector<4x4x8xf32>
    %c0_87 = arith.constant 0 : index
    %c0_88 = arith.constant 0 : index
    %c1_89 = arith.constant 1 : index
    %c0_90 = arith.constant 0 : index
    %115 = vector.load %arg8[%c0_87, %c0_88, %c1_89, %c0_90] : memref<1x5x5x8xbf16, #tpu.memory_space<vmem>>, vector<1x4x4x8xbf16>
    %116 = vector.shape_cast %115 : vector<1x4x4x8xbf16> to vector<4x4x8xbf16>
    %117 = arith.extf %116 : vector<4x4x8xbf16> to vector<4x4x8xf32>
    %118 = arith.addf %114, %117 : vector<4x4x8xf32>
    %c0_91 = arith.constant 0 : index
    %c0_92 = arith.constant 0 : index
    %c0_93 = arith.constant 0 : index
    %c0_94 = arith.constant 0 : index
    %119 = vector.load %arg10[%c0_91, %c0_92, %c0_93, %c0_94] : memref<1x5x5x8xbf16, #tpu.memory_space<vmem>>, vector<1x4x4x8xbf16>
    %120 = vector.shape_cast %119 : vector<1x4x4x8xbf16> to vector<4x4x8xbf16>
    %121 = arith.extf %120 : vector<4x4x8xbf16> to vector<4x4x8xf32>
    %122 = arith.addf %118, %121 : vector<4x4x8xf32>
    %c0_95 = arith.constant 0 : index
    %c0_96 = arith.constant 0 : index
    %c0_97 = arith.constant 0 : index
    %c0_98 = arith.constant 0 : index
    %123 = vector.load %arg11[%c0_95, %c0_96, %c0_97, %c0_98] : memref<1x5x5x8xbf16, #tpu.memory_space<vmem>>, vector<1x4x4x8xbf16>
    %124 = vector.shape_cast %123 : vector<1x4x4x8xbf16> to vector<4x4x8xbf16>
    %125 = arith.extf %124 : vector<4x4x8xbf16> to vector<4x4x8xf32>
    %126 = arith.addf %122, %125 : vector<4x4x8xf32>
    %c0_99 = arith.constant 0 : index
    %c0_100 = arith.constant 0 : index
    %c1_101 = arith.constant 1 : index
    %c0_102 = arith.constant 0 : index
    %127 = vector.load %arg10[%c0_99, %c0_100, %c1_101, %c0_102] : memref<1x5x5x8xbf16, #tpu.memory_space<vmem>>, vector<1x4x4x8xbf16>
    %128 = vector.shape_cast %127 : vector<1x4x4x8xbf16> to vector<4x4x8xbf16>
    %129 = arith.extf %128 : vector<4x4x8xbf16> to vector<4x4x8xf32>
    %130 = arith.addf %126, %129 : vector<4x4x8xf32>
    %c0_103 = arith.constant 0 : index
    %c1_104 = arith.constant 1 : index
    %c0_105 = arith.constant 0 : index
    %c0_106 = arith.constant 0 : index
    %131 = vector.load %arg8[%c0_103, %c1_104, %c0_105, %c0_106] : memref<1x5x5x8xbf16, #tpu.memory_space<vmem>>, vector<1x4x4x8xbf16>
    %132 = vector.shape_cast %131 : vector<1x4x4x8xbf16> to vector<4x4x8xbf16>
    %133 = arith.extf %132 : vector<4x4x8xbf16> to vector<4x4x8xf32>
    %134 = arith.addf %130, %133 : vector<4x4x8xf32>
    %c0_107 = arith.constant 0 : index
    %c1_108 = arith.constant 1 : index
    %c0_109 = arith.constant 0 : index
    %c0_110 = arith.constant 0 : index
    %135 = vector.load %arg9[%c0_107, %c1_108, %c0_109, %c0_110] : memref<1x5x5x8xbf16, #tpu.memory_space<vmem>>, vector<1x4x4x8xbf16>
    %136 = vector.shape_cast %135 : vector<1x4x4x8xbf16> to vector<4x4x8xbf16>
    %137 = arith.extf %136 : vector<4x4x8xbf16> to vector<4x4x8xf32>
    %138 = arith.addf %134, %137 : vector<4x4x8xf32>
    %c0_111 = arith.constant 0 : index
    %c1_112 = arith.constant 1 : index
    %c1_113 = arith.constant 1 : index
    %c0_114 = arith.constant 0 : index
    %139 = vector.load %arg8[%c0_111, %c1_112, %c1_113, %c0_114] : memref<1x5x5x8xbf16, #tpu.memory_space<vmem>>, vector<1x4x4x8xbf16>
    %140 = vector.shape_cast %139 : vector<1x4x4x8xbf16> to vector<4x4x8xbf16>
    %141 = arith.extf %140 : vector<4x4x8xbf16> to vector<4x4x8xf32>
    %142 = arith.addf %138, %141 : vector<4x4x8xf32>
    %c0_115 = arith.constant 0 : index
    %c0_116 = arith.constant 0 : index
    %c0_117 = arith.constant 0 : index
    %143 = vector.load %arg12[%c0_115, %c0_116, %c0_117] : memref<4x4x1xf32, #tpu.memory_space<vmem>>, vector<4x4x1xf32>
    %144 = vector.broadcast %143 : vector<4x4x1xf32> to vector<4x4x8xf32>
    %145 = arith.mulf %142, %144 : vector<4x4x8xf32>
    %146 = arith.addf %105, %145 : vector<4x4x8xf32>
    %147 = vector.shape_cast %146 : vector<4x4x8xf32> to vector<1x4x4x8xf32>
    %148 = arith.truncf %147 : vector<1x4x4x8xf32> to vector<1x4x4x8xbf16>
    %c0_118 = arith.constant 0 : index
    %c0_119 = arith.constant 0 : index
    %c0_120 = arith.constant 0 : index
    %c0_121 = arith.constant 0 : index
    %149 = vector.load %arg13[%c0_118, %c0_119, %c0_120, %c0_121] : memref<1x4x4x8xbf16, #tpu.memory_space<vmem>>, vector<1x4x4x8xbf16>
    tpu.vector_store %arg13[%c0_118, %c0_119, %c0_120, %c0_121], %148 {strides = array<i32>} : memref<1x4x4x8xbf16, #tpu.memory_space<vmem>>, vector<1x4x4x8xbf16>,
    return
  }
  func.func @transform_0(%arg0: i32) -> (i32, i32, i32, i32) {
    %c0_i32 = arith.constant 0 : i32
    %c0_i32_0 = arith.constant 0 : i32
    %c0_i32_1 = arith.constant 0 : i32
    %c0_i32_2 = arith.constant 0 : i32
    return %arg0, %c0_i32, %c0_i32_0, %c0_i32_1 : i32, i32, i32, i32
  }
  func.func @transform_1(%arg0: i32) -> (i32, i32, i32, i32) {
    %c0_i32 = arith.constant 0 : i32
    %c0_i32_0 = arith.constant 0 : i32
    %c0_i32_1 = arith.constant 0 : i32
    %c0_i32_2 = arith.constant 0 : i32
    return %arg0, %c0_i32, %c0_i32_0, %c0_i32_1 : i32, i32, i32, i32
  }
  func.func @transform_2(%arg0: i32) -> (i32, i32, i32, i32) {
    %c0_i32 = arith.constant 0 : i32
    %c0_i32_0 = arith.constant 0 : i32
    %c0_i32_1 = arith.constant 0 : i32
    %c0_i32_2 = arith.constant 0 : i32
    return %arg0, %c0_i32, %c0_i32_0, %c0_i32_1 : i32, i32, i32, i32
  }
  func.func @transform_3(%arg0: i32) -> (i32, i32, i32, i32) {
    %c0_i32 = arith.constant 0 : i32
    %c0_i32_0 = arith.constant 0 : i32
    %c0_i32_1 = arith.constant 0 : i32
    %c0_i32_2 = arith.constant 0 : i32
    return %arg0, %c0_i32, %c0_i32_0, %c0_i32_1 : i32, i32, i32, i32
  }
  func.func @transform_4(%arg0: i32) -> (i32, i32, i32) {
    %c0_i32 = arith.constant 0 : i32
    %c0_i32_0 = arith.constant 0 : i32
    %c0_i32_1 = arith.constant 0 : i32
    %c0_i32_2 = arith.constant 0 : i32
    return %c0_i32, %c0_i32_0, %c0_i32_1 : i32, i32, i32
  }
  func.func @transform_5(%arg0: i32) -> (i32, i32, i32) {
    %c0_i32 = arith.constant 0 : i32
    %c0_i32_0 = arith.constant 0 : i32
    %c0_i32_1 = arith.constant 0 : i32
    %c0_i32_2 = arith.constant 0 : i32
    return %c0_i32, %c0_i32_0, %c0_i32_1 : i32, i32, i32
  }
  func.func @transform_6(%arg0: i32) -> (i32, i32, i32) {
    %c0_i32 = arith.constant 0 : i32
    %c0_i32_0 = arith.constant 0 : i32
    %c0_i32_1 = arith.constant 0 : i32
    %c0_i32_2 = arith.constant 0 : i32
    return %c0_i32, %c0_i32_0, %c0_i32_1 : i32, i32, i32
  }
  func.func @transform_7(%arg0: i32) -> (i32, i32, i32, i32) {
    %c0_i32 = arith.constant 0 : i32
    %c0_i32_0 = arith.constant 0 : i32
    %c0_i32_1 = arith.constant 0 : i32
    %c0_i32_2 = arith.constant 0 : i32
    return %arg0, %c0_i32, %c0_i32_0, %c0_i32_1 : i32, i32, i32, i32
  }
  func.func @transform_8(%arg0: i32) -> (i32, i32, i32, i32) {
    %c0_i32 = arith.constant 0 : i32
    %c0_i32_0 = arith.constant 0 : i32
    %c0_i32_1 = arith.constant 0 : i32
    %c0_i32_2 = arith.constant 0 : i32
    return %arg0, %c0_i32, %c0_i32_0, %c0_i32_1 : i32, i32, i32, i32
  }
  func.func @transform_9(%arg0: i32) -> (i32, i32, i32, i32) {
    %c0_i32 = arith.constant 0 : i32
    %c0_i32_0 = arith.constant 0 : i32
    %c0_i32_1 = arith.constant 0 : i32
    %c0_i32_2 = arith.constant 0 : i32
    return %arg0, %c0_i32, %c0_i32_0, %c0_i32_1 : i32, i32, i32, i32
  }
  func.func @transform_10(%arg0: i32) -> (i32, i32, i32, i32) {
    %c0_i32 = arith.constant 0 : i32
    %c0_i32_0 = arith.constant 0 : i32
    %c0_i32_1 = arith.constant 0 : i32
    %c0_i32_2 = arith.constant 0 : i32
    return %arg0, %c0_i32, %c0_i32_0, %c0_i32_1 : i32, i32, i32, i32
  }
  func.func @transform_11(%arg0: i32) -> (i32, i32, i32) {
    %c0_i32 = arith.constant 0 : i32
    %c0_i32_0 = arith.constant 0 : i32
    %c0_i32_1 = arith.constant 0 : i32
    %c0_i32_2 = arith.constant 0 : i32
    return %c0_i32, %c0_i32_0, %c0_i32_1 : i32, i32, i32
  }
  func.func @transform_12(%arg0: i32) -> (i32, i32, i32, i32) {
    %c0_i32 = arith.constant 0 : i32
    %c0_i32_0 = arith.constant 0 : i32
    %c0_i32_1 = arith.constant 0 : i32
    %c0_i32_2 = arith.constant 0 : i32
    return %arg0, %c0_i32, %c0_i32_0, %c0_i32_1 : i32, i32, i32, i32
  }
}

module attributes {stable_mosaic.version = 11 : i64} {
  func.func @kernel(%arg0: i32, %arg1: memref<1x6x6x8xbf16, #tpu.memory_space<vmem>>, %arg2: memref<9x8x8xbf16, #tpu.memory_space<vmem>>, %arg3: memref<1x1x8xf32, #tpu.memory_space<vmem>>, %arg4: memref<1x1x8xf32, #tpu.memory_space<vmem>>, %arg5: memref<1x5x5x8xbf16, #tpu.memory_space<vmem>>, %arg6: memref<1x5x5x8xbf16, #tpu.memory_space<vmem>>, %arg7: memref<1x5x5x8xbf16, #tpu.memory_space<vmem>>, %arg8: memref<1x5x5x8xbf16, #tpu.memory_space<vmem>>, %arg9: memref<9x8x8xbf16, #tpu.memory_space<vmem>>, %arg10: memref<1x1x8xf32, #tpu.memory_space<vmem>>, %arg11: memref<1x1x8xf32, #tpu.memory_space<vmem>>, %arg12: memref<1x4x4x8xbf16, #tpu.memory_space<vmem>>) attributes {dimension_semantics = [#tpu.dimension_semantics<parallel>], iteration_bounds = array<i64: 2>, scalar_prefetch = 0 : i64, scratch_operands = 0 : i64, tpu.core_type = #tpu.core_type<tc>, window_params = [{transform_indices = @transform_0, window_bounds = array<i64: 1, 6, 6, 8>}, {pipeline_mode = #tpu.pipeline_mode<synchronous>, transform_indices = @transform_1, window_bounds = array<i64: 9, 8, 8>}, {pipeline_mode = #tpu.pipeline_mode<synchronous>, transform_indices = @transform_2, window_bounds = array<i64: 1, 1, 8>}, {pipeline_mode = #tpu.pipeline_mode<synchronous>, transform_indices = @transform_3, window_bounds = array<i64: 1, 1, 8>}, {transform_indices = @transform_4, window_bounds = array<i64: 1, 5, 5, 8>}, {transform_indices = @transform_5, window_bounds = array<i64: 1, 5, 5, 8>}, {transform_indices = @transform_6, window_bounds = array<i64: 1, 5, 5, 8>}, {transform_indices = @transform_7, window_bounds = array<i64: 1, 5, 5, 8>}, {pipeline_mode = #tpu.pipeline_mode<synchronous>, transform_indices = @transform_8, window_bounds = array<i64: 9, 8, 8>}, {pipeline_mode = #tpu.pipeline_mode<synchronous>, transform_indices = @transform_9, window_bounds = array<i64: 1, 1, 8>}, {pipeline_mode = #tpu.pipeline_mode<synchronous>, transform_indices = @transform_10, window_bounds = array<i64: 1, 1, 8>}, {transform_indices = @transform_11, window_bounds = array<i64: 1, 4, 4, 8>}]} {
    %cst = arith.constant 0.000000e+00 : f32
    %0 = vector.broadcast %cst : f32 to vector<4x4x8xf32>
    %c0 = arith.constant 0 : index
    %c0_0 = arith.constant 0 : index
    %c0_1 = arith.constant 0 : index
    %c0_2 = arith.constant 0 : index
    %1 = vector.load %arg1[%c0, %c0_0, %c0_1, %c0_2] : memref<1x6x6x8xbf16, #tpu.memory_space<vmem>>, vector<1x4x4x8xbf16>
    %2 = vector.shape_cast %1 : vector<1x4x4x8xbf16> to vector<4x4x8xbf16>
    %cst_3 = arith.constant 0.000000e+00 : bf16
    %3 = vector.broadcast %cst_3 : bf16 to vector<4x4x8xbf16>
    %4 = arith.maximumf %2, %3 : vector<4x4x8xbf16>
    %c0_4 = arith.constant 0 : index
    %c0_5 = arith.constant 0 : index
    %c0_6 = arith.constant 0 : index
    %5 = vector.load %arg2[%c0_4, %c0_5, %c0_6] : memref<9x8x8xbf16, #tpu.memory_space<vmem>>, vector<1x8x8xbf16>
    %6 = vector.shape_cast %5 : vector<1x8x8xbf16> to vector<8x8xbf16>
    %7 = vector.shape_cast %6 : vector<8x8xbf16> to vector<1x8x8xbf16>
    %8 = vector.shape_cast %7 : vector<1x8x8xbf16> to vector<1x8x8xbf16>
    %9 = vector.broadcast %8 : vector<1x8x8xbf16> to vector<4x8x8xbf16>
    %cst_7 = arith.constant dense<0.000000e+00> : vector<4x4x8xf32>
    %10 = tpu.matmul %4, %9, %cst_7 {dimension_numbers = #tpu.dot_dimension_numbers<[2], [1], [1], [2], [0, 0, 0, 1, 1, 2], [0], [0]>} : vector<4x4x8xbf16>, vector<4x8x8xbf16>, vector<4x4x8xf32> -> vector<4x4x8xf32>
    %11 = arith.addf %0, %10 : vector<4x4x8xf32>
    %c0_8 = arith.constant 0 : index
    %c0_9 = arith.constant 0 : index
    %c1 = arith.constant 1 : index
    %c0_10 = arith.constant 0 : index
    %12 = vector.load %arg1[%c0_8, %c0_9, %c1, %c0_10] : memref<1x6x6x8xbf16, #tpu.memory_space<vmem>>, vector<1x4x4x8xbf16>
    %13 = vector.shape_cast %12 : vector<1x4x4x8xbf16> to vector<4x4x8xbf16>
    %cst_11 = arith.constant 0.000000e+00 : bf16
    %14 = vector.broadcast %cst_11 : bf16 to vector<4x4x8xbf16>
    %15 = arith.maximumf %13, %14 : vector<4x4x8xbf16>
    %c1_12 = arith.constant 1 : index
    %c0_13 = arith.constant 0 : index
    %c0_14 = arith.constant 0 : index
    %16 = vector.load %arg2[%c1_12, %c0_13, %c0_14] : memref<9x8x8xbf16, #tpu.memory_space<vmem>>, vector<1x8x8xbf16>
    %17 = vector.shape_cast %16 : vector<1x8x8xbf16> to vector<8x8xbf16>
    %18 = vector.shape_cast %17 : vector<8x8xbf16> to vector<1x8x8xbf16>
    %19 = vector.shape_cast %18 : vector<1x8x8xbf16> to vector<1x8x8xbf16>
    %20 = vector.broadcast %19 : vector<1x8x8xbf16> to vector<4x8x8xbf16>
    %cst_15 = arith.constant dense<0.000000e+00> : vector<4x4x8xf32>
    %21 = tpu.matmul %15, %20, %cst_15 {dimension_numbers = #tpu.dot_dimension_numbers<[2], [1], [1], [2], [0, 0, 0, 1, 1, 2], [0], [0]>} : vector<4x4x8xbf16>, vector<4x8x8xbf16>, vector<4x4x8xf32> -> vector<4x4x8xf32>
    %22 = arith.addf %11, %21 : vector<4x4x8xf32>
    %c0_16 = arith.constant 0 : index
    %c0_17 = arith.constant 0 : index
    %c2 = arith.constant 2 : index
    %c0_18 = arith.constant 0 : index
    %23 = vector.load %arg1[%c0_16, %c0_17, %c2, %c0_18] : memref<1x6x6x8xbf16, #tpu.memory_space<vmem>>, vector<1x4x4x8xbf16>
    %24 = vector.shape_cast %23 : vector<1x4x4x8xbf16> to vector<4x4x8xbf16>
    %cst_19 = arith.constant 0.000000e+00 : bf16
    %25 = vector.broadcast %cst_19 : bf16 to vector<4x4x8xbf16>
    %26 = arith.maximumf %24, %25 : vector<4x4x8xbf16>
    %c2_20 = arith.constant 2 : index
    %c0_21 = arith.constant 0 : index
    %c0_22 = arith.constant 0 : index
    %27 = vector.load %arg2[%c2_20, %c0_21, %c0_22] : memref<9x8x8xbf16, #tpu.memory_space<vmem>>, vector<1x8x8xbf16>
    %28 = vector.shape_cast %27 : vector<1x8x8xbf16> to vector<8x8xbf16>
    %29 = vector.shape_cast %28 : vector<8x8xbf16> to vector<1x8x8xbf16>
    %30 = vector.shape_cast %29 : vector<1x8x8xbf16> to vector<1x8x8xbf16>
    %31 = vector.broadcast %30 : vector<1x8x8xbf16> to vector<4x8x8xbf16>
    %cst_23 = arith.constant dense<0.000000e+00> : vector<4x4x8xf32>
    %32 = tpu.matmul %26, %31, %cst_23 {dimension_numbers = #tpu.dot_dimension_numbers<[2], [1], [1], [2], [0, 0, 0, 1, 1, 2], [0], [0]>} : vector<4x4x8xbf16>, vector<4x8x8xbf16>, vector<4x4x8xf32> -> vector<4x4x8xf32>
    %33 = arith.addf %22, %32 : vector<4x4x8xf32>
    %c0_24 = arith.constant 0 : index
    %c1_25 = arith.constant 1 : index
    %c0_26 = arith.constant 0 : index
    %c0_27 = arith.constant 0 : index
    %34 = vector.load %arg1[%c0_24, %c1_25, %c0_26, %c0_27] : memref<1x6x6x8xbf16, #tpu.memory_space<vmem>>, vector<1x4x4x8xbf16>
    %35 = vector.shape_cast %34 : vector<1x4x4x8xbf16> to vector<4x4x8xbf16>
    %cst_28 = arith.constant 0.000000e+00 : bf16
    %36 = vector.broadcast %cst_28 : bf16 to vector<4x4x8xbf16>
    %37 = arith.maximumf %35, %36 : vector<4x4x8xbf16>
    %c3 = arith.constant 3 : index
    %c0_29 = arith.constant 0 : index
    %c0_30 = arith.constant 0 : index
    %38 = vector.load %arg2[%c3, %c0_29, %c0_30] : memref<9x8x8xbf16, #tpu.memory_space<vmem>>, vector<1x8x8xbf16>
    %39 = vector.shape_cast %38 : vector<1x8x8xbf16> to vector<8x8xbf16>
    %40 = vector.shape_cast %39 : vector<8x8xbf16> to vector<1x8x8xbf16>
    %41 = vector.shape_cast %40 : vector<1x8x8xbf16> to vector<1x8x8xbf16>
    %42 = vector.broadcast %41 : vector<1x8x8xbf16> to vector<4x8x8xbf16>
    %cst_31 = arith.constant dense<0.000000e+00> : vector<4x4x8xf32>
    %43 = tpu.matmul %37, %42, %cst_31 {dimension_numbers = #tpu.dot_dimension_numbers<[2], [1], [1], [2], [0, 0, 0, 1, 1, 2], [0], [0]>} : vector<4x4x8xbf16>, vector<4x8x8xbf16>, vector<4x4x8xf32> -> vector<4x4x8xf32>
    %44 = arith.addf %33, %43 : vector<4x4x8xf32>
    %c0_32 = arith.constant 0 : index
    %c1_33 = arith.constant 1 : index
    %c1_34 = arith.constant 1 : index
    %c0_35 = arith.constant 0 : index
    %45 = vector.load %arg1[%c0_32, %c1_33, %c1_34, %c0_35] : memref<1x6x6x8xbf16, #tpu.memory_space<vmem>>, vector<1x4x4x8xbf16>
    %46 = vector.shape_cast %45 : vector<1x4x4x8xbf16> to vector<4x4x8xbf16>
    %cst_36 = arith.constant 0.000000e+00 : bf16
    %47 = vector.broadcast %cst_36 : bf16 to vector<4x4x8xbf16>
    %48 = arith.maximumf %46, %47 : vector<4x4x8xbf16>
    %c4 = arith.constant 4 : index
    %c0_37 = arith.constant 0 : index
    %c0_38 = arith.constant 0 : index
    %49 = vector.load %arg2[%c4, %c0_37, %c0_38] : memref<9x8x8xbf16, #tpu.memory_space<vmem>>, vector<1x8x8xbf16>
    %50 = vector.shape_cast %49 : vector<1x8x8xbf16> to vector<8x8xbf16>
    %51 = vector.shape_cast %50 : vector<8x8xbf16> to vector<1x8x8xbf16>
    %52 = vector.shape_cast %51 : vector<1x8x8xbf16> to vector<1x8x8xbf16>
    %53 = vector.broadcast %52 : vector<1x8x8xbf16> to vector<4x8x8xbf16>
    %cst_39 = arith.constant dense<0.000000e+00> : vector<4x4x8xf32>
    %54 = tpu.matmul %48, %53, %cst_39 {dimension_numbers = #tpu.dot_dimension_numbers<[2], [1], [1], [2], [0, 0, 0, 1, 1, 2], [0], [0]>} : vector<4x4x8xbf16>, vector<4x8x8xbf16>, vector<4x4x8xf32> -> vector<4x4x8xf32>
    %55 = arith.addf %44, %54 : vector<4x4x8xf32>
    %c0_40 = arith.constant 0 : index
    %c1_41 = arith.constant 1 : index
    %c2_42 = arith.constant 2 : index
    %c0_43 = arith.constant 0 : index
    %56 = vector.load %arg1[%c0_40, %c1_41, %c2_42, %c0_43] : memref<1x6x6x8xbf16, #tpu.memory_space<vmem>>, vector<1x4x4x8xbf16>
    %57 = vector.shape_cast %56 : vector<1x4x4x8xbf16> to vector<4x4x8xbf16>
    %cst_44 = arith.constant 0.000000e+00 : bf16
    %58 = vector.broadcast %cst_44 : bf16 to vector<4x4x8xbf16>
    %59 = arith.maximumf %57, %58 : vector<4x4x8xbf16>
    %c5 = arith.constant 5 : index
    %c0_45 = arith.constant 0 : index
    %c0_46 = arith.constant 0 : index
    %60 = vector.load %arg2[%c5, %c0_45, %c0_46] : memref<9x8x8xbf16, #tpu.memory_space<vmem>>, vector<1x8x8xbf16>
    %61 = vector.shape_cast %60 : vector<1x8x8xbf16> to vector<8x8xbf16>
    %62 = vector.shape_cast %61 : vector<8x8xbf16> to vector<1x8x8xbf16>
    %63 = vector.shape_cast %62 : vector<1x8x8xbf16> to vector<1x8x8xbf16>
    %64 = vector.broadcast %63 : vector<1x8x8xbf16> to vector<4x8x8xbf16>
    %cst_47 = arith.constant dense<0.000000e+00> : vector<4x4x8xf32>
    %65 = tpu.matmul %59, %64, %cst_47 {dimension_numbers = #tpu.dot_dimension_numbers<[2], [1], [1], [2], [0, 0, 0, 1, 1, 2], [0], [0]>} : vector<4x4x8xbf16>, vector<4x8x8xbf16>, vector<4x4x8xf32> -> vector<4x4x8xf32>
    %66 = arith.addf %55, %65 : vector<4x4x8xf32>
    %c0_48 = arith.constant 0 : index
    %c2_49 = arith.constant 2 : index
    %c0_50 = arith.constant 0 : index
    %c0_51 = arith.constant 0 : index
    %67 = vector.load %arg1[%c0_48, %c2_49, %c0_50, %c0_51] : memref<1x6x6x8xbf16, #tpu.memory_space<vmem>>, vector<1x4x4x8xbf16>
    %68 = vector.shape_cast %67 : vector<1x4x4x8xbf16> to vector<4x4x8xbf16>
    %cst_52 = arith.constant 0.000000e+00 : bf16
    %69 = vector.broadcast %cst_52 : bf16 to vector<4x4x8xbf16>
    %70 = arith.maximumf %68, %69 : vector<4x4x8xbf16>
    %c6 = arith.constant 6 : index
    %c0_53 = arith.constant 0 : index
    %c0_54 = arith.constant 0 : index
    %71 = vector.load %arg2[%c6, %c0_53, %c0_54] : memref<9x8x8xbf16, #tpu.memory_space<vmem>>, vector<1x8x8xbf16>
    %72 = vector.shape_cast %71 : vector<1x8x8xbf16> to vector<8x8xbf16>
    %73 = vector.shape_cast %72 : vector<8x8xbf16> to vector<1x8x8xbf16>
    %74 = vector.shape_cast %73 : vector<1x8x8xbf16> to vector<1x8x8xbf16>
    %75 = vector.broadcast %74 : vector<1x8x8xbf16> to vector<4x8x8xbf16>
    %cst_55 = arith.constant dense<0.000000e+00> : vector<4x4x8xf32>
    %76 = tpu.matmul %70, %75, %cst_55 {dimension_numbers = #tpu.dot_dimension_numbers<[2], [1], [1], [2], [0, 0, 0, 1, 1, 2], [0], [0]>} : vector<4x4x8xbf16>, vector<4x8x8xbf16>, vector<4x4x8xf32> -> vector<4x4x8xf32>
    %77 = arith.addf %66, %76 : vector<4x4x8xf32>
    %c0_56 = arith.constant 0 : index
    %c2_57 = arith.constant 2 : index
    %c1_58 = arith.constant 1 : index
    %c0_59 = arith.constant 0 : index
    %78 = vector.load %arg1[%c0_56, %c2_57, %c1_58, %c0_59] : memref<1x6x6x8xbf16, #tpu.memory_space<vmem>>, vector<1x4x4x8xbf16>
    %79 = vector.shape_cast %78 : vector<1x4x4x8xbf16> to vector<4x4x8xbf16>
    %cst_60 = arith.constant 0.000000e+00 : bf16
    %80 = vector.broadcast %cst_60 : bf16 to vector<4x4x8xbf16>
    %81 = arith.maximumf %79, %80 : vector<4x4x8xbf16>
    %c7 = arith.constant 7 : index
    %c0_61 = arith.constant 0 : index
    %c0_62 = arith.constant 0 : index
    %82 = vector.load %arg2[%c7, %c0_61, %c0_62] : memref<9x8x8xbf16, #tpu.memory_space<vmem>>, vector<1x8x8xbf16>
    %83 = vector.shape_cast %82 : vector<1x8x8xbf16> to vector<8x8xbf16>
    %84 = vector.shape_cast %83 : vector<8x8xbf16> to vector<1x8x8xbf16>
    %85 = vector.shape_cast %84 : vector<1x8x8xbf16> to vector<1x8x8xbf16>
    %86 = vector.broadcast %85 : vector<1x8x8xbf16> to vector<4x8x8xbf16>
    %cst_63 = arith.constant dense<0.000000e+00> : vector<4x4x8xf32>
    %87 = tpu.matmul %81, %86, %cst_63 {dimension_numbers = #tpu.dot_dimension_numbers<[2], [1], [1], [2], [0, 0, 0, 1, 1, 2], [0], [0]>} : vector<4x4x8xbf16>, vector<4x8x8xbf16>, vector<4x4x8xf32> -> vector<4x4x8xf32>
    %88 = arith.addf %77, %87 : vector<4x4x8xf32>
    %c0_64 = arith.constant 0 : index
    %c2_65 = arith.constant 2 : index
    %c2_66 = arith.constant 2 : index
    %c0_67 = arith.constant 0 : index
    %89 = vector.load %arg1[%c0_64, %c2_65, %c2_66, %c0_67] : memref<1x6x6x8xbf16, #tpu.memory_space<vmem>>, vector<1x4x4x8xbf16>
    %90 = vector.shape_cast %89 : vector<1x4x4x8xbf16> to vector<4x4x8xbf16>
    %cst_68 = arith.constant 0.000000e+00 : bf16
    %91 = vector.broadcast %cst_68 : bf16 to vector<4x4x8xbf16>
    %92 = arith.maximumf %90, %91 : vector<4x4x8xbf16>
    %c8 = arith.constant 8 : index
    %c0_69 = arith.constant 0 : index
    %c0_70 = arith.constant 0 : index
    %93 = vector.load %arg2[%c8, %c0_69, %c0_70] : memref<9x8x8xbf16, #tpu.memory_space<vmem>>, vector<1x8x8xbf16>
    %94 = vector.shape_cast %93 : vector<1x8x8xbf16> to vector<8x8xbf16>
    %95 = vector.shape_cast %94 : vector<8x8xbf16> to vector<1x8x8xbf16>
    %96 = vector.shape_cast %95 : vector<1x8x8xbf16> to vector<1x8x8xbf16>
    %97 = vector.broadcast %96 : vector<1x8x8xbf16> to vector<4x8x8xbf16>
    %cst_71 = arith.constant dense<0.000000e+00> : vector<4x4x8xf32>
    %98 = tpu.matmul %92, %97, %cst_71 {dimension_numbers = #tpu.dot_dimension_numbers<[2], [1], [1], [2], [0, 0, 0, 1, 1, 2], [0], [0]>} : vector<4x4x8xbf16>, vector<4x8x8xbf16>, vector<4x4x8xf32> -> vector<4x4x8xf32>
    %99 = arith.addf %88, %98 : vector<4x4x8xf32>
    %c0_72 = arith.constant 0 : index
    %c0_73 = arith.constant 0 : index
    %c0_74 = arith.constant 0 : index
    %100 = vector.load %arg3[%c0_72, %c0_73, %c0_74] : memref<1x1x8xf32, #tpu.memory_space<vmem>>, vector<1x1x8xf32>
    %101 = vector.broadcast %100 : vector<1x1x8xf32> to vector<4x4x8xf32>
    %102 = arith.mulf %99, %101 : vector<4x4x8xf32>
    %c0_75 = arith.constant 0 : index
    %c0_76 = arith.constant 0 : index
    %c0_77 = arith.constant 0 : index
    %103 = vector.load %arg4[%c0_75, %c0_76, %c0_77] : memref<1x1x8xf32, #tpu.memory_space<vmem>>, vector<1x1x8xf32>
    %104 = vector.broadcast %103 : vector<1x1x8xf32> to vector<4x4x8xf32>
    %105 = arith.addf %102, %104 : vector<4x4x8xf32>
    %cst_78 = arith.constant 0.000000e+00 : f32
    %106 = vector.broadcast %cst_78 : f32 to vector<4x4x8xf32>
    %c0_79 = arith.constant 0 : index
    %c0_80 = arith.constant 0 : index
    %c0_81 = arith.constant 0 : index
    %c0_82 = arith.constant 0 : index
    %107 = vector.load %arg5[%c0_79, %c0_80, %c0_81, %c0_82] : memref<1x5x5x8xbf16, #tpu.memory_space<vmem>>, vector<1x4x4x8xbf16>
    %108 = vector.shape_cast %107 : vector<1x4x4x8xbf16> to vector<4x4x8xbf16>
    %cst_83 = arith.constant 0.000000e+00 : bf16
    %109 = vector.broadcast %cst_83 : bf16 to vector<4x4x8xbf16>
    %110 = arith.maximumf %108, %109 : vector<4x4x8xbf16>
    %c0_84 = arith.constant 0 : index
    %c0_85 = arith.constant 0 : index
    %c0_86 = arith.constant 0 : index
    %111 = vector.load %arg9[%c0_84, %c0_85, %c0_86] : memref<9x8x8xbf16, #tpu.memory_space<vmem>>, vector<1x8x8xbf16>
    %112 = vector.shape_cast %111 : vector<1x8x8xbf16> to vector<8x8xbf16>
    %113 = vector.shape_cast %112 : vector<8x8xbf16> to vector<1x8x8xbf16>
    %114 = vector.shape_cast %113 : vector<1x8x8xbf16> to vector<1x8x8xbf16>
    %115 = vector.broadcast %114 : vector<1x8x8xbf16> to vector<4x8x8xbf16>
    %cst_87 = arith.constant dense<0.000000e+00> : vector<4x4x8xf32>
    %116 = tpu.matmul %110, %115, %cst_87 {dimension_numbers = #tpu.dot_dimension_numbers<[2], [1], [1], [2], [0, 0, 0, 1, 1, 2], [0], [0]>} : vector<4x4x8xbf16>, vector<4x8x8xbf16>, vector<4x4x8xf32> -> vector<4x4x8xf32>
    %117 = arith.addf %106, %116 : vector<4x4x8xf32>
    %c0_88 = arith.constant 0 : index
    %c0_89 = arith.constant 0 : index
    %c0_90 = arith.constant 0 : index
    %c0_91 = arith.constant 0 : index
    %118 = vector.load %arg6[%c0_88, %c0_89, %c0_90, %c0_91] : memref<1x5x5x8xbf16, #tpu.memory_space<vmem>>, vector<1x4x4x8xbf16>
    %119 = vector.shape_cast %118 : vector<1x4x4x8xbf16> to vector<4x4x8xbf16>
    %cst_92 = arith.constant 0.000000e+00 : bf16
    %120 = vector.broadcast %cst_92 : bf16 to vector<4x4x8xbf16>
    %121 = arith.maximumf %119, %120 : vector<4x4x8xbf16>
    %c1_93 = arith.constant 1 : index
    %c0_94 = arith.constant 0 : index
    %c0_95 = arith.constant 0 : index
    %122 = vector.load %arg9[%c1_93, %c0_94, %c0_95] : memref<9x8x8xbf16, #tpu.memory_space<vmem>>, vector<1x8x8xbf16>
    %123 = vector.shape_cast %122 : vector<1x8x8xbf16> to vector<8x8xbf16>
    %124 = vector.shape_cast %123 : vector<8x8xbf16> to vector<1x8x8xbf16>
    %125 = vector.shape_cast %124 : vector<1x8x8xbf16> to vector<1x8x8xbf16>
    %126 = vector.broadcast %125 : vector<1x8x8xbf16> to vector<4x8x8xbf16>
    %cst_96 = arith.constant dense<0.000000e+00> : vector<4x4x8xf32>
    %127 = tpu.matmul %121, %126, %cst_96 {dimension_numbers = #tpu.dot_dimension_numbers<[2], [1], [1], [2], [0, 0, 0, 1, 1, 2], [0], [0]>} : vector<4x4x8xbf16>, vector<4x8x8xbf16>, vector<4x4x8xf32> -> vector<4x4x8xf32>
    %128 = arith.addf %117, %127 : vector<4x4x8xf32>
    %c0_97 = arith.constant 0 : index
    %c0_98 = arith.constant 0 : index
    %c1_99 = arith.constant 1 : index
    %c0_100 = arith.constant 0 : index
    %129 = vector.load %arg5[%c0_97, %c0_98, %c1_99, %c0_100] : memref<1x5x5x8xbf16, #tpu.memory_space<vmem>>, vector<1x4x4x8xbf16>
    %130 = vector.shape_cast %129 : vector<1x4x4x8xbf16> to vector<4x4x8xbf16>
    %cst_101 = arith.constant 0.000000e+00 : bf16
    %131 = vector.broadcast %cst_101 : bf16 to vector<4x4x8xbf16>
    %132 = arith.maximumf %130, %131 : vector<4x4x8xbf16>
    %c2_102 = arith.constant 2 : index
    %c0_103 = arith.constant 0 : index
    %c0_104 = arith.constant 0 : index
    %133 = vector.load %arg9[%c2_102, %c0_103, %c0_104] : memref<9x8x8xbf16, #tpu.memory_space<vmem>>, vector<1x8x8xbf16>
    %134 = vector.shape_cast %133 : vector<1x8x8xbf16> to vector<8x8xbf16>
    %135 = vector.shape_cast %134 : vector<8x8xbf16> to vector<1x8x8xbf16>
    %136 = vector.shape_cast %135 : vector<1x8x8xbf16> to vector<1x8x8xbf16>
    %137 = vector.broadcast %136 : vector<1x8x8xbf16> to vector<4x8x8xbf16>
    %cst_105 = arith.constant dense<0.000000e+00> : vector<4x4x8xf32>
    %138 = tpu.matmul %132, %137, %cst_105 {dimension_numbers = #tpu.dot_dimension_numbers<[2], [1], [1], [2], [0, 0, 0, 1, 1, 2], [0], [0]>} : vector<4x4x8xbf16>, vector<4x8x8xbf16>, vector<4x4x8xf32> -> vector<4x4x8xf32>
    %139 = arith.addf %128, %138 : vector<4x4x8xf32>
    %c0_106 = arith.constant 0 : index
    %c0_107 = arith.constant 0 : index
    %c0_108 = arith.constant 0 : index
    %c0_109 = arith.constant 0 : index
    %140 = vector.load %arg7[%c0_106, %c0_107, %c0_108, %c0_109] : memref<1x5x5x8xbf16, #tpu.memory_space<vmem>>, vector<1x4x4x8xbf16>
    %141 = vector.shape_cast %140 : vector<1x4x4x8xbf16> to vector<4x4x8xbf16>
    %cst_110 = arith.constant 0.000000e+00 : bf16
    %142 = vector.broadcast %cst_110 : bf16 to vector<4x4x8xbf16>
    %143 = arith.maximumf %141, %142 : vector<4x4x8xbf16>
    %c3_111 = arith.constant 3 : index
    %c0_112 = arith.constant 0 : index
    %c0_113 = arith.constant 0 : index
    %144 = vector.load %arg9[%c3_111, %c0_112, %c0_113] : memref<9x8x8xbf16, #tpu.memory_space<vmem>>, vector<1x8x8xbf16>
    %145 = vector.shape_cast %144 : vector<1x8x8xbf16> to vector<8x8xbf16>
    %146 = vector.shape_cast %145 : vector<8x8xbf16> to vector<1x8x8xbf16>
    %147 = vector.shape_cast %146 : vector<1x8x8xbf16> to vector<1x8x8xbf16>
    %148 = vector.broadcast %147 : vector<1x8x8xbf16> to vector<4x8x8xbf16>
    %cst_114 = arith.constant dense<0.000000e+00> : vector<4x4x8xf32>
    %149 = tpu.matmul %143, %148, %cst_114 {dimension_numbers = #tpu.dot_dimension_numbers<[2], [1], [1], [2], [0, 0, 0, 1, 1, 2], [0], [0]>} : vector<4x4x8xbf16>, vector<4x8x8xbf16>, vector<4x4x8xf32> -> vector<4x4x8xf32>
    %150 = arith.addf %139, %149 : vector<4x4x8xf32>
    %c0_115 = arith.constant 0 : index
    %c0_116 = arith.constant 0 : index
    %c0_117 = arith.constant 0 : index
    %c0_118 = arith.constant 0 : index
    %151 = vector.load %arg8[%c0_115, %c0_116, %c0_117, %c0_118] : memref<1x5x5x8xbf16, #tpu.memory_space<vmem>>, vector<1x4x4x8xbf16>
    %152 = vector.shape_cast %151 : vector<1x4x4x8xbf16> to vector<4x4x8xbf16>
    %cst_119 = arith.constant 0.000000e+00 : bf16
    %153 = vector.broadcast %cst_119 : bf16 to vector<4x4x8xbf16>
    %154 = arith.maximumf %152, %153 : vector<4x4x8xbf16>
    %c4_120 = arith.constant 4 : index
    %c0_121 = arith.constant 0 : index
    %c0_122 = arith.constant 0 : index
    %155 = vector.load %arg9[%c4_120, %c0_121, %c0_122] : memref<9x8x8xbf16, #tpu.memory_space<vmem>>, vector<1x8x8xbf16>
    %156 = vector.shape_cast %155 : vector<1x8x8xbf16> to vector<8x8xbf16>
    %157 = vector.shape_cast %156 : vector<8x8xbf16> to vector<1x8x8xbf16>
    %158 = vector.shape_cast %157 : vector<1x8x8xbf16> to vector<1x8x8xbf16>
    %159 = vector.broadcast %158 : vector<1x8x8xbf16> to vector<4x8x8xbf16>
    %cst_123 = arith.constant dense<0.000000e+00> : vector<4x4x8xf32>
    %160 = tpu.matmul %154, %159, %cst_123 {dimension_numbers = #tpu.dot_dimension_numbers<[2], [1], [1], [2], [0, 0, 0, 1, 1, 2], [0], [0]>} : vector<4x4x8xbf16>, vector<4x8x8xbf16>, vector<4x4x8xf32> -> vector<4x4x8xf32>
    %161 = arith.addf %150, %160 : vector<4x4x8xf32>
    %c0_124 = arith.constant 0 : index
    %c0_125 = arith.constant 0 : index
    %c1_126 = arith.constant 1 : index
    %c0_127 = arith.constant 0 : index
    %162 = vector.load %arg7[%c0_124, %c0_125, %c1_126, %c0_127] : memref<1x5x5x8xbf16, #tpu.memory_space<vmem>>, vector<1x4x4x8xbf16>
    %163 = vector.shape_cast %162 : vector<1x4x4x8xbf16> to vector<4x4x8xbf16>
    %cst_128 = arith.constant 0.000000e+00 : bf16
    %164 = vector.broadcast %cst_128 : bf16 to vector<4x4x8xbf16>
    %165 = arith.maximumf %163, %164 : vector<4x4x8xbf16>
    %c5_129 = arith.constant 5 : index
    %c0_130 = arith.constant 0 : index
    %c0_131 = arith.constant 0 : index
    %166 = vector.load %arg9[%c5_129, %c0_130, %c0_131] : memref<9x8x8xbf16, #tpu.memory_space<vmem>>, vector<1x8x8xbf16>
    %167 = vector.shape_cast %166 : vector<1x8x8xbf16> to vector<8x8xbf16>
    %168 = vector.shape_cast %167 : vector<8x8xbf16> to vector<1x8x8xbf16>
    %169 = vector.shape_cast %168 : vector<1x8x8xbf16> to vector<1x8x8xbf16>
    %170 = vector.broadcast %169 : vector<1x8x8xbf16> to vector<4x8x8xbf16>
    %cst_132 = arith.constant dense<0.000000e+00> : vector<4x4x8xf32>
    %171 = tpu.matmul %165, %170, %cst_132 {dimension_numbers = #tpu.dot_dimension_numbers<[2], [1], [1], [2], [0, 0, 0, 1, 1, 2], [0], [0]>} : vector<4x4x8xbf16>, vector<4x8x8xbf16>, vector<4x4x8xf32> -> vector<4x4x8xf32>
    %172 = arith.addf %161, %171 : vector<4x4x8xf32>
    %c0_133 = arith.constant 0 : index
    %c1_134 = arith.constant 1 : index
    %c0_135 = arith.constant 0 : index
    %c0_136 = arith.constant 0 : index
    %173 = vector.load %arg5[%c0_133, %c1_134, %c0_135, %c0_136] : memref<1x5x5x8xbf16, #tpu.memory_space<vmem>>, vector<1x4x4x8xbf16>
    %174 = vector.shape_cast %173 : vector<1x4x4x8xbf16> to vector<4x4x8xbf16>
    %cst_137 = arith.constant 0.000000e+00 : bf16
    %175 = vector.broadcast %cst_137 : bf16 to vector<4x4x8xbf16>
    %176 = arith.maximumf %174, %175 : vector<4x4x8xbf16>
    %c6_138 = arith.constant 6 : index
    %c0_139 = arith.constant 0 : index
    %c0_140 = arith.constant 0 : index
    %177 = vector.load %arg9[%c6_138, %c0_139, %c0_140] : memref<9x8x8xbf16, #tpu.memory_space<vmem>>, vector<1x8x8xbf16>
    %178 = vector.shape_cast %177 : vector<1x8x8xbf16> to vector<8x8xbf16>
    %179 = vector.shape_cast %178 : vector<8x8xbf16> to vector<1x8x8xbf16>
    %180 = vector.shape_cast %179 : vector<1x8x8xbf16> to vector<1x8x8xbf16>
    %181 = vector.broadcast %180 : vector<1x8x8xbf16> to vector<4x8x8xbf16>
    %cst_141 = arith.constant dense<0.000000e+00> : vector<4x4x8xf32>
    %182 = tpu.matmul %176, %181, %cst_141 {dimension_numbers = #tpu.dot_dimension_numbers<[2], [1], [1], [2], [0, 0, 0, 1, 1, 2], [0], [0]>} : vector<4x4x8xbf16>, vector<4x8x8xbf16>, vector<4x4x8xf32> -> vector<4x4x8xf32>
    %183 = arith.addf %172, %182 : vector<4x4x8xf32>
    %c0_142 = arith.constant 0 : index
    %c1_143 = arith.constant 1 : index
    %c0_144 = arith.constant 0 : index
    %c0_145 = arith.constant 0 : index
    %184 = vector.load %arg6[%c0_142, %c1_143, %c0_144, %c0_145] : memref<1x5x5x8xbf16, #tpu.memory_space<vmem>>, vector<1x4x4x8xbf16>
    %185 = vector.shape_cast %184 : vector<1x4x4x8xbf16> to vector<4x4x8xbf16>
    %cst_146 = arith.constant 0.000000e+00 : bf16
    %186 = vector.broadcast %cst_146 : bf16 to vector<4x4x8xbf16>
    %187 = arith.maximumf %185, %186 : vector<4x4x8xbf16>
    %c7_147 = arith.constant 7 : index
    %c0_148 = arith.constant 0 : index
    %c0_149 = arith.constant 0 : index
    %188 = vector.load %arg9[%c7_147, %c0_148, %c0_149] : memref<9x8x8xbf16, #tpu.memory_space<vmem>>, vector<1x8x8xbf16>
    %189 = vector.shape_cast %188 : vector<1x8x8xbf16> to vector<8x8xbf16>
    %190 = vector.shape_cast %189 : vector<8x8xbf16> to vector<1x8x8xbf16>
    %191 = vector.shape_cast %190 : vector<1x8x8xbf16> to vector<1x8x8xbf16>
    %192 = vector.broadcast %191 : vector<1x8x8xbf16> to vector<4x8x8xbf16>
    %cst_150 = arith.constant dense<0.000000e+00> : vector<4x4x8xf32>
    %193 = tpu.matmul %187, %192, %cst_150 {dimension_numbers = #tpu.dot_dimension_numbers<[2], [1], [1], [2], [0, 0, 0, 1, 1, 2], [0], [0]>} : vector<4x4x8xbf16>, vector<4x8x8xbf16>, vector<4x4x8xf32> -> vector<4x4x8xf32>
    %194 = arith.addf %183, %193 : vector<4x4x8xf32>
    %c0_151 = arith.constant 0 : index
    %c1_152 = arith.constant 1 : index
    %c1_153 = arith.constant 1 : index
    %c0_154 = arith.constant 0 : index
    %195 = vector.load %arg5[%c0_151, %c1_152, %c1_153, %c0_154] : memref<1x5x5x8xbf16, #tpu.memory_space<vmem>>, vector<1x4x4x8xbf16>
    %196 = vector.shape_cast %195 : vector<1x4x4x8xbf16> to vector<4x4x8xbf16>
    %cst_155 = arith.constant 0.000000e+00 : bf16
    %197 = vector.broadcast %cst_155 : bf16 to vector<4x4x8xbf16>
    %198 = arith.maximumf %196, %197 : vector<4x4x8xbf16>
    %c8_156 = arith.constant 8 : index
    %c0_157 = arith.constant 0 : index
    %c0_158 = arith.constant 0 : index
    %199 = vector.load %arg9[%c8_156, %c0_157, %c0_158] : memref<9x8x8xbf16, #tpu.memory_space<vmem>>, vector<1x8x8xbf16>
    %200 = vector.shape_cast %199 : vector<1x8x8xbf16> to vector<8x8xbf16>
    %201 = vector.shape_cast %200 : vector<8x8xbf16> to vector<1x8x8xbf16>
    %202 = vector.shape_cast %201 : vector<1x8x8xbf16> to vector<1x8x8xbf16>
    %203 = vector.broadcast %202 : vector<1x8x8xbf16> to vector<4x8x8xbf16>
    %cst_159 = arith.constant dense<0.000000e+00> : vector<4x4x8xf32>
    %204 = tpu.matmul %198, %203, %cst_159 {dimension_numbers = #tpu.dot_dimension_numbers<[2], [1], [1], [2], [0, 0, 0, 1, 1, 2], [0], [0]>} : vector<4x4x8xbf16>, vector<4x8x8xbf16>, vector<4x4x8xf32> -> vector<4x4x8xf32>
    %205 = arith.addf %194, %204 : vector<4x4x8xf32>
    %c0_160 = arith.constant 0 : index
    %c0_161 = arith.constant 0 : index
    %c0_162 = arith.constant 0 : index
    %206 = vector.load %arg10[%c0_160, %c0_161, %c0_162] : memref<1x1x8xf32, #tpu.memory_space<vmem>>, vector<1x1x8xf32>
    %207 = vector.broadcast %206 : vector<1x1x8xf32> to vector<4x4x8xf32>
    %208 = arith.mulf %205, %207 : vector<4x4x8xf32>
    %c0_163 = arith.constant 0 : index
    %c0_164 = arith.constant 0 : index
    %c0_165 = arith.constant 0 : index
    %209 = vector.load %arg11[%c0_163, %c0_164, %c0_165] : memref<1x1x8xf32, #tpu.memory_space<vmem>>, vector<1x1x8xf32>
    %210 = vector.broadcast %209 : vector<1x1x8xf32> to vector<4x4x8xf32>
    %211 = arith.addf %208, %210 : vector<4x4x8xf32>
    %212 = arith.addf %105, %211 : vector<4x4x8xf32>
    %213 = vector.shape_cast %212 : vector<4x4x8xf32> to vector<1x4x4x8xf32>
    %214 = arith.truncf %213 : vector<1x4x4x8xf32> to vector<1x4x4x8xbf16>
    %c0_166 = arith.constant 0 : index
    %c0_167 = arith.constant 0 : index
    %c0_168 = arith.constant 0 : index
    %c0_169 = arith.constant 0 : index
    %215 = vector.load %arg12[%c0_166, %c0_167, %c0_168, %c0_169] : memref<1x4x4x8xbf16, #tpu.memory_space<vmem>>, vector<1x4x4x8xbf16>
    tpu.vector_store %arg12[%c0_166, %c0_167, %c0_168, %c0_169], %214 {strides = array<i32>} : memref<1x4x4x8xbf16, #tpu.memory_space<vmem>>, vector<1x4x4x8xbf16>,
    return
  }
  func.func @transform_0(%arg0: i32) -> (i32, i32, i32, i32) {
    %c0_i32 = arith.constant 0 : i32
    %c0_i32_0 = arith.constant 0 : i32
    %c0_i32_1 = arith.constant 0 : i32
    %c0_i32_2 = arith.constant 0 : i32
    return %arg0, %c0_i32, %c0_i32_0, %c0_i32_1 : i32, i32, i32, i32
  }
  func.func @transform_1(%arg0: i32) -> (i32, i32, i32) {
    %c0_i32 = arith.constant 0 : i32
    %c0_i32_0 = arith.constant 0 : i32
    %c0_i32_1 = arith.constant 0 : i32
    %c0_i32_2 = arith.constant 0 : i32
    return %c0_i32, %c0_i32_0, %c0_i32_1 : i32, i32, i32
  }
  func.func @transform_2(%arg0: i32) -> (i32, i32, i32) {
    %c0_i32 = arith.constant 0 : i32
    %c0_i32_0 = arith.constant 0 : i32
    %c0_i32_1 = arith.constant 0 : i32
    %c0_i32_2 = arith.constant 0 : i32
    return %c0_i32, %c0_i32_0, %c0_i32_1 : i32, i32, i32
  }
  func.func @transform_3(%arg0: i32) -> (i32, i32, i32) {
    %c0_i32 = arith.constant 0 : i32
    %c0_i32_0 = arith.constant 0 : i32
    %c0_i32_1 = arith.constant 0 : i32
    %c0_i32_2 = arith.constant 0 : i32
    return %c0_i32, %c0_i32_0, %c0_i32_1 : i32, i32, i32
  }
  func.func @transform_4(%arg0: i32) -> (i32, i32, i32, i32) {
    %c0_i32 = arith.constant 0 : i32
    %c0_i32_0 = arith.constant 0 : i32
    %c0_i32_1 = arith.constant 0 : i32
    %c0_i32_2 = arith.constant 0 : i32
    return %arg0, %c0_i32, %c0_i32_0, %c0_i32_1 : i32, i32, i32, i32
  }
  func.func @transform_5(%arg0: i32) -> (i32, i32, i32, i32) {
    %c0_i32 = arith.constant 0 : i32
    %c0_i32_0 = arith.constant 0 : i32
    %c0_i32_1 = arith.constant 0 : i32
    %c0_i32_2 = arith.constant 0 : i32
    return %arg0, %c0_i32, %c0_i32_0, %c0_i32_1 : i32, i32, i32, i32
  }
  func.func @transform_6(%arg0: i32) -> (i32, i32, i32, i32) {
    %c0_i32 = arith.constant 0 : i32
    %c0_i32_0 = arith.constant 0 : i32
    %c0_i32_1 = arith.constant 0 : i32
    %c0_i32_2 = arith.constant 0 : i32
    return %arg0, %c0_i32, %c0_i32_0, %c0_i32_1 : i32, i32, i32, i32
  }
  func.func @transform_7(%arg0: i32) -> (i32, i32, i32, i32) {
    %c0_i32 = arith.constant 0 : i32
    %c0_i32_0 = arith.constant 0 : i32
    %c0_i32_1 = arith.constant 0 : i32
    %c0_i32_2 = arith.constant 0 : i32
    return %arg0, %c0_i32, %c0_i32_0, %c0_i32_1 : i32, i32, i32, i32
  }
  func.func @transform_8(%arg0: i32) -> (i32, i32, i32) {
    %c0_i32 = arith.constant 0 : i32
    %c0_i32_0 = arith.constant 0 : i32
    %c0_i32_1 = arith.constant 0 : i32
    %c0_i32_2 = arith.constant 0 : i32
    return %c0_i32, %c0_i32_0, %c0_i32_1 : i32, i32, i32
  }
  func.func @transform_9(%arg0: i32) -> (i32, i32, i32) {
    %c0_i32 = arith.constant 0 : i32
    %c0_i32_0 = arith.constant 0 : i32
    %c0_i32_1 = arith.constant 0 : i32
    %c0_i32_2 = arith.constant 0 : i32
    return %c0_i32, %c0_i32_0, %c0_i32_1 : i32, i32, i32
  }
  func.func @transform_10(%arg0: i32) -> (i32, i32, i32) {
    %c0_i32 = arith.constant 0 : i32
    %c0_i32_0 = arith.constant 0 : i32
    %c0_i32_1 = arith.constant 0 : i32
    %c0_i32_2 = arith.constant 0 : i32
    return %c0_i32, %c0_i32_0, %c0_i32_1 : i32, i32, i32
  }
  func.func @transform_11(%arg0: i32) -> (i32, i32, i32, i32) {
    %c0_i32 = arith.constant 0 : i32
    %c0_i32_0 = arith.constant 0 : i32
    %c0_i32_1 = arith.constant 0 : i32
    %c0_i32_2 = arith.constant 0 : i32
    return %arg0, %c0_i32, %c0_i32_0, %c0_i32_1 : i32, i32, i32, i32
  }
}

</mosaic_0001>

<bundles_post_ra>
// kernel: cell_down_forward.5
= control target key start
LH: loop header
LB: loop body
LE: loop exit
PB: predicated region body
PF: predicated region fallthrough
CT: control target
= control target key end

     0   :  { %vm100_vm0 = vcmask 1042432   ;;  %vm75_vm1 = vcmask 48128   ;;  %vm209_vm2 = vcmask 60416   ;;  %s449_s1 = inlined_call_operand.vmem [shape: bf16[6,8], index: 1, kind: input, shape index: {}]   ;;  %s450_s0 = inlined_call_operand.vmem [shape: bf16[128,6], index: 0, kind: input, shape index: {}]   ;;  %s451_s2 = inlined_call_operand.vmem [shape: f32[1,8], index: 2, kind: input, shape index: {}]   ;;  %s452_s3 = inlined_call_operand.vmem [shape: f32[1,8], index: 3, kind: input, shape index: {}]   ;;  %s453_s4 = inlined_call_operand.vmem [shape: bf16[128,8], index: 4, kind: output, shape index: {}]  }
   0x1   :  { %v34_v0 = vld [vmem:[%s449_s1] sm:$0x7]  ;;  %v272_v3 = vld [vmem:[%s450_s0 + $0x10] sm:$0xff]  ;;  %v271_v6 = vld [vmem:[%s450_s0 + $0x8] sm:$0xff] }
   0x2   :  { %v102_v1 = vsel %vm100_vm0, %v34_v0, 0  ;;  %v270_v2 = vld [vmem:[%s450_s0] sm:$0xff]  ;;  %v276_v5 = vld [vmem:[%s450_s0 + $0x30] sm:$0xff]  ;;  %v273_v7 = vld [vmem:[%s450_s0 + $0x18] sm:$0xff] }
   0x3   :  { %111 = vmatpush.bf16.msra.mxu0 %v102_v1  ;;  %278 = vmatpush.bf16.msra.mxu1 %v102_v1  ;;  %v274_v4 = vld [vmem:[%s450_s0 + $0x20] sm:$0xff]  ;;  %v275_v8 = vld [vmem:[%s450_s0 + $0x28] sm:$0xff]  ;;  %v277_v9 = vld [vmem:[%s450_s0 + $0x38] sm:$0xff] }
   0x4   :  { %279 = vmatpush.bf16.msra.mxu2 %v102_v1  ;;  %280 = vmatpush.bf16.msra.mxu3 %v102_v1  ;;  %v346_v10 = vld [vmem:[%s451_s2] ss:$0 sm:$0xff] }
   0x5   :  { %v351_v11 = vld [vmem:[%s452_s3] ss:$0 sm:$0xff] }
   0x6   :  { %262 = vmatmul.msk.bf16.vlgmr.msra.gmra.mxu0 %vm75_vm1, %v270_v2  ;;  %264 = vmatmul.msk.bf16.vlgmr.msra.gmra.mxu1 %vm75_vm1, %v272_v3 }
   0x7   :  { %266 = vmatmul.msk.bf16.vlgmr.msra.gmra.mxu2 %vm75_vm1, %v274_v4  ;;  %268 = vmatmul.msk.bf16.vlgmr.msra.gmra.mxu3 %vm75_vm1, %v276_v5 }
  0x16   :  { %263 = vmatmul.msk.bf16.gmra.mxu0 %vm75_vm1, %v271_v6  ;;  %265 = vmatmul.msk.bf16.gmra.mxu1 %vm75_vm1, %v273_v7 }
  0x17   :  { %267 = vmatmul.msk.bf16.gmra.mxu2 %vm75_vm1, %v275_v8  ;;  %269 = vmatmul.msk.bf16.gmra.mxu3 %vm75_vm1, %v277_v9 }
  0x83   :  { %v113_v12 = vpop.f32.mrf.mxu0  ;;  %v123_v13 = vpop.f32.mrf.mxu1 }
  0x84   :  { %v157_v14 = vmul.f32 %v346_v10, %v113_v12  ;;  %v161_v15 = vmul.f32 %v346_v10, %v123_v13 }
  0x86   :  { %v177_v16 = vadd.f32 %v351_v11, %v157_v14  ;;  %v181_v17 = vadd.f32 %v351_v11, %v161_v15 }
  0x88   :  { %v193_v18 = vpack.c.bf16 %v177_v16, %v177_v16  ;;  %v197_v19 = vpack.c.bf16 %v181_v17, %v181_v17 }
  0x8a   :  { %210 = vst.msk [vmem:[%s453_s4] sm:$0xf] %vm209_vm2, %v193_v18  ;;  %v133_v20 = vpop.f32.mrf.mxu2  ;;  %v143_v21 = vpop.f32.mrf.mxu3 }
  0x8b   :  { %214 = vst.msk [vmem:[%s453_s4 + $0x10] sm:$0xf] %vm209_vm2, %v197_v19  ;;  %v165_v22 = vmul.f32 %v346_v10, %v133_v20  ;;  %v169_v23 = vmul.f32 %v346_v10, %v143_v21  ;;  %v115_v24 = vpop.f32.mrf.mxu0  ;;  %v125_v25 = vpop.f32.mrf.mxu1 }
  0x8c   :  { %v158_v26 = vmul.f32 %v346_v10, %v115_v24  ;;  %v162_v27 = vmul.f32 %v346_v10, %v125_v25 }
  0x8d   :  { %v185_v28 = vadd.f32 %v351_v11, %v165_v22  ;;  %v189_v29 = vadd.f32 %v351_v11, %v169_v23 }
  0x8e   :  { %v178_v30 = vadd.f32 %v351_v11, %v158_v26  ;;  %v182_v31 = vadd.f32 %v351_v11, %v162_v27 }
  0x8f   :  { %v201_v32 = vpack.c.bf16 %v185_v28, %v185_v28  ;;  %v205_v33 = vpack.c.bf16 %v189_v29, %v189_v29 }
  0x90   :  { %v194_v34 = vpack.c.bf16 %v178_v30, %v178_v30  ;;  %v198_v35 = vpack.c.bf16 %v182_v31, %v182_v31 }
  0x91   :  { %218 = vst.msk [vmem:[%s453_s4 + $0x20] sm:$0xf] %vm209_vm2, %v201_v32 }
  0x92   :  { %222 = vst.msk [vmem:[%s453_s4 + $0x30] sm:$0xf] %vm209_vm2, %v205_v33  ;;  %v135_v36 = vpop.f32.mrf.mxu2  ;;  %v145_v37 = vpop.f32.mrf.mxu3 }
  0x93   :  { %211 = vst.msk [vmem:[%s453_s4 + $0x4] sm:$0xf] %vm209_vm2, %v194_v34  ;;  %v166_v38 = vmul.f32 %v346_v10, %v135_v36  ;;  %v170_v39 = vmul.f32 %v346_v10, %v145_v37  ;;  %v118_v40 = vpop.f32.mrf.mxu0  ;;  %v128_v41 = vpop.f32.mrf.mxu1 }
  0x94   :  { %215 = vst.msk [vmem:[%s453_s4 + $0x14] sm:$0xf] %vm209_vm2, %v198_v35  ;;  %v159_v42 = vmul.f32 %v346_v10, %v118_v40  ;;  %v163_v43 = vmul.f32 %v346_v10, %v128_v41 }
  0x95   :  { %v186_v44 = vadd.f32 %v351_v11, %v166_v38  ;;  %v190_v45 = vadd.f32 %v351_v11, %v170_v39 }
  0x96   :  { %v179_v46 = vadd.f32 %v351_v11, %v159_v42  ;;  %v183_v47 = vadd.f32 %v351_v11, %v163_v43 }
  0x97   :  { %v202_v48 = vpack.c.bf16 %v186_v44, %v186_v44  ;;  %v206_v49 = vpack.c.bf16 %v190_v45, %v190_v45 }
  0x98   :  { %v195_v50 = vpack.c.bf16 %v179_v46, %v179_v46  ;;  %v199_v51 = vpack.c.bf16 %v183_v47, %v183_v47 }
  0x99   :  { %219 = vst.msk [vmem:[%s453_s4 + $0x24] sm:$0xf] %vm209_vm2, %v202_v48 }
  0x9a   :  { %223 = vst.msk [vmem:[%s453_s4 + $0x34] sm:$0xf] %vm209_vm2, %v206_v49  ;;  %v138_v52 = vpop.f32.mrf.mxu2  ;;  %v148_v53 = vpop.f32.mrf.mxu3 }
  0x9b   :  { %212 = vst.msk [vmem:[%s453_s4 + $0x8] sm:$0xf] %vm209_vm2, %v195_v50  ;;  %v167_v54 = vmul.f32 %v346_v10, %v138_v52  ;;  %v171_v55 = vmul.f32 %v346_v10, %v148_v53  ;;  %v120_v56 = vpop.f32.mrf.mxu0  ;;  %v130_v57 = vpop.f32.mrf.mxu1 }
  0x9c   :  { %216 = vst.msk [vmem:[%s453_s4 + $0x18] sm:$0xf] %vm209_vm2, %v199_v51  ;;  %v160_v58 = vmul.f32 %v346_v10, %v120_v56  ;;  %v164_v59 = vmul.f32 %v346_v10, %v130_v57 }
  0x9d   :  { %v187_v60 = vadd.f32 %v351_v11, %v167_v54  ;;  %v191_v61 = vadd.f32 %v351_v11, %v171_v55 }
  0x9e   :  { %v180_v62 = vadd.f32 %v351_v11, %v160_v58  ;;  %v184_v63 = vadd.f32 %v351_v11, %v164_v59 }
  0x9f   :  { %v203_v0 = vpack.c.bf16 %v187_v60, %v187_v60  ;;  %v207_v1 = vpack.c.bf16 %v191_v61, %v191_v61 }
  0xa0   :  { %v196_v2 = vpack.c.bf16 %v180_v62, %v180_v62  ;;  %v200_v3 = vpack.c.bf16 %v184_v63, %v184_v63 }
  0xa1   :  { %220 = vst.msk [vmem:[%s453_s4 + $0x28] sm:$0xf] %vm209_vm2, %v203_v0 }
  0xa2   :  { %224 = vst.msk [vmem:[%s453_s4 + $0x38] sm:$0xf] %vm209_vm2, %v207_v1  ;;  %v140_v4 = vpop.f32.mrf.mxu2  ;;  %v150_v5 = vpop.f32.mrf.mxu3 }
  0xa3   :  { %213 = vst.msk [vmem:[%s453_s4 + $0xc] sm:$0xf] %vm209_vm2, %v196_v2  ;;  %v168_v6 = vmul.f32 %v346_v10, %v140_v4  ;;  %v172_v7 = vmul.f32 %v346_v10, %v150_v5 }
  0xa4   :  { %217 = vst.msk [vmem:[%s453_s4 + $0x1c] sm:$0xf] %vm209_vm2, %v200_v3 }
  0xa5   :  { %v188_v8 = vadd.f32 %v351_v11, %v168_v6  ;;  %v192_v9 = vadd.f32 %v351_v11, %v172_v7 }
  0xa7   :  { %v204_v12 = vpack.c.bf16 %v188_v8, %v188_v8  ;;  %v208_v13 = vpack.c.bf16 %v192_v9, %v192_v9 }
  0xa9   :  { %221 = vst.msk [vmem:[%s453_s4 + $0x2c] sm:$0xf] %vm209_vm2, %v204_v12 }
  0xaa   :  { %225 = vst.msk [vmem:[%s453_s4 + $0x3c] sm:$0xf] %vm209_vm2, %v208_v13 }

// kernel: cell_down_forward.4
= control target key start
LH: loop header
LB: loop body
LE: loop exit
PB: predicated region body
PF: predicated region fallthrough
CT: control target
= control target key end

     0   :  { %vm100_vm0 = vcmask 1041408   ;;  %vm75_vm1 = vcmask 31744   ;;  %vm209_vm2 = vcmask 60416   ;;  %s449_s1 = inlined_call_operand.vmem [shape: bf16[4,8], index: 1, kind: input, shape index: {}]   ;;  %s450_s0 = inlined_call_operand.vmem [shape: bf16[128,4], index: 0, kind: input, shape index: {}]   ;;  %s451_s2 = inlined_call_operand.vmem [shape: f32[1,8], index: 2, kind: input, shape index: {}]   ;;  %s452_s3 = inlined_call_operand.vmem [shape: f32[1,8], index: 3, kind: input, shape index: {}]   ;;  %s453_s4 = inlined_call_operand.vmem [shape: bf16[128,8], index: 4, kind: output, shape index: {}]  }
   0x1   :  { %v34_v0 = vld [vmem:[%s449_s1] sm:$0x3]  ;;  %v272_v3 = vld [vmem:[%s450_s0 + $0x10] sm:$0xff]  ;;  %v271_v6 = vld [vmem:[%s450_s0 + $0x8] sm:$0xff] }
   0x2   :  { %v102_v1 = vsel %vm100_vm0, %v34_v0, 0  ;;  %v270_v2 = vld [vmem:[%s450_s0] sm:$0xff]  ;;  %v276_v5 = vld [vmem:[%s450_s0 + $0x30] sm:$0xff]  ;;  %v273_v7 = vld [vmem:[%s450_s0 + $0x18] sm:$0xff] }
   0x3   :  { %111 = vmatpush.bf16.msra.mxu0 %v102_v1  ;;  %278 = vmatpush.bf16.msra.mxu1 %v102_v1  ;;  %v274_v4 = vld [vmem:[%s450_s0 + $0x20] sm:$0xff]  ;;  %v275_v8 = vld [vmem:[%s450_s0 + $0x28] sm:$0xff]  ;;  %v277_v9 = vld [vmem:[%s450_s0 + $0x38] sm:$0xff] }
   0x4   :  { %279 = vmatpush.bf16.msra.mxu2 %v102_v1  ;;  %280 = vmatpush.bf16.msra.mxu3 %v102_v1  ;;  %v346_v10 = vld [vmem:[%s451_s2] ss:$0 sm:$0xff] }
   0x5   :  { %v351_v11 = vld [vmem:[%s452_s3] ss:$0 sm:$0xff] }
   0x6   :  { %262 = vmatmul.msk.bf16.vlgmr.msra.gmra.mxu0 %vm75_vm1, %v270_v2  ;;  %264 = vmatmul.msk.bf16.vlgmr.msra.gmra.mxu1 %vm75_vm1, %v272_v3 }
   0x7   :  { %266 = vmatmul.msk.bf16.vlgmr.msra.gmra.mxu2 %vm75_vm1, %v274_v4  ;;  %268 = vmatmul.msk.bf16.vlgmr.msra.gmra.mxu3 %vm75_vm1, %v276_v5 }
  0x16   :  { %263 = vmatmul.msk.bf16.gmra.mxu0 %vm75_vm1, %v271_v6  ;;  %265 = vmatmul.msk.bf16.gmra.mxu1 %vm75_vm1, %v273_v7 }
  0x17   :  { %267 = vmatmul.msk.bf16.gmra.mxu2 %vm75_vm1, %v275_v8  ;;  %269 = vmatmul.msk.bf16.gmra.mxu3 %vm75_vm1, %v277_v9 }
  0x83   :  { %v113_v12 = vpop.f32.mrf.mxu0  ;;  %v123_v13 = vpop.f32.mrf.mxu1 }
  0x84   :  { %v157_v14 = vmul.f32 %v346_v10, %v113_v12  ;;  %v161_v15 = vmul.f32 %v346_v10, %v123_v13 }
  0x86   :  { %v177_v16 = vadd.f32 %v351_v11, %v157_v14  ;;  %v181_v17 = vadd.f32 %v351_v11, %v161_v15 }
  0x88   :  { %v193_v18 = vpack.c.bf16 %v177_v16, %v177_v16  ;;  %v197_v19 = vpack.c.bf16 %v181_v17, %v181_v17 }
  0x8a   :  { %210 = vst.msk [vmem:[%s453_s4] sm:$0xf] %vm209_vm2, %v193_v18  ;;  %v133_v20 = vpop.f32.mrf.mxu2  ;;  %v143_v21 = vpop.f32.mrf.mxu3 }
  0x8b   :  { %214 = vst.msk [vmem:[%s453_s4 + $0x10] sm:$0xf] %vm209_vm2, %v197_v19  ;;  %v165_v22 = vmul.f32 %v346_v10, %v133_v20  ;;  %v169_v23 = vmul.f32 %v346_v10, %v143_v21  ;;  %v115_v24 = vpop.f32.mrf.mxu0  ;;  %v125_v25 = vpop.f32.mrf.mxu1 }
  0x8c   :  { %v158_v26 = vmul.f32 %v346_v10, %v115_v24  ;;  %v162_v27 = vmul.f32 %v346_v10, %v125_v25 }
  0x8d   :  { %v185_v28 = vadd.f32 %v351_v11, %v165_v22  ;;  %v189_v29 = vadd.f32 %v351_v11, %v169_v23 }
  0x8e   :  { %v178_v30 = vadd.f32 %v351_v11, %v158_v26  ;;  %v182_v31 = vadd.f32 %v351_v11, %v162_v27 }
  0x8f   :  { %v201_v32 = vpack.c.bf16 %v185_v28, %v185_v28  ;;  %v205_v33 = vpack.c.bf16 %v189_v29, %v189_v29 }
  0x90   :  { %v194_v34 = vpack.c.bf16 %v178_v30, %v178_v30  ;;  %v198_v35 = vpack.c.bf16 %v182_v31, %v182_v31 }
  0x91   :  { %218 = vst.msk [vmem:[%s453_s4 + $0x20] sm:$0xf] %vm209_vm2, %v201_v32 }
  0x92   :  { %222 = vst.msk [vmem:[%s453_s4 + $0x30] sm:$0xf] %vm209_vm2, %v205_v33  ;;  %v135_v36 = vpop.f32.mrf.mxu2  ;;  %v145_v37 = vpop.f32.mrf.mxu3 }
  0x93   :  { %211 = vst.msk [vmem:[%s453_s4 + $0x4] sm:$0xf] %vm209_vm2, %v194_v34  ;;  %v166_v38 = vmul.f32 %v346_v10, %v135_v36  ;;  %v170_v39 = vmul.f32 %v346_v10, %v145_v37  ;;  %v118_v40 = vpop.f32.mrf.mxu0  ;;  %v128_v41 = vpop.f32.mrf.mxu1 }
  0x94   :  { %215 = vst.msk [vmem:[%s453_s4 + $0x14] sm:$0xf] %vm209_vm2, %v198_v35  ;;  %v159_v42 = vmul.f32 %v346_v10, %v118_v40  ;;  %v163_v43 = vmul.f32 %v346_v10, %v128_v41 }
  0x95   :  { %v186_v44 = vadd.f32 %v351_v11, %v166_v38  ;;  %v190_v45 = vadd.f32 %v351_v11, %v170_v39 }
  0x96   :  { %v179_v46 = vadd.f32 %v351_v11, %v159_v42  ;;  %v183_v47 = vadd.f32 %v351_v11, %v163_v43 }
  0x97   :  { %v202_v48 = vpack.c.bf16 %v186_v44, %v186_v44  ;;  %v206_v49 = vpack.c.bf16 %v190_v45, %v190_v45 }
  0x98   :  { %v195_v50 = vpack.c.bf16 %v179_v46, %v179_v46  ;;  %v199_v51 = vpack.c.bf16 %v183_v47, %v183_v47 }
  0x99   :  { %219 = vst.msk [vmem:[%s453_s4 + $0x24] sm:$0xf] %vm209_vm2, %v202_v48 }
  0x9a   :  { %223 = vst.msk [vmem:[%s453_s4 + $0x34] sm:$0xf] %vm209_vm2, %v206_v49  ;;  %v138_v52 = vpop.f32.mrf.mxu2  ;;  %v148_v53 = vpop.f32.mrf.mxu3 }
  0x9b   :  { %212 = vst.msk [vmem:[%s453_s4 + $0x8] sm:$0xf] %vm209_vm2, %v195_v50  ;;  %v167_v54 = vmul.f32 %v346_v10, %v138_v52  ;;  %v171_v55 = vmul.f32 %v346_v10, %v148_v53  ;;  %v120_v56 = vpop.f32.mrf.mxu0  ;;  %v130_v57 = vpop.f32.mrf.mxu1 }
  0x9c   :  { %216 = vst.msk [vmem:[%s453_s4 + $0x18] sm:$0xf] %vm209_vm2, %v199_v51  ;;  %v160_v58 = vmul.f32 %v346_v10, %v120_v56  ;;  %v164_v59 = vmul.f32 %v346_v10, %v130_v57 }
  0x9d   :  { %v187_v60 = vadd.f32 %v351_v11, %v167_v54  ;;  %v191_v61 = vadd.f32 %v351_v11, %v171_v55 }
  0x9e   :  { %v180_v62 = vadd.f32 %v351_v11, %v160_v58  ;;  %v184_v63 = vadd.f32 %v351_v11, %v164_v59 }
  0x9f   :  { %v203_v0 = vpack.c.bf16 %v187_v60, %v187_v60  ;;  %v207_v1 = vpack.c.bf16 %v191_v61, %v191_v61 }
  0xa0   :  { %v196_v2 = vpack.c.bf16 %v180_v62, %v180_v62  ;;  %v200_v3 = vpack.c.bf16 %v184_v63, %v184_v63 }
  0xa1   :  { %220 = vst.msk [vmem:[%s453_s4 + $0x28] sm:$0xf] %vm209_vm2, %v203_v0 }
  0xa2   :  { %224 = vst.msk [vmem:[%s453_s4 + $0x38] sm:$0xf] %vm209_vm2, %v207_v1  ;;  %v140_v4 = vpop.f32.mrf.mxu2  ;;  %v150_v5 = vpop.f32.mrf.mxu3 }
  0xa3   :  { %213 = vst.msk [vmem:[%s453_s4 + $0xc] sm:$0xf] %vm209_vm2, %v196_v2  ;;  %v168_v6 = vmul.f32 %v346_v10, %v140_v4  ;;  %v172_v7 = vmul.f32 %v346_v10, %v150_v5 }
  0xa4   :  { %217 = vst.msk [vmem:[%s453_s4 + $0x1c] sm:$0xf] %vm209_vm2, %v200_v3 }
  0xa5   :  { %v188_v8 = vadd.f32 %v351_v11, %v168_v6  ;;  %v192_v9 = vadd.f32 %v351_v11, %v172_v7 }
  0xa7   :  { %v204_v12 = vpack.c.bf16 %v188_v8, %v188_v8  ;;  %v208_v13 = vpack.c.bf16 %v192_v9, %v192_v9 }
  0xa9   :  { %221 = vst.msk [vmem:[%s453_s4 + $0x2c] sm:$0xf] %vm209_vm2, %v204_v12 }
  0xaa   :  { %225 = vst.msk [vmem:[%s453_s4 + $0x3c] sm:$0xf] %vm209_vm2, %v208_v13 }

// kernel: cell_down_forward.6
= control target key start
LH: loop header
LB: loop body
LE: loop exit
PB: predicated region body
PF: predicated region fallthrough
CT: control target
= control target key end

     0   :  { %s1987_s21 = smov 0   ;;  %s2278_s0 = inlined_call_operand.vmem [shape: bf16[2,5,5,8], index: 0, kind: input, shape index: {}]   ;;  %s2279_s1 = inlined_call_operand.vmem [shape: bf16[2,5,5,8], index: 1, kind: input, shape index: {}]   ;;  %s2280_s2 = inlined_call_operand.vmem [shape: bf16[2,5,5,8], index: 2, kind: input, shape index: {}]   ;;  %s2281_s3 = inlined_call_operand.vmem [shape: bf16[2,5,5,8], index: 3, kind: input, shape index: {}]   ;;  %s2282_s4 = inlined_call_operand.vmem [shape: bf16[9,8,8], index: 4, kind: input, shape index: {}]   ;;  %s2283_s5 = inlined_call_operand.vmem [shape: f32[1,1,8], index: 5, kind: input, shape index: {}]   ;;  %s2284_s6 = inlined_call_operand.vmem [shape: f32[1,1,8], index: 6, kind: input, shape index: {}]   ;;  %s2285_s7 = inlined_call_operand.vmem [shape: bf16[2,5,5,8], index: 7, kind: input, shape index: {}]   ;;  %s2286_s8 = inlined_call_operand.vmem [shape: bf16[2,5,5,8], index: 8, kind: input, shape index: {}]   ;;  %s2287_s9 = inlined_call_operand.vmem [shape: bf16[2,5,5,8], index: 9, kind: input, shape index: {}]   ;;  %s2288_s10 = inlined_call_operand.vmem [shape: bf16[2,5,5,8], index: 10, kind: input, shape index: {}]   ;;  %s2289_s11 = inlined_call_operand.vmem [shape: f32[4,4,1], index: 11, kind: input, shape index: {}]   ;;  %s2290_s12 = inlined_call_operand.vmem [shape: bf16[2,4,4,8], index: 12, kind: output, shape index: {}]  }
   0x1 LB: > { %s1813_s22 = sadd.s32 4294967295, %s1919_s21   ;;  %p1817_p0 = scmp.ge.s32.totalorder %s1919_s21, 1  ;;  %s1919_s21 = sphi %s1987_s21, %s22_s21  }
   0x2   : > { %p432_p1 = scmp.lt.s32.totalorder %s1919_s21, 3 }
   0x4   : > { %p433_p2 = pnand %p1817_p0, %p432_p1 }
   0x5   : > { %p509_p3 = scmp.lt.s32.totalorder (!%p433_p2), %s1813_s22, 1 }
   0x6   : > { %436 = sbr.rel (%p433_p2) target bundleno = 295 (0x127), region = 68 }
   0xb   : > { %v1828_v0 = vld [vmem:[%s2282_s4 + $0x4] sm:$0xf]  ;;  %vm594_vm0 = vcmask 1043456   ;;  %v571_v2 = vld [vmem:[%s2282_s4] sm:$0xf]  ;;  %s2292_s22 = smov (!%p509_p3, %s1813_s22), 1 }
   0xc   : > { %v596_v1 = vsel %vm594_vm0, %v1828_v0, 0  ;;  %v663_v3 = vsel %vm594_vm0, %v571_v2, 0  ;;  %s2006_s27 = smul.u32 20, %s2292_s22  ;;  %v1837_v15 = vld [vmem:[%s2282_s4 + $0x8] sm:$0xf]  ;;  %vm590_vm1 = vcmask 64512  }
   0xd   : > { %605 = vmatpush.bf16.msra.mxu0 %v596_v1  ;;  %621 = vmatpush.bf16.msra.mxu1 %v596_v1  ;;  %v758_v25 = vsel %vm594_vm0, %v1837_v15, 0  ;;  %v1842_v54 = vld [vmem:[%s2282_s4 + $0xc] sm:$0xf]  ;;  %vm1669_vm2 = vcmask 58368  }
   0xe   : > { %637 = vmatpush.bf16.msra.mxu2 %v596_v1  ;;  %653 = vmatpush.bf16.msra.mxu3 %v596_v1  ;;  %s2012_s30 = scalar_lea.vmem %s2279_s1, %s2006_s27  ;;  %s2022_s15 = scalar_lea.vmem %s2278_s0, %s2006_s27  ;;  %v877_v59 = vsel %vm594_vm0, %v1842_v54, 0 }
   0xf   : > { %v572_v4 = vld [vmem:[%s2012_s30] sm:$0x3]  ;;  %v573_v5 = vld [vmem:[%s2012_s30 + $0x4] sm:$0x3]  ;;  %v574_v6 = vld [vmem:[%s2012_s30 + $0x8] sm:$0x3]  ;;  %s2055_s26 = scalar_lea.vmem %s2280_s2, %s2006_s27  ;;  %s528_s16 = scalar_lea.vmem %s2281_s3, %s2006_s27 }
  0x10   : > { %v576_v7 = vunpack.c.l.bf16 %v572_v4  ;;  %v577_v8 = vunpack.c.l.bf16 %v573_v5  ;;  %v578_v9 = vunpack.c.l.bf16 %v574_v6  ;;  %v575_v10 = vld [vmem:[%s2012_s30 + $0xc] sm:$0x3]  ;;  %v726_v17 = vld [vmem:[%s2022_s15] sm:$0x7]  ;;  %v727_v18 = vld [vmem:[%s2022_s15 + $0x4] sm:$0x7]  ;;  %s2166_s18 = scalar_lea.vmem %s2285_s7, %s2006_s27  ;;  %s2172_s23 = scalar_lea.vmem %s2286_s8, %s2006_s27 }
  0x11   : > { %672 = vmatpush.bf16.msrb.mxu0 %v663_v3  ;;  %688 = vmatpush.bf16.msrb.mxu1 %v663_v3  ;;  %v579_v11 = vunpack.c.l.bf16 %v575_v10  ;;  %v728_v22 = vld [vmem:[%s2022_s15 + $0x8] sm:$0x7]  ;;  %v729_v23 = vld [vmem:[%s2022_s15 + $0xc] sm:$0x7]  ;;  %v730_v26 = vunpack.c.l.bf16 %v726_v17  ;;  %v731_v27 = vunpack.c.l.bf16 %v727_v18  ;;  %v555_v28 = vld [vmem:[%s2022_s15] sm:$0x3]  ;;  %s2188_s25 = scalar_lea.vmem %s2287_s9, %s2006_s27 }
  0x12   : > { %704 = vmatpush.bf16.msrb.mxu2 %v663_v3  ;;  %720 = vmatpush.bf16.msrb.mxu3 %v663_v3  ;;  %v580_v12 = vmax.f32 %v576_v7, 0.0  ;;  %v581_v13 = vmax.f32 %v577_v8, 0.0  ;;  %v582_v14 = vmax.f32 %v578_v9, 0.0  ;;  %v556_v29 = vld [vmem:[%s2022_s15 + $0x4] sm:$0x3]  ;;  %v732_v30 = vunpack.c.l.bf16 %v728_v22 }
  0x13   : > { %v583_v16 = vmax.f32 %v579_v11, 0.0  ;;  %v733_v31 = vunpack.c.l.bf16 %v729_v23  ;;  %v557_v32 = vld [vmem:[%s2022_s15 + $0x8] sm:$0x3]  ;;  %v558_v33 = vld [vmem:[%s2022_s15 + $0xc] sm:$0x3]  ;;  %v559_v34 = vunpack.c.l.bf16 %v555_v28  ;;  %v560_v35 = vunpack.c.l.bf16 %v556_v29 }
  0x14   : > { %v584_v19 = vpack.c.bf16 %v580_v12, %v580_v12  ;;  %v585_v20 = vpack.c.bf16 %v581_v13, %v581_v13  ;;  %v586_v21 = vpack.c.bf16 %v582_v14, %v582_v14  ;;  %v734_v36 = vmax.f32 %v730_v26, 0.0  ;;  %v1847_v14 = vld [vmem:[%s2282_s4 + $0x10] sm:$0xf]  ;;  %v855_v18 = vld [vmem:[%s2055_s26] sm:$0x3] }
  0x15   : > { %v587_v24 = vpack.c.bf16 %v583_v16, %v583_v16  ;;  %v735_v37 = vmax.f32 %v731_v27, 0.0  ;;  %v561_v38 = vunpack.c.l.bf16 %v557_v32  ;;  %v562_v39 = vunpack.c.l.bf16 %v558_v33  ;;  %v1852_v32 = vld [vmem:[%s2282_s4 + $0x14] sm:$0xf] }
  0x16   : > { %1829 = vmatmul.msk.bf16.vlgmr.msra.gmra.mxu0 %vm590_vm1, %v584_v19  ;;  %1830 = vmatmul.msk.bf16.vlgmr.msra.gmra.mxu1 %vm590_vm1, %v585_v20  ;;  %v736_v40 = vmax.f32 %v732_v30, 0.0  ;;  %v737_v41 = vmax.f32 %v733_v31, 0.0  ;;  %v563_v42 = vmax.f32 %v559_v34, 0.0  ;;  %v564_v43 = vmax.f32 %v560_v35, 0.0  ;;  %v856_v19 = vld [vmem:[%s2055_s26 + $0x4] sm:$0x3] }
  0x17   : > { %1831 = vmatmul.msk.bf16.vlgmr.msra.gmra.mxu2 %vm590_vm1, %v586_v21  ;;  %1832 = vmatmul.msk.bf16.vlgmr.msra.gmra.mxu3 %vm590_vm1, %v587_v24  ;;  %v738_v44 = vpack.c.bf16 %v734_v36, %v734_v36  ;;  %v739_v45 = vpack.c.bf16 %v735_v37, %v735_v37  ;;  %v565_v46 = vmax.f32 %v561_v38, 0.0  ;;  %v566_v47 = vmax.f32 %v562_v39, 0.0  ;;  %v857_v20 = vld [vmem:[%s2055_s26 + $0x8] sm:$0x3]  ;;  %v858_v21 = vld [vmem:[%s2055_s26 + $0xc] sm:$0x3] }
  0x18   : > { %819 = vmatpush.bf16.msra.mxu2 %v758_v25  ;;  %845 = vmatpush.bf16.msra.mxu3 %v758_v25  ;;  %v740_v48 = vpack.c.bf16 %v736_v40, %v736_v40  ;;  %v741_v49 = vpack.c.bf16 %v737_v41, %v737_v41  ;;  %v567_v50 = vpack.c.bf16 %v563_v42, %v563_v42  ;;  %v966_v17 = vsel %vm594_vm0, %v1847_v14, 0  ;;  %v1033_v35 = vld [vmem:[%s2055_s26] sm:$0x7]  ;;  %v1034_v36 = vld [vmem:[%s2055_s26 + $0x4] sm:$0x7] }
  0x19   : > { %767 = vmatpush.bf16.msra.mxu0 %v758_v25  ;;  %793 = vmatpush.bf16.msra.mxu1 %v758_v25  ;;  %v568_v51 = vpack.c.bf16 %v564_v43, %v564_v43  ;;  %v745_v52 = vunpack.c.l.b16 %v738_v44  ;;  %v774_v53 = vunpack.c.l.b16 %v739_v45  ;;  %v569_v55 = vpack.c.bf16 %v565_v46, %v565_v46  ;;  %v1035_v37 = vld [vmem:[%s2055_s26 + $0x8] sm:$0x7]  ;;  %v1036_v38 = vld [vmem:[%s2055_s26 + $0xc] sm:$0x7]  ;;  %v944_v42 = vld [vmem:[%s528_s16] sm:$0x3] }
  0x1a   : > { %v570_v56 = vpack.c.bf16 %v566_v47, %v566_v47  ;;  %v800_v57 = vunpack.c.l.b16 %v740_v48  ;;  %v826_v58 = vunpack.c.l.b16 %v741_v49  ;;  %v859_v22 = vunpack.c.l.bf16 %v855_v18  ;;  %v945_v43 = vld [vmem:[%s528_s16 + $0x4] sm:$0x3]  ;;  %v946_v46 = vld [vmem:[%s528_s16 + $0x8] sm:$0x3]  ;;  %v947_v47 = vld [vmem:[%s528_s16 + $0xc] sm:$0x3] }
  0x1b   : > { %v746_v60 = vpack.c.b16 %v745_v52, %v745_v52  ;;  %v775_v61 = vpack.c.b16 %v774_v53, %v774_v53  ;;  %v860_v23 = vunpack.c.l.bf16 %v856_v19  ;;  %v861_v24 = vunpack.c.l.bf16 %v857_v20  ;;  %s1898_s16 = sshll.u32 %s2292_s22, 3 }
  0x1c   : > { %v801_v62 = vpack.c.b16 %v800_v57, %v800_v57  ;;  %v827_v63 = vpack.c.b16 %v826_v58, %v826_v58  ;;  %v862_v25 = vunpack.c.l.bf16 %v858_v21  ;;  %v863_v26 = vmax.f32 %v859_v22, 0.0  ;;  %s553_s19 = scalar_lea.vmem %s2290_s12, %s1898_s16 }
  0x1d   : > { %v750_v0 = vshll.u32 %v746_v60, 16  ;;  %v779_v1 = vshll.u32 %v775_v61, 16  ;;  %v748_v4 = vshrl.u32 %v746_v60, 16  ;;  %v777_v6 = vshrl.u32 %v775_v61, 16 }
  0x1e   : > { %v805_v2 = vshll.u32 %v801_v62, 16  ;;  %v831_v3 = vshll.u32 %v827_v63, 16  ;;  %v803_v8 = vshrl.u32 %v801_v62, 16  ;;  %v829_v10 = vshrl.u32 %v827_v63, 16 }
  0x1f   : > { %v752_v5 = vrot.slane %v750_v0, 1  ;;  %v781_v7 = vrot.slane %v779_v1, 1  ;;  %v864_v27 = vmax.f32 %v860_v23, 0.0  ;;  %v865_v28 = vmax.f32 %v861_v24, 0.0 }
  0x20   : > { %v807_v9 = vrot.slane %v805_v2, 1  ;;  %v833_v11 = vrot.slane %v831_v3, 1  ;;  %v866_v29 = vmax.f32 %v862_v25, 0.0  ;;  %v867_v30 = vpack.c.bf16 %v863_v26, %v863_v26 }
  0x21   : > { %v753_v12 = vor.u32 %v752_v5, %v748_v4  ;;  %v782_v13 = vor.u32 %v781_v7, %v777_v6  ;;  %v868_v31 = vpack.c.bf16 %v864_v27, %v864_v27  ;;  %v869_v33 = vpack.c.bf16 %v865_v28, %v865_v28  ;;  %v1861_v4 = vld [vmem:[%s2282_s4 + $0x18] sm:$0xf]  ;;  %v1870_v28 = vld [vmem:[%s2282_s4 + $0x1c] sm:$0xf] }
  0x22   : > { %v808_v15 = vor.u32 %v807_v9, %v803_v8  ;;  %v834_v16 = vor.u32 %v833_v11, %v829_v10  ;;  %v870_v34 = vpack.c.bf16 %v866_v29, %v866_v29  ;;  %v1065_v39 = vsel %vm594_vm0, %v1852_v32, 0  ;;  %v1857_v32 = vld [vmem:[%s2022_s15 + $0x4] sm:$0x3] }
  0x23   : > { %v1037_v40 = vunpack.c.l.bf16 %v1033_v35  ;;  %v1038_v41 = vunpack.c.l.bf16 %v1034_v36  ;;  %v1039_v44 = vunpack.c.l.bf16 %v1035_v37  ;;  %v1040_v45 = vunpack.c.l.bf16 %v1036_v38  ;;  %v1860_v35 = vld [vmem:[%s2022_s15 + $0x10] sm:$0x3] }
  0x24   : > { %v948_v48 = vunpack.c.l.bf16 %v944_v42  ;;  %v949_v49 = vunpack.c.l.bf16 %v945_v43  ;;  %v950_v52 = vunpack.c.l.bf16 %v946_v46  ;;  %v951_v53 = vunpack.c.l.bf16 %v947_v47  ;;  %v1879_v46 = vld [vmem:[%s2282_s4 + $0x20] sm:$0xf]  ;;  %v1875_v47 = vld [vmem:[%s2022_s15 + $0x4] sm:$0x7] }
  0x25   : > { %v1043_v54 = vmax.f32 %v1039_v44, 0.0  ;;  %v1185_v9 = vsel %vm594_vm0, %v1861_v4, 0  ;;  %v1167_v36 = vunpack.c.l.bf16 %v1857_v32 }
  0x26   : > { %1833 = vmatmul.msk.bf16.vlgmr.msrb.gmra.mxu0 %vm590_vm1, %v567_v50  ;;  %1834 = vmatmul.msk.bf16.vlgmr.msrb.gmra.mxu1 %vm590_vm1, %v568_v51  ;;  %v1041_v50 = vmax.f32 %v1037_v40, 0.0  ;;  %v1042_v51 = vmax.f32 %v1038_v41, 0.0  ;;  %v953_v57 = vmax.f32 %v949_v49, 0.0  ;;  %v954_v60 = vmax.f32 %v950_v52, 0.0  ;;  %v1878_v52 = vld [vmem:[%s2022_s15 + $0x10] sm:$0x7] }
  0x27   : > { %1835 = vmatmul.msk.bf16.vlgmr.msrb.gmra.mxu2 %vm590_vm1, %v569_v55  ;;  %1836 = vmatmul.msk.bf16.vlgmr.msrb.gmra.mxu3 %vm590_vm1, %v570_v56  ;;  %v1044_v55 = vmax.f32 %v1040_v45, 0.0  ;;  %v952_v56 = vmax.f32 %v948_v48, 0.0  ;;  %v955_v61 = vmax.f32 %v951_v53, 0.0  ;;  %v1047_v62 = vpack.c.bf16 %v1043_v54, %v1043_v54 }
  0x28   : > { %918 = vmatpush.bf16.msrb.mxu2 %v877_v59  ;;  %934 = vmatpush.bf16.msrb.mxu3 %v877_v59  ;;  %v1045_v58 = vpack.c.bf16 %v1041_v50, %v1041_v50  ;;  %v957_v1 = vpack.c.bf16 %v953_v57, %v953_v57  ;;  %v958_v5 = vpack.c.bf16 %v954_v60, %v954_v60  ;;  %v1171_v40 = vmax.f32 %v1167_v36, 0.0  ;;  %v1876_v50 = vld [vmem:[%s2022_s15 + $0x8] sm:$0x7]  ;;  %v1868_v60 = vld [vmem:[%s2012_s30 + $0xc] sm:$0x3] }
  0x29   : > { %886 = vmatpush.bf16.msrb.mxu0 %v877_v59  ;;  %902 = vmatpush.bf16.msrb.mxu1 %v877_v59  ;;  %v1046_v59 = vpack.c.bf16 %v1042_v51, %v1042_v51  ;;  %v1048_v63 = vpack.c.bf16 %v1044_v55, %v1044_v55  ;;  %v956_v0 = vpack.c.bf16 %v952_v56, %v952_v56  ;;  %v1107_v7 = vunpack.c.l.b16 %v1047_v62  ;;  %v1877_v51 = vld [vmem:[%s2022_s15 + $0xc] sm:$0x7]  ;;  %v1866_v56 = vld [vmem:[%s2012_s30 + $0x4] sm:$0x3]  ;;  %v1867_v57 = vld [vmem:[%s2012_s30 + $0x8] sm:$0x3] }
  0x2a   : > { %v1052_v2 = vunpack.c.l.b16 %v1045_v58  ;;  %v959_v6 = vpack.c.bf16 %v955_v61, %v955_v61  ;;  %v1175_v44 = vpack.c.bf16 %v1171_v40, %v1171_v40  ;;  %v1374_v53 = vsel %vm594_vm0, %v1879_v46, 0  ;;  %v1869_v61 = vld [vmem:[%s2012_s30 + $0x10] sm:$0x3]  ;;  %s2201_s30 = scalar_lea.vmem %s2288_s10, %s2006_s27 }
  0x2b   : > { %v1081_v3 = vunpack.c.l.b16 %v1046_v59  ;;  %v1133_v8 = vunpack.c.l.b16 %v1048_v63  ;;  %v1346_v54 = vunpack.c.l.bf16 %v1875_v47  ;;  %v1347_v55 = vunpack.c.l.bf16 %v1876_v50 }
  0x2c   : > { %v1053_v10 = vpack.c.b16 %v1052_v2, %v1052_v2  ;;  %v1348_v58 = vunpack.c.l.bf16 %v1877_v51  ;;  %v1349_v59 = vunpack.c.l.bf16 %v1878_v52  ;;  %v1257_v63 = vunpack.c.l.bf16 %v1866_v56  ;;  %v1635_v2 = vld [vmem:[%s2289_s11 + $0x8] sm:$0xf] }
  0x2d   : > { %v1082_v11 = vpack.c.b16 %v1081_v3, %v1081_v3  ;;  %v1350_v62 = vmax.f32 %v1346_v54, 0.0  ;;  %v1633_v3 = vld [vmem:[%s2289_s11] sm:$0xf]  ;;  %v1259_v4 = vunpack.c.l.bf16 %v1868_v60 }
  0x2e   : > { %v1057_v14 = vshll.u32 %v1053_v10, 16  ;;  %v1055_v18 = vshrl.u32 %v1053_v10, 16 }
  0x2f   : > { %v1084_v20 = vshrl.u32 %v1082_v11, 16 }
  0x30   : > { %v1059_v19 = vrot.slane %v1057_v14, 1 }
  0x32   : > { %v1060_v26 = vor.u32 %v1059_v19, %v1055_v18 }
  0x36   : > { %1838 = vmatmul.msk.bf16.vlgmr.msra.gmra.mxu0 %vm590_vm1, %v753_v12  ;;  %1839 = vmatmul.msk.bf16.vlgmr.msra.gmra.mxu1 %vm590_vm1, %v782_v13  ;;  %v1108_v12 = vpack.c.b16 %v1107_v7, %v1107_v7  ;;  %v1134_v13 = vpack.c.b16 %v1133_v8, %v1133_v8  ;;  %v1353_v7 = vmax.f32 %v1349_v59, 0.0  ;;  %v1921_v8 = vmov 0  }
  0x37   : > { %1840 = vmatmul.msk.bf16.vlgmr.msra.gmra.mxu2 %vm590_vm1, %v808_v15  ;;  %1841 = vmatmul.msk.bf16.vlgmr.msra.gmra.mxu3 %vm590_vm1, %v834_v16  ;;  %v1086_v15 = vshll.u32 %v1082_v11, 16  ;;  %v1354_v11 = vpack.c.bf16 %v1350_v62, %v1350_v62 }
  0x38   : > { %1007 = vmatpush.bf16.msra.mxu2 %v966_v17  ;;  %1023 = vmatpush.bf16.msra.mxu3 %v966_v17  ;;  %v1112_v16 = vshll.u32 %v1108_v12, 16  ;;  %v1110_v22 = vshrl.u32 %v1108_v12, 16  ;;  %v1136_v24 = vshrl.u32 %v1134_v13, 16 }
  0x39   : > { %975 = vmatpush.bf16.msra.mxu0 %v966_v17  ;;  %991 = vmatpush.bf16.msra.mxu1 %v966_v17  ;;  %v1138_v17 = vshll.u32 %v1134_v13, 16  ;;  %v1088_v21 = vrot.slane %v1086_v15, 1  ;;  %v1263_v13 = vmax.f32 %v1259_v4, 0.0  ;;  %v1361_v19 = vunpack.c.l.b16 %v1354_v11 }
  0x3a   : > { %v1114_v23 = vrot.slane %v1112_v16, 1  ;;  %1910 = vset.pattern.permute.xlu1 %v1921_v8  ;;  %1909 = vset.pattern.permute.xlu0 %v1921_v8  ;;  %v1357_v16 = vpack.c.bf16 %v1353_v7, %v1353_v7 }
  0x3b   : > { %v1140_v25 = vrot.slane %v1138_v17, 1  ;;  %v1089_v27 = vor.u32 %v1088_v21, %v1084_v20  ;;  %1649 = vperm.xlu1 %1910, %v1635_v2   ;;  %1639 = vperm.xlu0 %1909, %v1633_v3   ;;  %v1636_v21 = vld [vmem:[%s2289_s11 + $0xc] sm:$0xf] }
  0x3c   : > { %v1115_v29 = vor.u32 %v1114_v23, %v1110_v22  ;;  %v1634_v22 = vld [vmem:[%s2289_s11 + $0x4] sm:$0xf]  ;;  %v1267_v23 = vpack.c.bf16 %v1263_v13, %v1263_v13 }
  0x43   : > { %1654 = vperm.xlu1 %1910, %v1636_v21   ;;  %1644 = vperm.xlu0 %1909, %v1634_v22  }
  0x46   : > { %1843 = vmatmul.msk.bf16.vlgmr.msrb.gmra.mxu0 %vm590_vm1, %v867_v30  ;;  %1844 = vmatmul.msk.bf16.vlgmr.msrb.gmra.mxu1 %vm590_vm1, %v868_v31  ;;  %v1141_v30 = vor.u32 %v1140_v25, %v1136_v24  ;;  %v1275_v31 = vsel %vm594_vm0, %v1870_v28, 0 }
  0x47   : > { %1845 = vmatmul.msk.bf16.vlgmr.msrb.gmra.mxu2 %vm590_vm1, %v869_v33  ;;  %1846 = vmatmul.msk.bf16.vlgmr.msrb.gmra.mxu3 %vm590_vm1, %v870_v34  ;;  %v1858_v33 = vld [vmem:[%s2022_s15 + $0x8] sm:$0x3]  ;;  %v1859_v34 = vld [vmem:[%s2022_s15 + $0xc] sm:$0x3] }
  0x48   : > { %1126 = vmatpush.bf16.msrb.mxu2 %v1065_v39  ;;  %1152 = vmatpush.bf16.msrb.mxu3 %v1065_v39  ;;  %v1168_v37 = vunpack.c.l.bf16 %v1858_v33  ;;  %v1169_v38 = vunpack.c.l.bf16 %v1859_v34 }
  0x49   : > { %1074 = vmatpush.bf16.msrb.mxu0 %v1065_v39  ;;  %1100 = vmatpush.bf16.msrb.mxu1 %v1065_v39  ;;  %v1170_v39 = vunpack.c.l.bf16 %v1860_v35 }
  0x4a   : > { %v1172_v41 = vmax.f32 %v1168_v37, 0.0  ;;  %v1173_v42 = vmax.f32 %v1169_v38, 0.0 }
  0x4b   : > { %v1174_v43 = vmax.f32 %v1170_v39, 0.0 }
  0x4c   : > { %v1176_v45 = vpack.c.bf16 %v1172_v41, %v1172_v41  ;;  %v1177_v48 = vpack.c.bf16 %v1173_v42, %v1173_v42 }
  0x4d   : > { %v1178_v49 = vpack.c.bf16 %v1174_v43, %v1174_v43 }
  0x56   : > { %1848 = vmatmul.msk.bf16.vlgmr.msra.gmra.mxu0 %vm590_vm1, %v956_v0  ;;  %1849 = vmatmul.msk.bf16.vlgmr.msra.gmra.mxu1 %vm590_vm1, %v957_v1  ;;  %v1258_v0 = vunpack.c.l.bf16 %v1867_v57  ;;  %v1351_v1 = vmax.f32 %v1347_v55, 0.0 }
  0x57   : > { %1850 = vmatmul.msk.bf16.vlgmr.msra.gmra.mxu2 %vm590_vm1, %v958_v5  ;;  %1851 = vmatmul.msk.bf16.vlgmr.msra.gmra.mxu3 %vm590_vm1, %v959_v6  ;;  %v1260_v5 = vunpack.c.l.bf16 %v1869_v61  ;;  %v1352_v6 = vmax.f32 %v1348_v58, 0.0 }
  0x58   : > { %1226 = vmatpush.bf16.msra.mxu2 %v1185_v9  ;;  %1242 = vmatpush.bf16.msra.mxu3 %v1185_v9  ;;  %v1262_v10 = vmax.f32 %v1258_v0, 0.0  ;;  %v1355_v12 = vpack.c.bf16 %v1351_v1, %v1351_v1 }
  0x59   : > { %1194 = vmatpush.bf16.msra.mxu0 %v1185_v9  ;;  %1210 = vmatpush.bf16.msra.mxu1 %v1185_v9  ;;  %v1261_v9 = vmax.f32 %v1257_v63, 0.0  ;;  %v1264_v14 = vmax.f32 %v1260_v5, 0.0  ;;  %v1356_v15 = vpack.c.bf16 %v1352_v6, %v1352_v6 }
  0x5a   : > { %v1266_v18 = vpack.c.bf16 %v1262_v10, %v1262_v10  ;;  %v1390_v20 = vunpack.c.l.b16 %v1355_v12 }
  0x5b   : > { %v1265_v17 = vpack.c.bf16 %v1261_v9, %v1261_v9  ;;  %v1268_v24 = vpack.c.bf16 %v1264_v14, %v1264_v14  ;;  %v1416_v25 = vunpack.c.l.b16 %v1356_v15 }
  0x5c   : > { %v1391_v28 = vpack.c.b16 %v1390_v20, %v1390_v20 }
  0x5e   : > { %v1395_v32 = vshll.u32 %v1391_v28, 16  ;;  %v1393_v37 = vshrl.u32 %v1391_v28, 16 }
  0x60   : > { %v1397_v38 = vrot.slane %v1395_v32, 1 }
  0x66   : > { %1853 = vmatmul.msk.bf16.vlgmr.msrb.gmra.mxu0 %vm590_vm1, %v1060_v26  ;;  %1854 = vmatmul.msk.bf16.vlgmr.msrb.gmra.mxu1 %vm590_vm1, %v1089_v27  ;;  %v1442_v26 = vunpack.c.l.b16 %v1357_v16  ;;  %v1362_v27 = vpack.c.b16 %v1361_v19, %v1361_v19 }
  0x67   : > { %1855 = vmatmul.msk.bf16.vlgmr.msrb.gmra.mxu2 %vm590_vm1, %v1115_v29  ;;  %1856 = vmatmul.msk.bf16.vlgmr.msrb.gmra.mxu3 %vm590_vm1, %v1141_v30  ;;  %v1417_v29 = vpack.c.b16 %v1416_v25, %v1416_v25 }
  0x68   : > { %1316 = vmatpush.bf16.msrb.mxu2 %v1275_v31  ;;  %1332 = vmatpush.bf16.msrb.mxu3 %v1275_v31  ;;  %v1443_v30 = vpack.c.b16 %v1442_v26, %v1442_v26  ;;  %v1364_v35 = vshrl.u32 %v1362_v27, 16 }
  0x69   : > { %1284 = vmatpush.bf16.msrb.mxu0 %v1275_v31  ;;  %1300 = vmatpush.bf16.msrb.mxu1 %v1275_v31  ;;  %v1366_v31 = vshll.u32 %v1362_v27, 16  ;;  %v1421_v33 = vshll.u32 %v1417_v29, 16  ;;  %v1419_v39 = vshrl.u32 %v1417_v29, 16 }
  0x6a   : > { %v1447_v34 = vshll.u32 %v1443_v30, 16  ;;  %v1445_v41 = vshrl.u32 %v1443_v30, 16 }
  0x6b   : > { %v1368_v36 = vrot.slane %v1366_v31, 1  ;;  %v1423_v40 = vrot.slane %v1421_v33, 1 }
  0x6c   : > { %v1449_v42 = vrot.slane %v1447_v34, 1 }
  0x6d   : > { %v1369_v43 = vor.u32 %v1368_v36, %v1364_v35  ;;  %v1424_v47 = vor.u32 %v1423_v40, %v1419_v39 }
  0x76   : > { %1862 = vmatmul.msk.bf16.vlgmr.msra.gmra.mxu0 %vm590_vm1, %v1175_v44  ;;  %1863 = vmatmul.msk.bf16.vlgmr.msra.gmra.mxu1 %vm590_vm1, %v1176_v45  ;;  %v1398_v44 = vor.u32 %v1397_v38, %v1393_v37 }
  0x77   : > { %1864 = vmatmul.msk.bf16.vlgmr.msra.gmra.mxu2 %vm590_vm1, %v1177_v48  ;;  %1865 = vmatmul.msk.bf16.vlgmr.msra.gmra.mxu3 %vm590_vm1, %v1178_v49  ;;  %v1450_v48 = vor.u32 %v1449_v42, %v1445_v41  ;;  %v1487_v41 = vld [vmem:[%s2166_s18] sm:$0x3] }
  0x78   : > { %1435 = vmatpush.bf16.msra.mxu2 %v1374_v53  ;;  %1461 = vmatpush.bf16.msra.mxu3 %v1374_v53  ;;  %v1499_v42 = vld [vmem:[%s2172_s23] sm:$0x3] }
  0x79   : > { %1383 = vmatpush.bf16.msra.mxu0 %v1374_v53  ;;  %1409 = vmatpush.bf16.msra.mxu1 %v1374_v53 }
  0x86   : > { %1871 = vmatmul.msk.bf16.vlgmr.msrb.gmra.mxu0 %vm590_vm1, %v1265_v17  ;;  %1872 = vmatmul.msk.bf16.vlgmr.msrb.gmra.mxu1 %vm590_vm1, %v1266_v18 }
  0x87   : > { %1873 = vmatmul.msk.bf16.vlgmr.msrb.gmra.mxu2 %vm590_vm1, %v1267_v23  ;;  %1874 = vmatmul.msk.bf16.vlgmr.msrb.gmra.mxu3 %vm590_vm1, %v1268_v24 }
  0x93   : > { %v607_v45 = vpop.f32.mrf.mxu0  ;;  %v623_v46 = vpop.f32.mrf.mxu1 }
  0x96   : > { %1880 = vmatmul.msk.bf16.vlgmr.msra.gmra.mxu0 %vm590_vm1, %v1369_v43  ;;  %1881 = vmatmul.msk.bf16.vlgmr.msra.gmra.mxu1 %vm590_vm1, %v1398_v44  ;;  %v1511_v43 = vld [vmem:[%s2166_s18] sm:$0x7]  ;;  %v1488_v44 = vld [vmem:[%s2166_s18 + $0x4] sm:$0x3] }
  0x97   : > { %1882 = vmatmul.msk.bf16.vlgmr.msra.gmra.mxu2 %vm590_vm1, %v1424_v47  ;;  %1883 = vmatmul.msk.bf16.vlgmr.msra.gmra.mxu3 %vm590_vm1, %v1450_v48 }
  0x9a   : > { %v639_v49 = vpop.f32.mrf.mxu2  ;;  %v655_v50 = vpop.f32.mrf.mxu3 }
  0x9b   : > { %v609_v51 = vpop.f32.mrf.mxu0  ;;  %v625_v52 = vpop.f32.mrf.mxu1 }
  0x9c   : > { %v1491_v51 = vunpack.c.l.bf16 %v1487_v41  ;;  %v1503_v52 = vunpack.c.l.bf16 %v1499_v42 }
  0xa2   : > { %v641_v53 = vpop.f32.mrf.mxu2  ;;  %v657_v54 = vpop.f32.mrf.mxu3 }
  0xa3   : > { %v674_v55 = vpop.f32.mrf.mxu0  ;;  %v690_v56 = vpop.f32.mrf.mxu1  ;;  %v1515_v53 = vunpack.c.l.bf16 %v1511_v43  ;;  %v1492_v54 = vunpack.c.l.bf16 %v1488_v44  ;;  %v1538_v43 = vld [vmem:[%s2188_s25 + $0xc] sm:$0x3] }
  0xa4   : > { %v675_v57 = vadd.f32 %v674_v55, %v607_v45  ;;  %v691_v58 = vadd.f32 %v690_v56, %v623_v46  ;;  %v1500_v45 = vld [vmem:[%s2172_s23 + $0x4] sm:$0x3] }
  0xa5   : > { %v1512_v46 = vld [vmem:[%s2166_s18 + $0x4] sm:$0x7]  ;;  %v1504_v55 = vunpack.c.l.bf16 %v1500_v45 }
  0xa6   : > { %v1516_v56 = vunpack.c.l.bf16 %v1512_v46 }
  0xaa   : > { %v706_v59 = vpop.f32.mrf.mxu2  ;;  %v722_v60 = vpop.f32.mrf.mxu3 }
  0xab   : > { %v707_v61 = vadd.f32 %v706_v59, %v639_v49  ;;  %v723_v62 = vadd.f32 %v722_v60, %v655_v50  ;;  %v676_v63 = vpop.f32.mrf.mxu0  ;;  %v692_v0 = vpop.f32.mrf.mxu1  ;;  %v1513_v59 = vld [vmem:[%s2166_s18 + $0x8] sm:$0x7]  ;;  %v1507_v60 = vadd.f32 %v1503_v52, %v1491_v51 }
  0xac   : > { %v1502_v63 = vld [vmem:[%s2172_s23 + $0xc] sm:$0x3]  ;;  %v1535_v0 = vld [vmem:[%s2188_s25] sm:$0x3] }
  0xb2   : > { %v708_v1 = vpop.f32.mrf.mxu2  ;;  %v724_v2 = vpop.f32.mrf.mxu3 }
  0xb3   : > { %v769_v3 = vpop.f32.mrf.mxu0  ;;  %v795_v4 = vpop.f32.mrf.mxu1  ;;  %v1514_v1 = vld [vmem:[%s2166_s18 + $0xc] sm:$0x7]  ;;  %v1508_v2 = vadd.f32 %v1504_v55, %v1492_v54  ;;  %v1549_v55 = vld [vmem:[%s2201_s30 + $0x8] sm:$0x3] }
  0xb4   : > { %v851_v5 = vadd.f32 %v769_v3, %v675_v57  ;;  %v852_v6 = vadd.f32 %v795_v4, %v691_v58  ;;  %v1489_v57 = vld [vmem:[%s2166_s18 + $0x8] sm:$0x3]  ;;  %v1524_v3 = vrot.slane %v1516_v56, 1  ;;  %v1536_v4 = vld [vmem:[%s2188_s25 + $0x4] sm:$0x3] }
  0xb5   : > { %v1501_v58 = vld [vmem:[%s2172_s23 + $0x8] sm:$0x3] }
  0xb6   : > { %v1561_v56 = vld [vmem:[%s2188_s25 + $0x8] sm:$0x7] }
  0xba   : > { %v821_v7 = vpop.f32.mrf.mxu2  ;;  %v847_v8 = vpop.f32.mrf.mxu3 }
  0xbb   : > { %v853_v9 = vadd.f32 %v821_v7, %v707_v61  ;;  %v854_v10 = vadd.f32 %v847_v8, %v723_v62  ;;  %v771_v11 = vpop.f32.mrf.mxu0  ;;  %v797_v12 = vpop.f32.mrf.mxu1  ;;  %v1523_v61 = vrot.slane %v1515_v53, 1  ;;  %v1490_v62 = vld [vmem:[%s2166_s18 + $0xc] sm:$0x3]  ;;  %v1493_v7 = vunpack.c.l.bf16 %v1489_v57 }
  0xbc   : > { %v1505_v8 = vunpack.c.l.bf16 %v1501_v58  ;;  %v1542_v58 = vunpack.c.l.bf16 %v1538_v43 }
  0xc2   : > { %v823_v13 = vpop.f32.mrf.mxu2  ;;  %v849_v14 = vpop.f32.mrf.mxu3 }
  0xc3   : > { %v888_v15 = vpop.f32.mrf.mxu0  ;;  %v904_v16 = vpop.f32.mrf.mxu1  ;;  %v1531_v13 = vadd.f32 %v1523_v61, %v1507_v60  ;;  %v1539_v14 = vunpack.c.l.bf16 %v1535_v0  ;;  %v1550_v61 = vld [vmem:[%s2201_s30 + $0xc] sm:$0x3] }
  0xc4   : > { %v2138_v17 = vadd.f32 %v888_v15, %v851_v5  ;;  %v2140_v18 = vadd.f32 %v904_v16, %v852_v6  ;;  %v1506_v15 = vunpack.c.l.bf16 %v1502_v63  ;;  %v1518_v16 = vunpack.c.l.bf16 %v1514_v1  ;;  %v1884_v1 = vld [vmem:[%s2166_s18 + $0x4] sm:$0x3] }
  0xc6   : > { %v1526_v41 = vrot.slane %v1518_v16, 1 }
  0xca   : > { %v920_v19 = vpop.f32.mrf.mxu2  ;;  %v936_v20 = vpop.f32.mrf.mxu3 }
  0xcb   : > { %v2142_v21 = vadd.f32 %v920_v19, %v853_v9  ;;  %v2144_v22 = vadd.f32 %v936_v20, %v854_v10  ;;  %v890_v23 = vpop.f32.mrf.mxu0  ;;  %v906_v24 = vpop.f32.mrf.mxu1  ;;  %v1517_v9 = vunpack.c.l.bf16 %v1513_v59  ;;  %v1494_v10 = vunpack.c.l.bf16 %v1490_v62  ;;  %v1547_v19 = vld [vmem:[%s2201_s30] sm:$0x3]  ;;  %v1562_v62 = vld [vmem:[%s2188_s25 + $0xc] sm:$0x7] }
  0xcc   : > { %v1532_v20 = vadd.f32 %v1524_v3, %v1508_v2  ;;  %v1540_v23 = vunpack.c.l.bf16 %v1536_v4  ;;  %v1559_v24 = vld [vmem:[%s2188_s25] sm:$0x7]  ;;  %v1885_v2 = vld [vmem:[%s2166_s18 + $0x8] sm:$0x3]  ;;  %v1553_v4 = vunpack.c.l.bf16 %v1549_v55 }
  0xcd   : > { %v1563_v42 = vunpack.c.l.bf16 %v1559_v24  ;;  %v1589_v16 = vunpack.c.l.bf16 %v1885_v2 }
  0xce   : > { %v1544_v44 = vadd.f32 %v1540_v23, %v1532_v20  ;;  %v1889_v20 = vld [vmem:[%s2172_s23 + $0x8] sm:$0x3] }
  0xcf   : > { %v1571_v60 = vrot.slane %v1563_v42, 1  ;;  %v1893_v23 = vld [vmem:[%s2166_s18 + $0x8] sm:$0x7] }
  0xd2   : > { %v922_v25 = vpop.f32.mrf.mxu2  ;;  %v938_v26 = vpop.f32.mrf.mxu3 }
  0xd3   : > { %v2146_v27 = vpop.f32.mrf.mxu0  ;;  %v2148_v28 = vpop.f32.mrf.mxu1  ;;  %v1548_v25 = vld [vmem:[%s2201_s30 + $0x4] sm:$0x3] }
  0xd4   : > { %v1560_v26 = vld [vmem:[%s2188_s25 + $0x4] sm:$0x7]  ;;  %v1552_v45 = vunpack.c.l.bf16 %v1548_v25  ;;  %v1029_v24 = vadd.f32 %v2146_v27, %v2138_v17  ;;  %v1030_v25 = vadd.f32 %v2148_v28, %v2140_v18  ;;  %v1887_v17 = vld [vmem:[%s2166_s18 + $0x10] sm:$0x3]  ;;  %v1602_v18 = vunpack.c.l.bf16 %v1889_v20 }
  0xd5   : > { %v1564_v46 = vunpack.c.l.bf16 %v1560_v26  ;;  %v1614_v28 = vunpack.c.l.bf16 %v1893_v23 }
  0xd6   : > { %v1556_v63 = vadd.f32 %v1552_v45, %v1544_v44 }
  0xd7   : > { %v1572_v0 = vrot.slane %v1564_v46, 1 }
  0xda   : > { %v2150_v29 = vpop.f32.mrf.mxu2  ;;  %v2152_v30 = vpop.f32.mrf.mxu3 }
  0xdb   : > { %v979_v31 = vpop.f32.mrf.mxu0  ;;  %v995_v32 = vpop.f32.mrf.mxu1 }
  0xdc   : > { %v1509_v31 = vadd.f32 %v1505_v8, %v1493_v7  ;;  %v1525_v32 = vrot.slane %v1517_v9, 1  ;;  %v1565_v7 = vunpack.c.l.bf16 %v1561_v56  ;;  %v1554_v9 = vunpack.c.l.bf16 %v1550_v61  ;;  %v1894_v56 = vld [vmem:[%s2166_s18 + $0xc] sm:$0x7] }
  0xde   : > { %v1533_v51 = vadd.f32 %v1525_v32, %v1509_v31 }
  0xe2   : > { %v1011_v33 = vpop.f32.mrf.mxu2  ;;  %v1027_v34 = vpop.f32.mrf.mxu3 }
  0xe3   : > { %v2154_v35 = vpop.f32.mrf.mxu0  ;;  %v2156_v36 = vpop.f32.mrf.mxu1  ;;  %v1537_v33 = vld [vmem:[%s2188_s25 + $0x8] sm:$0x3]  ;;  %v1543_v34 = vadd.f32 %v1539_v14, %v1531_v13  ;;  %v1888_v13 = vld [vmem:[%s2172_s23 + $0x4] sm:$0x3] }
  0xe4   : > { %v1541_v52 = vunpack.c.l.bf16 %v1537_v33  ;;  %v1892_v14 = vld [vmem:[%s2166_s18 + $0x4] sm:$0x7]  ;;  %v1573_v33 = vrot.slane %v1565_v7, 1  ;;  %v1158_v46 = vadd.f32 %v2154_v35, %v1029_v24  ;;  %v1031_v35 = vadd.f32 %v2150_v29, %v2142_v21 }
  0xe5   : > { %v1613_v42 = vunpack.c.l.bf16 %v1892_v14  ;;  %v1615_v7 = vunpack.c.l.bf16 %v1894_v56 }
  0xe6   : > { %v1545_v3 = vadd.f32 %v1541_v52, %v1533_v51  ;;  %v1890_v52 = vld [vmem:[%s2172_s23 + $0xc] sm:$0x3] }
  0xe7   : > { %v1603_v2 = vunpack.c.l.bf16 %v1890_v52 }
  0xe8   : > { %v1557_v32 = vadd.f32 %v1553_v4, %v1545_v3 }
  0xea   : > { %v2158_v37 = vpop.f32.mrf.mxu2  ;;  %v2160_v38 = vpop.f32.mrf.mxu3 }
  0xeb   : > { %v1078_v39 = vpop.f32.mrf.mxu0  ;;  %v1104_v40 = vpop.f32.mrf.mxu1  ;;  %v1160_v20 = vadd.f32 %v2158_v37, %v1031_v35 }
  0xec   : > { %v1551_v39 = vunpack.c.l.bf16 %v1547_v19  ;;  %v1510_v40 = vadd.f32 %v1506_v15, %v1494_v10  ;;  %v1566_v10 = vunpack.c.l.bf16 %v1562_v62  ;;  %v1580_v15 = vadd.f32 %v1572_v0, %v1556_v63  ;;  %v2226_v19 = vpop.permute.xlu0 %1639  ;;  %v1891_v62 = vld [vmem:[%s2172_s23 + $0x10] sm:$0x3] }
  0xed   : > { %v1895_v63 = vld [vmem:[%s2166_s18 + $0x10] sm:$0x7]  ;;  %v1604_v29 = vunpack.c.l.bf16 %v1891_v62 }
  0xee   : > { %v1534_v57 = vadd.f32 %v1526_v41, %v1510_v40  ;;  %v1555_v59 = vadd.f32 %v1551_v39, %v1543_v34  ;;  %v1886_v40 = vld [vmem:[%s2166_s18 + $0xc] sm:$0x3]  ;;  %v1601_v41 = vunpack.c.l.bf16 %v1888_v13  ;;  %v1574_v44 = vrot.slane %v1566_v10, 1 }
  0xef   : > { %v1593_v27 = vadd.f32 %v1589_v16, %v1580_v15  ;;  %v1590_v51 = vunpack.c.l.bf16 %v1886_v40  ;;  %v1032_v10 = vadd.f32 %v2152_v30, %v2144_v22  ;;  %v1616_v13 = vunpack.c.l.bf16 %v1895_v63 }
  0xf0   : > { %v1546_v8 = vadd.f32 %v1542_v58, %v1534_v57  ;;  %v1621_v57 = vrot.slane %v1613_v42, 1  ;;  %v1623_v30 = vrot.slane %v1615_v7, 1 }
  0xf1   : > { %v1606_v0 = vadd.f32 %v1602_v18, %v1593_v27  ;;  %v1161_v23 = vadd.f32 %v2160_v38, %v1032_v10  ;;  %v1624_v40 = vrot.slane %v1616_v13, 1 }
  0xf2   : > { %v1130_v47 = vpop.f32.mrf.mxu2  ;;  %v1156_v48 = vpop.f32.mrf.mxu3  ;;  %v1558_v43 = vadd.f32 %v1554_v9, %v1546_v8 }
  0xf3   : > { %v2180_v49 = vpop.f32.mrf.mxu0  ;;  %v2182_v50 = vpop.f32.mrf.mxu1 }
  0xf4   : > { %v1248_v55 = vadd.f32 %v2180_v49, %v1158_v46  ;;  %v1582_v58 = vadd.f32 %v1574_v44, %v1558_v43  ;;  %v1645_v24 = vpop.permute.xlu0 %1644 }
  0xfa   : > { %v2204_v5 = vpop.f32.mrf.mxu2  ;;  %v2206_v6 = vpop.f32.mrf.mxu3 }
  0xfb   : > { %v1198_v11 = vpop.f32.mrf.mxu0  ;;  %v1214_v12 = vpop.f32.mrf.mxu1 }
  0xfc   : > { %v1579_v11 = vadd.f32 %v1571_v60, %v1555_v59  ;;  %v1588_v12 = vunpack.c.l.bf16 %v1884_v1  ;;  %v1591_v59 = vunpack.c.l.bf16 %v1887_v17  ;;  %v1622_v1 = vrot.slane %v1614_v28, 1 }
  0xfe   : > { %v1592_v45 = vadd.f32 %v1588_v12, %v1579_v11  ;;  %v1595_v21 = vadd.f32 %v1591_v59, %v1582_v58  ;;  %v1630_v16 = vadd.f32 %v1622_v1, %v1606_v0 }
 0x100   : > { %v1605_v61 = vadd.f32 %v1601_v41, %v1592_v45  ;;  %v1658_v44 = vmul.f32 %v1645_v24, %v1630_v16 }
 0x102   : > { %v1230_v47 = vpop.f32.mrf.mxu2  ;;  %v1246_v48 = vpop.f32.mrf.mxu3  ;;  %v1629_v14 = vadd.f32 %v1621_v57, %v1605_v61 }
 0x103   : > { %v2214_v53 = vpop.f32.mrf.mxu0  ;;  %v2216_v54 = vpop.f32.mrf.mxu1  ;;  %v1159_v47 = vadd.f32 %v2156_v36, %v1030_v25  ;;  %v1581_v48 = vadd.f32 %v1573_v33, %v1557_v32  ;;  %v1250_v33 = vadd.f32 %v2204_v5, %v1160_v20 }
 0x104   : > { %v1650_v36 = vpop.permute.xlu1 %1649  ;;  %v1338_v3 = vadd.f32 %v2214_v53, %v1248_v55  ;;  %v1657_v41 = vmul.f32 %v2226_v19, %v1629_v14 }
 0x105   : > { %v1249_v60 = vadd.f32 %v2182_v50, %v1159_v47  ;;  %v1594_v4 = vadd.f32 %v1590_v51, %v1581_v48  ;;  %v1911_v50 = vld [vmem:[%s2283_s5] ss:$0 sm:$0xff] }
 0x107   : > { %v1339_v49 = vadd.f32 %v2216_v54, %v1249_v60  ;;  %v1912_v54 = vld [vmem:[%s2284_s6] ss:$0 sm:$0xff]  ;;  %v1607_v22 = vadd.f32 %v1603_v2, %v1594_v4 }
 0x109   : > { %v1631_v45 = vadd.f32 %v1623_v30, %v1607_v22 }
 0x10a   : > { %v2234_v26 = vpop.f32.mrf.mxu2  ;;  %v2236_v31 = vpop.f32.mrf.mxu3 }
 0x10b   : > { %v1288_v34 = vpop.f32.mrf.mxu0  ;;  %v1304_v39 = vpop.f32.mrf.mxu1  ;;  %v1340_v37 = vadd.f32 %v2234_v26, %v1250_v33  ;;  %v1659_v55 = vmul.f32 %v1650_v36, %v1631_v45 }
 0x10c   : > { %v1251_v34 = vadd.f32 %v2206_v6, %v1161_v23  ;;  %v1608_v39 = vadd.f32 %v1604_v29, %v1595_v21  ;;  %v1655_v51 = vpop.permute.xlu1 %1654 }
 0x10e   : > { %v1341_v38 = vadd.f32 %v2236_v31, %v1251_v34  ;;  %v1632_v5 = vadd.f32 %v1624_v40, %v1608_v39 }
 0x110   : > { %v1660_v56 = vmul.f32 %v1655_v51, %v1632_v5 }
 0x112   : > { %v1320_v8 = vpop.f32.mrf.mxu2  ;;  %v1336_v9 = vpop.f32.mrf.mxu3 }
 0x113   : > { %v1385_v11 = vpop.f32.mrf.mxu0  ;;  %v1411_v12 = vpop.f32.mrf.mxu1 }
 0x114   : > { %v1467_v53 = vadd.f32 %v1385_v11, %v1338_v3  ;;  %v1468_v15 = vadd.f32 %v1411_v12, %v1339_v49 }
 0x116   : > { %v1475_v25 = vmul.f32 %v1911_v50, %v1467_v53  ;;  %v1476_v32 = vmul.f32 %v1911_v50, %v1468_v15 }
 0x118   : > { %v1483_v42 = vadd.f32 %v1912_v54, %v1475_v25  ;;  %v1484_v43 = vadd.f32 %v1912_v54, %v1476_v32 }
 0x11a   : > { %v1661_v17 = vadd.f32 %v1657_v41, %v1483_v42  ;;  %v1662_v27 = vadd.f32 %v1658_v44, %v1484_v43  ;;  %v1437_v18 = vpop.f32.mrf.mxu2  ;;  %v1463_v28 = vpop.f32.mrf.mxu3 }
 0x11b   : > { %v1469_v6 = vadd.f32 %v1437_v18, %v1340_v37  ;;  %v1470_v19 = vadd.f32 %v1463_v28, %v1341_v38  ;;  %v1387_v46 = vpop.f32.mrf.mxu0  ;;  %v1413_v47 = vpop.f32.mrf.mxu1 }
 0x11c   : > { %v1665_v48 = vpack.c.bf16 %v1661_v17, %v1661_v17  ;;  %v1666_v26 = vpack.c.bf16 %v1662_v27, %v1662_v27 }
 0x11d   : > { %v1477_v52 = vmul.f32 %v1911_v50, %v1469_v6  ;;  %v1478_v31 = vmul.f32 %v1911_v50, %v1470_v19 }
 0x11e   : > { %1670 = vst.msk [vmem:[%s553_s19] sm:$0x3] %vm1669_vm2, %v1665_v48 }
 0x11f   : > { %1671 = vst.msk [vmem:[%s553_s19 + $0x2] sm:$0x3] %vm1669_vm2, %v1666_v26  ;;  %v1485_v57 = vadd.f32 %v1912_v54, %v1477_v52  ;;  %v1486_v58 = vadd.f32 %v1912_v54, %v1478_v31 }
 0x121   : > { %v1663_v59 = vadd.f32 %v1659_v55, %v1485_v57  ;;  %v1664_v60 = vadd.f32 %v1660_v56, %v1486_v58 }
 0x122   : > { %v1439_v61 = vpop.f32.mrf.mxu2  ;;  %v1465_v62 = vpop.f32.mrf.mxu3 }
 0x123   : > { %v1667_v63 = vpack.c.bf16 %v1663_v59, %v1663_v59  ;;  %v1668_v0 = vpack.c.bf16 %v1664_v60, %v1664_v60 }
 0x125   : > { %1672 = vst.msk [vmem:[%s553_s19 + $0x4] sm:$0x3] %vm1669_vm2, %v1667_v63 }
 0x126   : > { %1673 = vst.msk [vmem:[%s553_s19 + $0x6] sm:$0x3] %vm1669_vm2, %v1668_v0 }
 0x127 PF: > { %s22_s21 = sadd.s32 1, %s1919_s21  }
 0x128   : > { %p19_p4 = scmp.ge.s32.totalorder %s22_s21, 4  }
 0x12a   :  { %21 = sbr.rel (!%p19_p4) target bundleno = 1 (0x1), region = 131 }

// kernel: cell_down_forward.7
= control target key start
LH: loop header
LB: loop body
LE: loop exit
PB: predicated region body
PF: predicated region fallthrough
CT: control target
= control target key end

     0   :  { %s2715_s17 = smov 0   ;;  %s3003_s0 = inlined_call_operand.vmem [shape: bf16[2,6,6,8], index: 0, kind: input, shape index: {}]   ;;  %s3004_s1 = inlined_call_operand.vmem [shape: bf16[9,8,8], index: 1, kind: input, shape index: {}]   ;;  %s3005_s2 = inlined_call_operand.vmem [shape: f32[1,1,8], index: 2, kind: input, shape index: {}]   ;;  %s3006_s3 = inlined_call_operand.vmem [shape: f32[1,1,8], index: 3, kind: input, shape index: {}]   ;;  %s3007_s4 = inlined_call_operand.vmem [shape: bf16[2,5,5,8], index: 4, kind: input, shape index: {}]   ;;  %s3008_s5 = inlined_call_operand.vmem [shape: bf16[2,5,5,8], index: 5, kind: input, shape index: {}]   ;;  %s3009_s6 = inlined_call_operand.vmem [shape: bf16[2,5,5,8], index: 6, kind: input, shape index: {}]   ;;  %s3010_s7 = inlined_call_operand.vmem [shape: bf16[2,5,5,8], index: 7, kind: input, shape index: {}]   ;;  %s3011_s8 = inlined_call_operand.vmem [shape: bf16[9,8,8], index: 8, kind: input, shape index: {}]   ;;  %s3012_s9 = inlined_call_operand.vmem [shape: f32[1,1,8], index: 9, kind: input, shape index: {}]   ;;  %s3013_s10 = inlined_call_operand.vmem [shape: f32[1,1,8], index: 10, kind: input, shape index: {}]   ;;  %s3014_s11 = inlined_call_operand.vmem [shape: bf16[2,4,4,8], index: 11, kind: output, shape index: {}]  }
   0x1 LB: > { %s2494_s18 = sadd.s32 4294967295, %s2653_s17   ;;  %p2498_p0 = scmp.ge.s32.totalorder %s2653_s17, 1  ;;  %s2653_s17 = sphi %s2715_s17, %s21_s17  }
   0x2   : > { %p377_p1 = scmp.lt.s32.totalorder %s2653_s17, 3 }
   0x4   : > { %p378_p2 = pnand %p2498_p0, %p377_p1 }
   0x5   : > { %p437_p3 = scmp.lt.s32.totalorder (!%p378_p2), %s2494_s18, 1 }
   0x6   : > { %381 = sbr.rel (%p378_p2) target bundleno = 449 (0x1c1), region = 64 }
   0xb   : > { %v2506_v0 = vld [vmem:[%s3004_s1 + $0x4] sm:$0xf]  ;;  %vm517_vm0 = vcmask 1043456   ;;  %v484_v2 = vld [vmem:[%s3004_s1] sm:$0xf]  ;;  %s3016_s18 = smov (!%p437_p3, %s2494_s18), 1 }
   0xc   : > { %v519_v1 = vsel %vm517_vm0, %v2506_v0, 0  ;;  %v616_v3 = vsel %vm517_vm0, %v484_v2, 0  ;;  %s2633_s23 = smul.u32 24, %s3016_s18  ;;  %v2515_v38 = vld [vmem:[%s3004_s1 + $0x8] sm:$0xf]  ;;  %vm513_vm1 = vcmask 64512  }
   0xd   : > { %528 = vmatpush.bf16.msra.mxu0 %v519_v1  ;;  %554 = vmatpush.bf16.msra.mxu1 %v519_v1  ;;  %v705_v45 = vsel %vm517_vm0, %v2515_v38, 0  ;;  %s2632_s30 = sshll.u32 %s3016_s18, 3  ;;  %vm2386_vm2 = vcmask 58368  }
   0xe   : > { %580 = vmatpush.bf16.msra.mxu2 %v519_v1  ;;  %606 = vmatpush.bf16.msra.mxu3 %v519_v1  ;;  %s2737_s26 = scalar_lea.vmem %s3003_s0, %s2633_s23 }
   0xf   : > { %v485_v4 = vld [vmem:[%s2737_s26] sm:$0x7]  ;;  %v486_v5 = vld [vmem:[%s2737_s26 + $0x4] sm:$0x7]  ;;  %v487_v6 = vld [vmem:[%s2737_s26 + $0x8] sm:$0x7] }
  0x10   : > { %v489_v7 = vunpack.c.l.bf16 %v485_v4  ;;  %v490_v8 = vunpack.c.l.bf16 %v486_v5  ;;  %v491_v9 = vunpack.c.l.bf16 %v487_v6  ;;  %v488_v10 = vld [vmem:[%s2737_s26 + $0xc] sm:$0x7]  ;;  %v468_v46 = vld [vmem:[%s2737_s26] sm:$0x3]  ;;  %v469_v47 = vld [vmem:[%s2737_s26 + $0x4] sm:$0x3] }
  0x11   : > { %625 = vmatpush.bf16.msrb.mxu0 %v616_v3  ;;  %641 = vmatpush.bf16.msrb.mxu1 %v616_v3  ;;  %v492_v11 = vunpack.c.l.bf16 %v488_v10  ;;  %v470_v48 = vld [vmem:[%s2737_s26 + $0x8] sm:$0x3]  ;;  %v471_v49 = vld [vmem:[%s2737_s26 + $0xc] sm:$0x3]  ;;  %v472_v50 = vunpack.c.l.bf16 %v468_v46  ;;  %v473_v51 = vunpack.c.l.bf16 %v469_v47  ;;  %v679_v54 = vld [vmem:[%s2737_s26] sm:$0x6] }
  0x12   : > { %657 = vmatpush.bf16.msrb.mxu2 %v616_v3  ;;  %673 = vmatpush.bf16.msrb.mxu3 %v616_v3  ;;  %v493_v12 = vmax.f32 %v489_v7, 0.0  ;;  %v494_v13 = vmax.f32 %v490_v8, 0.0  ;;  %v495_v14 = vmax.f32 %v491_v9, 0.0  ;;  %v474_v52 = vunpack.c.l.bf16 %v470_v48  ;;  %v680_v55 = vld [vmem:[%s2737_s26 + $0x4] sm:$0x6] }
  0x13   : > { %v496_v15 = vmax.f32 %v492_v11, 0.0  ;;  %v475_v53 = vunpack.c.l.bf16 %v471_v49  ;;  %v681_v56 = vld [vmem:[%s2737_s26 + $0x8] sm:$0x6]  ;;  %v682_v57 = vld [vmem:[%s2737_s26 + $0xc] sm:$0x6]  ;;  %v476_v58 = vmax.f32 %v472_v50, 0.0  ;;  %v683_v60 = vunpack.c.l.bf16 %v679_v54 }
  0x14   : > { %v497_v16 = vpack.c.bf16 %v493_v12, %v493_v12  ;;  %v498_v17 = vpack.c.bf16 %v494_v13, %v494_v13  ;;  %v499_v18 = vpack.c.bf16 %v495_v14, %v495_v14  ;;  %v477_v59 = vmax.f32 %v473_v51, 0.0  ;;  %v2524_v6 = vld [vmem:[%s3004_s1 + $0xc] sm:$0xf]  ;;  %v2521_v38 = vld [vmem:[%s2737_s26 + $0x8] sm:$0x3] }
  0x15   : > { %v500_v19 = vpack.c.bf16 %v496_v15, %v496_v15  ;;  %v684_v61 = vunpack.c.l.bf16 %v680_v55  ;;  %v478_v62 = vmax.f32 %v474_v52, 0.0  ;;  %v479_v63 = vmax.f32 %v475_v53, 0.0 }
  0x16   : > { %v504_v20 = vunpack.c.l.b16 %v497_v16  ;;  %v535_v21 = vunpack.c.l.b16 %v498_v17  ;;  %v561_v22 = vunpack.c.l.b16 %v499_v18  ;;  %v685_v0 = vunpack.c.l.bf16 %v681_v56 }
  0x17   : > { %v587_v23 = vunpack.c.l.b16 %v500_v19  ;;  %v686_v1 = vunpack.c.l.bf16 %v682_v57  ;;  %v480_v2 = vpack.c.bf16 %v476_v58, %v476_v58  ;;  %v481_v3 = vpack.c.bf16 %v477_v59, %v477_v59 }
  0x18   : > { %v505_v24 = vpack.c.b16 %v504_v20, %v504_v20  ;;  %v536_v25 = vpack.c.b16 %v535_v21, %v535_v21  ;;  %v562_v26 = vpack.c.b16 %v561_v22, %v561_v22  ;;  %v687_v4 = vmax.f32 %v683_v60, 0.0 }
  0x19   : > { %v588_v27 = vpack.c.b16 %v587_v23, %v587_v23  ;;  %v688_v5 = vmax.f32 %v684_v61, 0.0  ;;  %v482_v7 = vpack.c.bf16 %v478_v62, %v478_v62  ;;  %v483_v8 = vpack.c.bf16 %v479_v63, %v479_v63  ;;  %v2542_v63 = vld [vmem:[%s3004_s1 + $0x14] sm:$0xf] }
  0x1a   : > { %v507_v28 = vshrl.u32 %v505_v24, 16  ;;  %v509_v29 = vshll.u32 %v505_v24, 16  ;;  %v538_v30 = vshrl.u32 %v536_v25, 16  ;;  %v540_v31 = vshll.u32 %v536_v25, 16 }
  0x1b   : > { %v564_v32 = vshrl.u32 %v562_v26, 16  ;;  %v566_v33 = vshll.u32 %v562_v26, 16  ;;  %v590_v34 = vshrl.u32 %v588_v27, 16  ;;  %v592_v35 = vshll.u32 %v588_v27, 16  ;;  %v2533_v26 = vld [vmem:[%s3004_s1 + $0x10] sm:$0xf] }
  0x1c   : > { %v511_v36 = vrot.slane %v509_v29, 1  ;;  %v542_v37 = vrot.slane %v540_v31, 1  ;;  %v689_v9 = vmax.f32 %v685_v0, 0.0  ;;  %v690_v10 = vmax.f32 %v686_v1, 0.0  ;;  %v2529_v27 = vld [vmem:[%s2737_s26 + $0x4] sm:$0x7] }
  0x1d   : > { %v568_v39 = vrot.slane %v566_v33, 1  ;;  %v594_v40 = vrot.slane %v592_v35, 1  ;;  %v807_v11 = vsel %vm517_vm0, %v2524_v6, 0  ;;  %v691_v12 = vpack.c.bf16 %v687_v4, %v687_v4  ;;  %v2531_v31 = vld [vmem:[%s2737_s26 + $0xc] sm:$0x7] }
  0x1e   : > { %v512_v41 = vor.u32 %v511_v36, %v507_v28  ;;  %v543_v42 = vor.u32 %v542_v37, %v538_v30  ;;  %v692_v13 = vpack.c.bf16 %v688_v5, %v688_v5  ;;  %v693_v14 = vpack.c.bf16 %v689_v9, %v689_v9  ;;  %v2530_v30 = vld [vmem:[%s2737_s26 + $0x8] sm:$0x7]  ;;  %v2520_v37 = vld [vmem:[%s2737_s26 + $0x4] sm:$0x3] }
  0x1f   : > { %v569_v43 = vor.u32 %v568_v39, %v564_v32  ;;  %v595_v44 = vor.u32 %v594_v40, %v590_v34  ;;  %v694_v15 = vpack.c.bf16 %v690_v10, %v690_v10  ;;  %v698_v16 = vunpack.c.l.b16 %v691_v12  ;;  %v2532_v32 = vld [vmem:[%s2737_s26 + $0x10] sm:$0x7]  ;;  %v2522_v40 = vld [vmem:[%s2737_s26 + $0xc] sm:$0x3]  ;;  %v2539_v12 = vld [vmem:[%s2737_s26 + $0x8] sm:$0x6] }
  0x20   : > { %2507 = vmatmul.msk.bf16.vlgmr.msra.gmra.mxu0 %vm513_vm1, %v512_v41  ;;  %2508 = vmatmul.msk.bf16.vlgmr.msra.gmra.mxu1 %vm513_vm1, %v543_v42  ;;  %v721_v17 = vunpack.c.l.b16 %v692_v13  ;;  %v741_v18 = vunpack.c.l.b16 %v693_v14  ;;  %v906_v33 = vsel %vm517_vm0, %v2533_v26, 0  ;;  %v878_v34 = vunpack.c.l.bf16 %v2529_v27  ;;  %v2523_v41 = vld [vmem:[%s2737_s26 + $0x10] sm:$0x3]  ;;  %v2540_v14 = vld [vmem:[%s2737_s26 + $0xc] sm:$0x6] }
  0x21   : > { %2509 = vmatmul.msk.bf16.vlgmr.msra.gmra.mxu2 %vm513_vm1, %v569_v43  ;;  %2510 = vmatmul.msk.bf16.vlgmr.msra.gmra.mxu3 %vm513_vm1, %v595_v44  ;;  %v761_v19 = vunpack.c.l.b16 %v694_v15  ;;  %v699_v20 = vpack.c.b16 %v698_v16, %v698_v16  ;;  %v879_v35 = vunpack.c.l.bf16 %v2530_v30  ;;  %v880_v36 = vunpack.c.l.bf16 %v2531_v31  ;;  %v2541_v15 = vld [vmem:[%s2737_s26 + $0x10] sm:$0x6] }
  0x22   : > { %754 = vmatpush.bf16.msra.mxu2 %v705_v45  ;;  %774 = vmatpush.bf16.msra.mxu3 %v705_v45  ;;  %v722_v21 = vpack.c.b16 %v721_v17, %v721_v17  ;;  %v742_v22 = vpack.c.b16 %v741_v18, %v741_v18  ;;  %v881_v39 = vunpack.c.l.bf16 %v2532_v32  ;;  %v882_v42 = vmax.f32 %v878_v34, 0.0  ;;  %v2551_v32 = vld [vmem:[%s3004_s1 + $0x18] sm:$0xf] }
  0x23   : > { %714 = vmatpush.bf16.msra.mxu0 %v705_v45  ;;  %734 = vmatpush.bf16.msra.mxu1 %v705_v45  ;;  %v762_v23 = vpack.c.b16 %v761_v19, %v761_v19  ;;  %v700_v24 = vrot.slane %v699_v20, 1  ;;  %v789_v43 = vunpack.c.l.bf16 %v2520_v37  ;;  %v790_v44 = vunpack.c.l.bf16 %v2521_v38 }
  0x24   : > { %v723_v25 = vrot.slane %v722_v21, 1  ;;  %v743_v28 = vrot.slane %v742_v22, 1  ;;  %v883_v45 = vmax.f32 %v879_v35, 0.0  ;;  %v884_v46 = vmax.f32 %v880_v36, 0.0 }
  0x25   : > { %v763_v29 = vrot.slane %v762_v23, 1  ;;  %v791_v47 = vunpack.c.l.bf16 %v2522_v40  ;;  %v792_v48 = vunpack.c.l.bf16 %v2523_v41  ;;  %v885_v49 = vmax.f32 %v881_v39, 0.0 }
  0x26   : > { %v886_v50 = vpack.c.bf16 %v882_v42, %v882_v42  ;;  %v793_v51 = vmax.f32 %v789_v43, 0.0  ;;  %v794_v52 = vmax.f32 %v790_v44, 0.0  ;;  %v887_v53 = vpack.c.bf16 %v883_v45, %v883_v45 }
  0x27   : > { %v888_v54 = vpack.c.bf16 %v884_v46, %v884_v46  ;;  %v795_v55 = vmax.f32 %v791_v47, 0.0  ;;  %v796_v56 = vmax.f32 %v792_v48, 0.0  ;;  %v889_v57 = vpack.c.bf16 %v885_v49, %v885_v49 }
  0x28   : > { %v893_v58 = vunpack.c.l.b16 %v886_v50  ;;  %v797_v59 = vpack.c.bf16 %v793_v51, %v793_v51  ;;  %v798_v60 = vpack.c.bf16 %v794_v52, %v794_v52  ;;  %v922_v61 = vunpack.c.l.b16 %v887_v53  ;;  %v2560_v52 = vld [vmem:[%s3004_s1 + $0x1c] sm:$0xf]  ;;  %v2556_v53 = vld [vmem:[%s2737_s26 + $0x8] sm:$0x7] }
  0x29   : > { %v948_v62 = vunpack.c.l.b16 %v888_v54  ;;  %v799_v0 = vpack.c.bf16 %v795_v55, %v795_v55  ;;  %v800_v1 = vpack.c.bf16 %v796_v56, %v796_v56  ;;  %v1029_v4 = vsel %vm517_vm0, %v2542_v63, 0  ;;  %v2557_v54 = vld [vmem:[%s2737_s26 + $0xc] sm:$0x7]  ;;  %v2547_v63 = vld [vmem:[%s2737_s26 + $0x8] sm:$0x3] }
  0x2a   : > { %v923_v5 = vpack.c.b16 %v922_v61, %v922_v61  ;;  %v1008_v19 = vunpack.c.l.bf16 %v2539_v12  ;;  %v1009_v26 = vunpack.c.l.bf16 %v2540_v14  ;;  %v1010_v27 = vunpack.c.l.bf16 %v2541_v15 }
  0x2b   : > { %v949_v6 = vpack.c.b16 %v948_v62, %v948_v62  ;;  %v1131_v39 = vsel %vm517_vm0, %v2551_v32, 0  ;;  %v1203_v61 = vunpack.c.l.bf16 %v2557_v54 }
  0x2c   : > { %v927_v9 = vshll.u32 %v923_v5, 16  ;;  %v925_v20 = vshrl.u32 %v923_v5, 16  ;;  %v1013_v35 = vmax.f32 %v1009_v26, 0.0  ;;  %v1014_v36 = vmax.f32 %v1010_v27, 0.0 }
  0x2d   : > { %v953_v10 = vshll.u32 %v949_v6, 16  ;;  %v951_v22 = vshrl.u32 %v949_v6, 16  ;;  %v1207_v5 = vmax.f32 %v1203_v61, 0.0  ;;  %v1113_v6 = vunpack.c.l.bf16 %v2547_v63 }
  0x2e   : > { %v929_v21 = vrot.slane %v927_v9, 1  ;;  %v1017_v40 = vpack.c.bf16 %v1013_v35, %v1013_v35  ;;  %v1018_v41 = vpack.c.bf16 %v1014_v36, %v1014_v36 }
  0x2f   : > { %v955_v23 = vrot.slane %v953_v10, 1  ;;  %v1117_v14 = vmax.f32 %v1113_v6, 0.0 }
  0x30   : > { %2511 = vmatmul.msk.bf16.vlgmr.msrb.gmra.mxu0 %vm513_vm1, %v480_v2  ;;  %2512 = vmatmul.msk.bf16.vlgmr.msrb.gmra.mxu1 %vm513_vm1, %v481_v3  ;;  %v974_v2 = vunpack.c.l.b16 %v889_v57  ;;  %v894_v3 = vpack.c.b16 %v893_v58, %v893_v58  ;;  %v930_v31 = vor.u32 %v929_v21, %v925_v20  ;;  %v1065_v44 = vunpack.c.l.b16 %v1017_v40  ;;  %v2558_v57 = vld [vmem:[%s2737_s26 + $0x10] sm:$0x7]  ;;  %v2559_v58 = vld [vmem:[%s2737_s26 + $0x14] sm:$0x7] }
  0x31   : > { %2513 = vmatmul.msk.bf16.vlgmr.msrb.gmra.mxu2 %vm513_vm1, %v482_v7  ;;  %2514 = vmatmul.msk.bf16.vlgmr.msrb.gmra.mxu3 %vm513_vm1, %v483_v8  ;;  %v1085_v45 = vunpack.c.l.b16 %v1018_v41  ;;  %v1204_v62 = vunpack.c.l.bf16 %v2558_v57  ;;  %v2567_v40 = vld [vmem:[%s2737_s26 + $0x10] sm:$0x6]  ;;  %v2568_v41 = vld [vmem:[%s2737_s26 + $0x14] sm:$0x6] }
  0x32   : > { %848 = vmatpush.bf16.msrb.mxu2 %v807_v11  ;;  %864 = vmatpush.bf16.msrb.mxu3 %v807_v11  ;;  %v975_v7 = vpack.c.b16 %v974_v2, %v974_v2  ;;  %v898_v8 = vshll.u32 %v894_v3, 16  ;;  %v896_v16 = vshrl.u32 %v894_v3, 16  ;;  %v1066_v48 = vpack.c.b16 %v1065_v44, %v1065_v44  ;;  %v2549_v2 = vld [vmem:[%s2737_s26 + $0x10] sm:$0x3]  ;;  %v2550_v3 = vld [vmem:[%s2737_s26 + $0x14] sm:$0x3] }
  0x33   : > { %816 = vmatpush.bf16.msrb.mxu0 %v807_v11  ;;  %832 = vmatpush.bf16.msrb.mxu1 %v807_v11  ;;  %v2538_v11 = vld [vmem:[%s2737_s26 + $0x4] sm:$0x6]  ;;  %v1086_v49 = vpack.c.b16 %v1085_v45, %v1085_v45  ;;  %v1115_v9 = vunpack.c.l.bf16 %v2549_v2  ;;  %v1116_v10 = vunpack.c.l.bf16 %v2550_v3 }
  0x34   : > { %v979_v13 = vshll.u32 %v975_v7, 16  ;;  %v900_v17 = vrot.slane %v898_v8, 1  ;;  %v1007_v18 = vunpack.c.l.bf16 %v2538_v11  ;;  %v1067_v55 = vrot.slane %v1066_v48, 1 }
  0x35   : > { %v1087_v56 = vrot.slane %v1086_v49, 1  ;;  %v1208_v8 = vmax.f32 %v1204_v62, 0.0 }
  0x36   : > { %v901_v30 = vor.u32 %v900_v17, %v896_v16  ;;  %v1119_v17 = vmax.f32 %v1115_v9, 0.0 }
  0x37   : > { %v1212_v16 = vpack.c.bf16 %v1208_v8, %v1208_v8 }
  0x38   : > { %v1123_v26 = vpack.c.bf16 %v1119_v17, %v1119_v17 }
  0x40   : > { %2516 = vmatmul.msk.bf16.vlgmr.msra.gmra.mxu0 %vm513_vm1, %v700_v24  ;;  %2517 = vmatmul.msk.bf16.vlgmr.msra.gmra.mxu1 %vm513_vm1, %v723_v25  ;;  %v977_v24 = vshrl.u32 %v975_v7, 16  ;;  %v981_v25 = vrot.slane %v979_v13, 1  ;;  %v1211_v13 = vpack.c.bf16 %v1207_v5, %v1207_v5 }
  0x41   : > { %2518 = vmatmul.msk.bf16.vlgmr.msra.gmra.mxu2 %vm513_vm1, %v743_v28  ;;  %2519 = vmatmul.msk.bf16.vlgmr.msra.gmra.mxu3 %vm513_vm1, %v763_v29  ;;  %v1011_v28 = vmax.f32 %v1007_v18, 0.0  ;;  %v1012_v29 = vmax.f32 %v1008_v19, 0.0  ;;  %v1120_v18 = vmax.f32 %v1116_v10, 0.0 }
  0x42   : > { %967 = vmatpush.bf16.msra.mxu2 %v906_v33  ;;  %993 = vmatpush.bf16.msra.mxu3 %v906_v33  ;;  %v982_v34 = vor.u32 %v981_v25, %v977_v24  ;;  %v1246_v21 = vunpack.c.l.b16 %v1211_v13  ;;  %v1272_v24 = vunpack.c.l.b16 %v1212_v16  ;;  %v2569_v25 = vld [vmem:[%s3004_s1 + $0x20] sm:$0xf] }
  0x43   : > { %915 = vmatpush.bf16.msra.mxu0 %v906_v33  ;;  %941 = vmatpush.bf16.msra.mxu1 %v906_v33  ;;  %v956_v33 = vor.u32 %v955_v23, %v951_v22  ;;  %v1015_v37 = vpack.c.bf16 %v1011_v28, %v1011_v28  ;;  %v1016_v38 = vpack.c.bf16 %v1012_v29, %v1012_v29 }
  0x44   : > { %v1121_v22 = vpack.c.bf16 %v1117_v14, %v1117_v14  ;;  %v1124_v27 = vpack.c.bf16 %v1120_v18, %v1120_v18  ;;  %v1273_v32 = vpack.c.b16 %v1272_v24, %v1272_v24  ;;  %v1464_v14 = vld [vmem:[%s3011_s8] sm:$0xf] }
  0x45   : > { %v1022_v42 = vunpack.c.l.b16 %v1015_v37  ;;  %v1045_v43 = vunpack.c.l.b16 %v1016_v38  ;;  %v2565_v38 = vld [vmem:[%s2737_s26 + $0x8] sm:$0x6] }
  0x46   : > { %v1277_v36 = vshll.u32 %v1273_v32, 16  ;;  %v1331_v48 = vunpack.c.l.bf16 %v2565_v38 }
  0x47   : > { %v1023_v46 = vpack.c.b16 %v1022_v42, %v1022_v42  ;;  %v1046_v47 = vpack.c.b16 %v1045_v43, %v1045_v43 }
  0x49   : > { %v1024_v50 = vrot.slane %v1023_v46, 1  ;;  %v1047_v51 = vrot.slane %v1046_v47, 1  ;;  %v1275_v46 = vshrl.u32 %v1273_v32, 16  ;;  %v1279_v47 = vrot.slane %v1277_v36, 1 }
  0x50   : > { %2525 = vmatmul.msk.bf16.vlgmr.msrb.gmra.mxu0 %vm513_vm1, %v797_v59  ;;  %2526 = vmatmul.msk.bf16.vlgmr.msrb.gmra.mxu1 %vm513_vm1, %v798_v60  ;;  %v1230_v59 = vsel %vm517_vm0, %v2560_v52, 0  ;;  %v1202_v60 = vunpack.c.l.bf16 %v2556_v53  ;;  %v1333_v52 = vunpack.c.l.bf16 %v2567_v40  ;;  %v1334_v53 = vunpack.c.l.bf16 %v2568_v41  ;;  %v2583_v40 = vld [vmem:[%s3011_s8 + $0x8] sm:$0xf] }
  0x51   : > { %2527 = vmatmul.msk.bf16.vlgmr.msrb.gmra.mxu2 %vm513_vm1, %v799_v0  ;;  %2528 = vmatmul.msk.bf16.vlgmr.msrb.gmra.mxu3 %vm513_vm1, %v800_v1  ;;  %v2548_v0 = vld [vmem:[%s2737_s26 + $0xc] sm:$0x3]  ;;  %v1205_v1 = vunpack.c.l.bf16 %v2559_v58  ;;  %v2574_v58 = vld [vmem:[%s3011_s8 + $0x4] sm:$0xf] }
  0x52   : > { %1078 = vmatpush.bf16.msrb.mxu2 %v1029_v4  ;;  %1098 = vmatpush.bf16.msrb.mxu3 %v1029_v4  ;;  %v1114_v7 = vunpack.c.l.bf16 %v2548_v0  ;;  %v1337_v61 = vmax.f32 %v1333_v52, 0.0  ;;  %v1338_v62 = vmax.f32 %v1334_v53, 0.0  ;;  %v1487_v63 = vsel %vm517_vm0, %v2574_v58, 0 }
  0x53   : > { %1038 = vmatpush.bf16.msrb.mxu0 %v1029_v4  ;;  %1058 = vmatpush.bf16.msrb.mxu1 %v1029_v4  ;;  %v1206_v4 = vmax.f32 %v1202_v60, 0.0  ;;  %v1209_v11 = vmax.f32 %v1205_v1, 0.0 }
  0x54   : > { %v1118_v15 = vmax.f32 %v1114_v7, 0.0  ;;  %v1341_v2 = vpack.c.bf16 %v1337_v61, %v1337_v61  ;;  %v1342_v3 = vpack.c.bf16 %v1338_v62, %v1338_v62 }
  0x55   : > { %v1210_v12 = vpack.c.bf16 %v1206_v4, %v1206_v4  ;;  %v1213_v19 = vpack.c.bf16 %v1209_v11, %v1209_v11 }
  0x56   : > { %v1122_v23 = vpack.c.bf16 %v1118_v15, %v1118_v15  ;;  %v1389_v6 = vunpack.c.l.b16 %v1341_v2  ;;  %v1409_v7 = vunpack.c.l.b16 %v1342_v3 }
  0x57   : > { %v1217_v20 = vunpack.c.l.b16 %v1210_v12  ;;  %v1298_v28 = vunpack.c.l.b16 %v1213_v19  ;;  %v1554_v19 = vsel %vm517_vm0, %v1464_v14, 0 }
  0x58   : > { %v1390_v10 = vpack.c.b16 %v1389_v6, %v1389_v6  ;;  %v1410_v11 = vpack.c.b16 %v1409_v7, %v1409_v7 }
  0x59   : > { %v1218_v29 = vpack.c.b16 %v1217_v20, %v1217_v20 }
  0x5a   : > { %v1391_v17 = vrot.slane %v1390_v10, 1  ;;  %v1411_v18 = vrot.slane %v1410_v11, 1 }
  0x5b   : > { %v1220_v42 = vshrl.u32 %v1218_v29, 16 }
  0x60   : > { %2534 = vmatmul.msk.bf16.vlgmr.msra.gmra.mxu0 %vm513_vm1, %v901_v30  ;;  %2535 = vmatmul.msk.bf16.vlgmr.msra.gmra.mxu1 %vm513_vm1, %v930_v31  ;;  %v1247_v30 = vpack.c.b16 %v1246_v21, %v1246_v21  ;;  %v1353_v31 = vsel %vm517_vm0, %v2569_v25, 0 }
  0x61   : > { %2536 = vmatmul.msk.bf16.vlgmr.msra.gmra.mxu2 %vm513_vm1, %v956_v33  ;;  %2537 = vmatmul.msk.bf16.vlgmr.msra.gmra.mxu3 %vm513_vm1, %v982_v34  ;;  %v1299_v33 = vpack.c.b16 %v1298_v28, %v1298_v28  ;;  %v1222_v34 = vshll.u32 %v1218_v29, 16 }
  0x62   : > { %1172 = vmatpush.bf16.msra.mxu2 %v1131_v39  ;;  %1188 = vmatpush.bf16.msra.mxu3 %v1131_v39  ;;  %v1251_v35 = vshll.u32 %v1247_v30, 16  ;;  %v1249_v44 = vshrl.u32 %v1247_v30, 16 }
  0x63   : > { %1140 = vmatpush.bf16.msra.mxu0 %v1131_v39  ;;  %1156 = vmatpush.bf16.msra.mxu1 %v1131_v39  ;;  %v1303_v37 = vshll.u32 %v1299_v33, 16  ;;  %v2566_v39 = vld [vmem:[%s2737_s26 + $0xc] sm:$0x6]  ;;  %v1224_v43 = vrot.slane %v1222_v34, 1  ;;  %s2840_s26 = smul.u32 20, %s3016_s18 }
  0x64   : > { %v1253_v45 = vrot.slane %v1251_v35, 1  ;;  %v1332_v49 = vunpack.c.l.bf16 %v2566_v39 }
  0x65   : > { %v1225_v54 = vor.u32 %v1224_v43, %v1220_v42  ;;  %s2849_s12 = scalar_lea.vmem %s3008_s5, %s2840_s26  ;;  %s2864_s15 = scalar_lea.vmem %s3007_s4, %s2840_s26 }
  0x66   : > { %v1336_v57 = vmax.f32 %v1332_v49, 0.0  ;;  %v1465_v20 = vld [vmem:[%s2849_s12] sm:$0x3]  ;;  %v1466_v21 = vld [vmem:[%s2849_s12 + $0x4] sm:$0x3]  ;;  %s2897_s27 = scalar_lea.vmem %s3009_s6, %s2840_s26  ;;  %s461_s14 = scalar_lea.vmem %s3010_s7, %s2840_s26 }
  0x67   : > { %v1619_v49 = vld [vmem:[%s2864_s15 + $0x8] sm:$0x7]  ;;  %v1448_v52 = vld [vmem:[%s2864_s15] sm:$0x3]  ;;  %v1449_v53 = vld [vmem:[%s2864_s15 + $0x4] sm:$0x3]  ;;  %s466_s26 = scalar_lea.vmem %s3014_s11, %s2632_s30 }
  0x68   : > { %v1340_v1 = vpack.c.bf16 %v1336_v57, %v1336_v57  ;;  %v1451_v57 = vld [vmem:[%s2864_s15 + $0xc] sm:$0x3]  ;;  %v1623_v58 = vunpack.c.l.bf16 %v1619_v49  ;;  %v1453_v61 = vunpack.c.l.bf16 %v1449_v53 }
  0x6a   : > { %v1369_v5 = vunpack.c.l.b16 %v1340_v1  ;;  %v1455_v1 = vunpack.c.l.bf16 %v1451_v57  ;;  %v1457_v11 = vmax.f32 %v1453_v61, 0.0 }
  0x6c   : > { %v1370_v9 = vpack.c.b16 %v1369_v5, %v1369_v5 }
  0x6e   : > { %v1371_v13 = vrot.slane %v1370_v9, 1 }
  0x70   : > { %2543 = vmatmul.msk.bf16.vlgmr.msrb.gmra.mxu0 %vm513_vm1, %v1024_v50  ;;  %2544 = vmatmul.msk.bf16.vlgmr.msrb.gmra.mxu1 %vm513_vm1, %v1047_v51  ;;  %v1301_v50 = vshrl.u32 %v1299_v33, 16  ;;  %v1305_v51 = vrot.slane %v1303_v37, 1 }
  0x71   : > { %2545 = vmatmul.msk.bf16.vlgmr.msrb.gmra.mxu2 %vm513_vm1, %v1067_v55  ;;  %2546 = vmatmul.msk.bf16.vlgmr.msrb.gmra.mxu3 %vm513_vm1, %v1087_v56  ;;  %v1254_v55 = vor.u32 %v1253_v45, %v1249_v44  ;;  %v1335_v56 = vmax.f32 %v1331_v48, 0.0  ;;  %v1617_v45 = vld [vmem:[%s2864_s15] sm:$0x7] }
  0x72   : > { %1291 = vmatpush.bf16.msrb.mxu2 %v1230_v59  ;;  %1317 = vmatpush.bf16.msrb.mxu3 %v1230_v59  ;;  %v1306_v60 = vor.u32 %v1305_v51, %v1301_v50  ;;  %v1620_v50 = vld [vmem:[%s2864_s15 + $0xc] sm:$0x7]  ;;  %v1649_v51 = vsel %vm517_vm0, %v2583_v40, 0 }
  0x73   : > { %1239 = vmatpush.bf16.msrb.mxu0 %v1230_v59  ;;  %1265 = vmatpush.bf16.msrb.mxu1 %v1230_v59  ;;  %v1280_v59 = vor.u32 %v1279_v47, %v1275_v46  ;;  %v1339_v0 = vpack.c.bf16 %v1335_v56, %v1335_v56  ;;  %v1618_v46 = vld [vmem:[%s2864_s15 + $0x4] sm:$0x7]  ;;  %v1450_v56 = vld [vmem:[%s2864_s15 + $0x8] sm:$0x3] }
  0x75   : > { %v1346_v4 = vunpack.c.l.b16 %v1339_v0  ;;  %v1454_v0 = vunpack.c.l.bf16 %v1450_v56 }
  0x77   : > { %v1347_v8 = vpack.c.b16 %v1346_v4, %v1346_v4  ;;  %v1458_v14 = vmax.f32 %v1454_v0, 0.0 }
  0x79   : > { %v1348_v12 = vrot.slane %v1347_v8, 1  ;;  %v1627_v8 = vmax.f32 %v1623_v58, 0.0 }
  0x80   : > { %2552 = vmatmul.msk.bf16.vlgmr.msra.gmra.mxu0 %vm513_vm1, %v1121_v22  ;;  %2553 = vmatmul.msk.bf16.vlgmr.msra.gmra.mxu1 %vm513_vm1, %v1122_v23  ;;  %v1467_v22 = vld [vmem:[%s2849_s12 + $0x8] sm:$0x3]  ;;  %v1468_v23 = vld [vmem:[%s2849_s12 + $0xc] sm:$0x3] }
  0x81   : > { %2554 = vmatmul.msk.bf16.vlgmr.msra.gmra.mxu2 %vm513_vm1, %v1123_v26  ;;  %2555 = vmatmul.msk.bf16.vlgmr.msra.gmra.mxu3 %vm513_vm1, %v1124_v27  ;;  %v1469_v26 = vunpack.c.l.bf16 %v1465_v20  ;;  %v1470_v27 = vunpack.c.l.bf16 %v1466_v21  ;;  %v1471_v30 = vunpack.c.l.bf16 %v1467_v22  ;;  %v1461_v21 = vpack.c.bf16 %v1457_v11, %v1457_v11 }
  0x82   : > { %1402 = vmatpush.bf16.msra.mxu2 %v1353_v31  ;;  %1422 = vmatpush.bf16.msra.mxu3 %v1353_v31 }
  0x83   : > { %1362 = vmatpush.bf16.msra.mxu0 %v1353_v31  ;;  %1382 = vmatpush.bf16.msra.mxu1 %v1353_v31  ;;  %v1472_v31 = vunpack.c.l.bf16 %v1468_v23  ;;  %v1473_v32 = vmax.f32 %v1469_v26, 0.0  ;;  %v1474_v33 = vmax.f32 %v1470_v27, 0.0  ;;  %v1475_v34 = vmax.f32 %v1471_v30, 0.0 }
  0x84   : > { %v1462_v27 = vpack.c.bf16 %v1458_v14, %v1458_v14 }
  0x85   : > { %v1476_v35 = vmax.f32 %v1472_v31, 0.0  ;;  %v1477_v38 = vpack.c.bf16 %v1473_v32, %v1473_v32  ;;  %v1478_v39 = vpack.c.bf16 %v1474_v33, %v1474_v33  ;;  %v1479_v43 = vpack.c.bf16 %v1475_v34, %v1475_v34 }
  0x87   : > { %v1480_v44 = vpack.c.bf16 %v1476_v35, %v1476_v35 }
  0x90   : > { %2561 = vmatmul.msk.bf16.vlgmr.msrb.gmra.mxu0 %vm513_vm1, %v1225_v54  ;;  %2562 = vmatmul.msk.bf16.vlgmr.msrb.gmra.mxu1 %vm513_vm1, %v1254_v55  ;;  %v1621_v54 = vunpack.c.l.bf16 %v1617_v45  ;;  %v1622_v55 = vunpack.c.l.bf16 %v1618_v46 }
  0x91   : > { %2563 = vmatmul.msk.bf16.vlgmr.msrb.gmra.mxu2 %vm513_vm1, %v1280_v59  ;;  %2564 = vmatmul.msk.bf16.vlgmr.msrb.gmra.mxu3 %vm513_vm1, %v1306_v60  ;;  %v1624_v59 = vunpack.c.l.bf16 %v1620_v50  ;;  %v1452_v60 = vunpack.c.l.bf16 %v1448_v52 }
  0x92   : > { %1528 = vmatpush.bf16.msrb.mxu2 %v1487_v63  ;;  %1544 = vmatpush.bf16.msrb.mxu3 %v1487_v63  ;;  %v1625_v2 = vmax.f32 %v1621_v54, 0.0  ;;  %v1626_v3 = vmax.f32 %v1622_v55, 0.0 }
  0x93   : > { %1496 = vmatpush.bf16.msrb.mxu0 %v1487_v63  ;;  %1512 = vmatpush.bf16.msrb.mxu1 %v1487_v63  ;;  %v1628_v9 = vmax.f32 %v1624_v59, 0.0  ;;  %v1456_v10 = vmax.f32 %v1452_v60, 0.0  ;;  %v2593_v60 = vld [vmem:[%s3011_s8 + $0x10] sm:$0xf] }
  0x95   : > { %v1460_v20 = vpack.c.bf16 %v1456_v10, %v1456_v10 }
  0x9d   : > { %v530_v15 = vpop.f32.mrf.mxu0  ;;  %v556_v16 = vpop.f32.mrf.mxu1 }
  0xa0   : > { %2570 = vmatmul.msk.bf16.vlgmr.msra.gmra.mxu0 %vm513_vm1, %v1348_v12  ;;  %2571 = vmatmul.msk.bf16.vlgmr.msra.gmra.mxu1 %vm513_vm1, %v1371_v13  ;;  %v1629_v12 = vpack.c.bf16 %v1625_v2, %v1625_v2  ;;  %v1630_v13 = vpack.c.bf16 %v1626_v3, %v1626_v3  ;;  %v1857_v3 = vsel %vm517_vm0, %v2593_v60, 0 }
  0xa1   : > { %2572 = vmatmul.msk.bf16.vlgmr.msra.gmra.mxu2 %vm513_vm1, %v1391_v17  ;;  %2573 = vmatmul.msk.bf16.vlgmr.msra.gmra.mxu3 %vm513_vm1, %v1411_v18  ;;  %v1632_v17 = vpack.c.bf16 %v1628_v9, %v1628_v9 }
  0xa2   : > { %1595 = vmatpush.bf16.msra.mxu2 %v1554_v19  ;;  %1611 = vmatpush.bf16.msra.mxu3 %v1554_v19  ;;  %v1636_v22 = vunpack.c.l.b16 %v1629_v12  ;;  %v1665_v23 = vunpack.c.l.b16 %v1630_v13 }
  0xa3   : > { %1563 = vmatpush.bf16.msra.mxu0 %v1554_v19  ;;  %1579 = vmatpush.bf16.msra.mxu1 %v1554_v19  ;;  %v1717_v30 = vunpack.c.l.b16 %v1632_v17 }
  0xa4   : > { %v582_v24 = vpop.f32.mrf.mxu2  ;;  %v608_v25 = vpop.f32.mrf.mxu3  ;;  %v1637_v34 = vpack.c.b16 %v1636_v22, %v1636_v22  ;;  %v1666_v35 = vpack.c.b16 %v1665_v23, %v1665_v23 }
  0xa5   : > { %v532_v28 = vpop.f32.mrf.mxu0  ;;  %v558_v29 = vpop.f32.mrf.mxu1 }
  0xa6   : > { %v1641_v40 = vshll.u32 %v1637_v34, 16  ;;  %v1668_v50 = vshrl.u32 %v1666_v35, 16 }
  0xa8   : > { %v1643_v49 = vrot.slane %v1641_v40, 1 }
  0xac   : > { %v584_v36 = vpop.f32.mrf.mxu2  ;;  %v610_v37 = vpop.f32.mrf.mxu3 }
  0xad   : > { %v627_v41 = vpop.f32.mrf.mxu0  ;;  %v643_v42 = vpop.f32.mrf.mxu1  ;;  %v1718_v37 = vpack.c.b16 %v1717_v30, %v1717_v30 }
  0xae   : > { %v628_v47 = vadd.f32 %v627_v41, %v530_v15  ;;  %v644_v48 = vadd.f32 %v643_v42, %v556_v16  ;;  %v1459_v15 = vmax.f32 %v1455_v1, 0.0  ;;  %v1631_v16 = vpack.c.bf16 %v1627_v8, %v1627_v8 }
  0xaf   : > { %v1670_v41 = vshll.u32 %v1666_v35, 16  ;;  %v1720_v54 = vshrl.u32 %v1718_v37, 16  ;;  %v1926_v35 = vld [vmem:[%s2897_s27 + $0x8] sm:$0x7] }
  0xb0   : > { %2575 = vmatmul.msk.bf16.vlgmr.msrb.gmra.mxu0 %vm513_vm1, %v1477_v38  ;;  %2576 = vmatmul.msk.bf16.vlgmr.msrb.gmra.mxu1 %vm513_vm1, %v1478_v39  ;;  %v1463_v28 = vpack.c.bf16 %v1459_v15, %v1459_v15  ;;  %v1691_v29 = vunpack.c.l.b16 %v1631_v16 }
  0xb1   : > { %2577 = vmatmul.msk.bf16.vlgmr.msrb.gmra.mxu2 %vm513_vm1, %v1479_v43  ;;  %2578 = vmatmul.msk.bf16.vlgmr.msrb.gmra.mxu3 %vm513_vm1, %v1480_v44 }
  0xb2   : > { %1710 = vmatpush.bf16.msrb.mxu2 %v1649_v51  ;;  %1736 = vmatpush.bf16.msrb.mxu3 %v1649_v51  ;;  %v1692_v36 = vpack.c.b16 %v1691_v29, %v1691_v29 }
  0xb3   : > { %1658 = vmatpush.bf16.msrb.mxu0 %v1649_v51  ;;  %1684 = vmatpush.bf16.msrb.mxu1 %v1649_v51  ;;  %v1672_v51 = vrot.slane %v1670_v41, 1 }
  0xb4   : > { %v659_v62 = vpop.f32.mrf.mxu2  ;;  %v675_v63 = vpop.f32.mrf.mxu3  ;;  %v1696_v46 = vshll.u32 %v1692_v36, 16  ;;  %v1694_v52 = vshrl.u32 %v1692_v36, 16  ;;  %v1927_v36 = vld [vmem:[%s2897_s27 + $0xc] sm:$0x7] }
  0xb5   : > { %v660_v4 = vadd.f32 %v659_v62, %v582_v24  ;;  %v676_v5 = vadd.f32 %v675_v63, %v608_v25  ;;  %v629_v6 = vpop.f32.mrf.mxu0  ;;  %v645_v7 = vpop.f32.mrf.mxu1  ;;  %v2588_v24 = vld [vmem:[%s3011_s8 + $0xc] sm:$0xf]  ;;  %v1673_v59 = vor.u32 %v1672_v51, %v1668_v50 }
  0xb6   : > { %v1768_v33 = vsel %vm517_vm0, %v2588_v24, 0  ;;  %v1698_v53 = vrot.slane %v1696_v46, 1  ;;  %v1748_v6 = vld [vmem:[%s2897_s27 + $0x8] sm:$0x3]  ;;  %v1749_v7 = vld [vmem:[%s2897_s27 + $0xc] sm:$0x3] }
  0xb7   : > { %v1752_v16 = vunpack.c.l.bf16 %v1748_v6  ;;  %v1753_v17 = vunpack.c.l.bf16 %v1749_v7 }
  0xb8   : > { %v1699_v63 = vor.u32 %v1698_v53, %v1694_v52 }
  0xbc   : > { %v661_v18 = vpop.f32.mrf.mxu2  ;;  %v677_v19 = vpop.f32.mrf.mxu3 }
  0xbd   : > { %v716_v25 = vpop.f32.mrf.mxu0  ;;  %v736_v26 = vpop.f32.mrf.mxu1 }
  0xbe   : > { %v780_v31 = vadd.f32 %v716_v25, %v628_v47  ;;  %v781_v32 = vadd.f32 %v736_v26, %v644_v48  ;;  %v1722_v47 = vshll.u32 %v1718_v37, 16  ;;  %v1639_v48 = vshrl.u32 %v1637_v34, 16  ;;  %v2598_v26 = vld [vmem:[%s3011_s8 + $0x14] sm:$0xf] }
  0xbf   : > { %v1956_v37 = vsel %vm517_vm0, %v2598_v26, 0 }
  0xc0   : > { %2579 = vmatmul.msk.bf16.vlgmr.msra.gmra.mxu0 %vm513_vm1, %v1460_v20  ;;  %2580 = vmatmul.msk.bf16.vlgmr.msra.gmra.mxu1 %vm513_vm1, %v1461_v21  ;;  %v1724_v55 = vrot.slane %v1722_v47, 1  ;;  %v1644_v58 = vor.u32 %v1643_v49, %v1639_v48  ;;  %v1756_v20 = vmax.f32 %v1752_v16, 0.0  ;;  %v1757_v21 = vmax.f32 %v1753_v17, 0.0 }
  0xc1   : > { %2581 = vmatmul.msk.bf16.vlgmr.msra.gmra.mxu2 %vm513_vm1, %v1462_v27  ;;  %2582 = vmatmul.msk.bf16.vlgmr.msra.gmra.mxu3 %vm513_vm1, %v1463_v28 }
  0xc2   : > { %1809 = vmatpush.bf16.msra.mxu2 %v1768_v33  ;;  %1825 = vmatpush.bf16.msra.mxu3 %v1768_v33  ;;  %v1725_v0 = vor.u32 %v1724_v55, %v1720_v54  ;;  %v1760_v29 = vpack.c.bf16 %v1756_v20, %v1756_v20  ;;  %v1761_v30 = vpack.c.bf16 %v1757_v21, %v1757_v21 }
  0xc3   : > { %1777 = vmatpush.bf16.msra.mxu0 %v1768_v33  ;;  %1793 = vmatpush.bf16.msra.mxu1 %v1768_v33 }
  0xc4   : > { %v756_v38 = vpop.f32.mrf.mxu2  ;;  %v776_v39 = vpop.f32.mrf.mxu3 }
  0xc5   : > { %v782_v42 = vadd.f32 %v756_v38, %v660_v4  ;;  %v783_v43 = vadd.f32 %v776_v39, %v676_v5  ;;  %v718_v44 = vpop.f32.mrf.mxu0  ;;  %v738_v45 = vpop.f32.mrf.mxu1  ;;  %v1746_v4 = vld [vmem:[%s2897_s27] sm:$0x3]  ;;  %v1747_v5 = vld [vmem:[%s2897_s27 + $0x4] sm:$0x3] }
  0xc6   : > { %v1750_v10 = vunpack.c.l.bf16 %v1746_v4  ;;  %v1751_v11 = vunpack.c.l.bf16 %v1747_v5  ;;  %v1835_v38 = vld [vmem:[%s461_s14] sm:$0x3]  ;;  %v1836_v39 = vld [vmem:[%s461_s14 + $0x4] sm:$0x3]  ;;  %v1930_v44 = vunpack.c.l.bf16 %v1926_v35  ;;  %v1931_v45 = vunpack.c.l.bf16 %v1927_v36 }
  0xc7   : > { %v1839_v46 = vunpack.c.l.bf16 %v1835_v38  ;;  %v1840_v47 = vunpack.c.l.bf16 %v1836_v39 }
  0xc8   : > { %v1754_v18 = vmax.f32 %v1750_v10, 0.0  ;;  %v1755_v19 = vmax.f32 %v1751_v11, 0.0  ;;  %v2607_v10 = vld [vmem:[%s3011_s8 + $0x18] sm:$0xf] }
  0xc9   : > { %v1843_v60 = vmax.f32 %v1839_v46, 0.0  ;;  %v2616_v46 = vld [vmem:[%s3011_s8 + $0x1c] sm:$0xf] }
  0xca   : > { %v1758_v24 = vpack.c.bf16 %v1754_v18, %v1754_v18  ;;  %v1759_v25 = vpack.c.bf16 %v1755_v19, %v1755_v19  ;;  %v2076_v19 = vsel %vm517_vm0, %v2607_v10, 0 }
  0xcb   : > { %v1847_v6 = vpack.c.bf16 %v1843_v60, %v1843_v60 }
  0xcc   : > { %v758_v56 = vpop.f32.mrf.mxu2  ;;  %v778_v57 = vpop.f32.mrf.mxu3 }
  0xcd   : > { %v818_v61 = vpop.f32.mrf.mxu0  ;;  %v834_v62 = vpop.f32.mrf.mxu1 }
  0xce   : > { %v870_v1 = vadd.f32 %v818_v61, %v780_v31  ;;  %v871_v2 = vadd.f32 %v834_v62, %v781_v32  ;;  %v1924_v31 = vld [vmem:[%s2897_s27] sm:$0x7]  ;;  %v1925_v32 = vld [vmem:[%s2897_s27 + $0x4] sm:$0x7]  ;;  %v1844_v61 = vmax.f32 %v1840_v47, 0.0 }
  0xcf   : > { %v1928_v40 = vunpack.c.l.bf16 %v1924_v31  ;;  %v1929_v41 = vunpack.c.l.bf16 %v1925_v32 }
  0xd0   : > { %2584 = vmatmul.msk.bf16.vlgmr.msrb.gmra.mxu0 %vm513_vm1, %v1644_v58  ;;  %2585 = vmatmul.msk.bf16.vlgmr.msrb.gmra.mxu1 %vm513_vm1, %v1673_v59  ;;  %v1934_v58 = vmax.f32 %v1930_v44, 0.0  ;;  %v1935_v59 = vmax.f32 %v1931_v45, 0.0  ;;  %v1848_v7 = vpack.c.bf16 %v1844_v61, %v1844_v61 }
  0xd1   : > { %2586 = vmatmul.msk.bf16.vlgmr.msrb.gmra.mxu2 %vm513_vm1, %v1699_v63  ;;  %2587 = vmatmul.msk.bf16.vlgmr.msrb.gmra.mxu3 %vm513_vm1, %v1725_v0  ;;  %v1932_v52 = vmax.f32 %v1928_v40, 0.0  ;;  %v1933_v53 = vmax.f32 %v1929_v41, 0.0 }
  0xd2   : > { %1898 = vmatpush.bf16.msrb.mxu2 %v1857_v3  ;;  %1914 = vmatpush.bf16.msrb.mxu3 %v1857_v3 }
  0xd3   : > { %1866 = vmatpush.bf16.msrb.mxu0 %v1857_v3  ;;  %1882 = vmatpush.bf16.msrb.mxu1 %v1857_v3  ;;  %v1936_v62 = vpack.c.bf16 %v1932_v52, %v1932_v52  ;;  %v1937_v63 = vpack.c.bf16 %v1933_v53, %v1933_v53  ;;  %v1939_v3 = vpack.c.bf16 %v1935_v59, %v1935_v59  ;;  %v2166_v53 = vsel %vm517_vm0, %v2616_v46, 0 }
  0xd4   : > { %v850_v8 = vpop.f32.mrf.mxu2  ;;  %v866_v9 = vpop.f32.mrf.mxu3 }
  0xd5   : > { %v872_v12 = vadd.f32 %v850_v8, %v782_v42  ;;  %v873_v13 = vadd.f32 %v866_v9, %v783_v43  ;;  %v820_v14 = vpop.f32.mrf.mxu0  ;;  %v836_v15 = vpop.f32.mrf.mxu1  ;;  %v1837_v42 = vld [vmem:[%s461_s14 + $0x8] sm:$0x3]  ;;  %v1838_v43 = vld [vmem:[%s461_s14 + $0xc] sm:$0x3]  ;;  %v1943_v8 = vunpack.c.l.b16 %v1936_v62  ;;  %v1972_v9 = vunpack.c.l.b16 %v1937_v63 }
  0xd6   : > { %v1841_v50 = vunpack.c.l.bf16 %v1837_v42  ;;  %v1842_v51 = vunpack.c.l.bf16 %v1838_v43  ;;  %v2024_v16 = vunpack.c.l.b16 %v1939_v3 }
  0xd7   : > { %v1944_v20 = vpack.c.b16 %v1943_v8, %v1943_v8  ;;  %v1973_v21 = vpack.c.b16 %v1972_v9, %v1972_v9 }
  0xd8   : > { %v1845_v0 = vmax.f32 %v1841_v50, 0.0 }
  0xd9   : > { %v1948_v26 = vshll.u32 %v1944_v20, 16  ;;  %v1975_v36 = vshrl.u32 %v1973_v21, 16 }
  0xdb   : > { %v1950_v35 = vrot.slane %v1948_v26, 1 }
  0xdc   : > { %v852_v22 = vpop.f32.mrf.mxu2  ;;  %v868_v23 = vpop.f32.mrf.mxu3 }
  0xdd   : > { %v917_v27 = vpop.f32.mrf.mxu0  ;;  %v943_v28 = vpop.f32.mrf.mxu1  ;;  %v2025_v23 = vpack.c.b16 %v2024_v16, %v2024_v16 }
  0xde   : > { %v999_v33 = vadd.f32 %v917_v27, %v870_v1  ;;  %v1000_v34 = vadd.f32 %v943_v28, %v871_v2  ;;  %v1846_v1 = vmax.f32 %v1842_v51, 0.0  ;;  %v1938_v2 = vpack.c.bf16 %v1934_v58, %v1934_v58 }
  0xdf   : > { %v1977_v27 = vshll.u32 %v1973_v21, 16  ;;  %v2027_v40 = vshrl.u32 %v2025_v23, 16  ;;  %v2623_v21 = vld [vmem:[%s2864_s15 + $0xc] sm:$0x7] }
  0xe0   : > { %2589 = vmatmul.msk.bf16.vlgmr.msra.gmra.mxu0 %vm513_vm1, %v1758_v24  ;;  %2590 = vmatmul.msk.bf16.vlgmr.msra.gmra.mxu1 %vm513_vm1, %v1759_v25  ;;  %v1850_v14 = vpack.c.bf16 %v1846_v1, %v1846_v1  ;;  %v1998_v15 = vunpack.c.l.b16 %v1938_v2 }
  0xe1   : > { %2591 = vmatmul.msk.bf16.vlgmr.msra.gmra.mxu2 %vm513_vm1, %v1760_v29  ;;  %2592 = vmatmul.msk.bf16.vlgmr.msra.gmra.mxu3 %vm513_vm1, %v1761_v30 }
  0xe2   : > { %2017 = vmatpush.bf16.msra.mxu2 %v1956_v37  ;;  %2043 = vmatpush.bf16.msra.mxu3 %v1956_v37  ;;  %v1999_v22 = vpack.c.b16 %v1998_v15, %v1998_v15 }
  0xe3   : > { %1965 = vmatpush.bf16.msra.mxu0 %v1956_v37  ;;  %1991 = vmatpush.bf16.msra.mxu1 %v1956_v37  ;;  %v1979_v37 = vrot.slane %v1977_v27, 1 }
  0xe4   : > { %v969_v48 = vpop.f32.mrf.mxu2  ;;  %v995_v49 = vpop.f32.mrf.mxu3  ;;  %v2003_v32 = vshll.u32 %v1999_v22, 16  ;;  %v2001_v38 = vshrl.u32 %v1999_v22, 16  ;;  %v2624_v22 = vld [vmem:[%s2864_s15 + $0x10] sm:$0x7] }
  0xe5   : > { %v1001_v54 = vadd.f32 %v969_v48, %v872_v12  ;;  %v1002_v55 = vadd.f32 %v995_v49, %v873_v13  ;;  %v919_v56 = vpop.f32.mrf.mxu0  ;;  %v945_v57 = vpop.f32.mrf.mxu1  ;;  %v1849_v13 = vpack.c.bf16 %v1845_v0, %v1845_v0  ;;  %v1980_v45 = vor.u32 %v1979_v37, %v1975_v36 }
  0xe6   : > { %v2005_v39 = vrot.slane %v2003_v32, 1  ;;  %v2605_v56 = vld [vmem:[%s2864_s15 + $0xc] sm:$0x3]  ;;  %v2606_v57 = vld [vmem:[%s2864_s15 + $0x10] sm:$0x3] }
  0xe7   : > { %v2060_v2 = vunpack.c.l.bf16 %v2605_v56  ;;  %v2061_v3 = vunpack.c.l.bf16 %v2606_v57 }
  0xe8   : > { %v2006_v49 = vor.u32 %v2005_v39, %v2001_v38 }
  0xec   : > { %v971_v4 = vpop.f32.mrf.mxu2  ;;  %v997_v5 = vpop.f32.mrf.mxu3 }
  0xed   : > { %v1040_v11 = vpop.f32.mrf.mxu0  ;;  %v1060_v12 = vpop.f32.mrf.mxu1 }
  0xee   : > { %v1104_v17 = vadd.f32 %v1040_v11, %v999_v33  ;;  %v1105_v18 = vadd.f32 %v1060_v12, %v1000_v34  ;;  %v2029_v33 = vshll.u32 %v2025_v23, 16  ;;  %v1946_v34 = vshrl.u32 %v1944_v20, 16  ;;  %v2625_v12 = vld [vmem:[%s3011_s8 + $0x20] sm:$0xf] }
  0xef   : > { %v2265_v23 = vsel %vm517_vm0, %v2625_v12, 0 }
  0xf0   : > { %2594 = vmatmul.msk.bf16.vlgmr.msrb.gmra.mxu0 %vm513_vm1, %v1847_v6  ;;  %2595 = vmatmul.msk.bf16.vlgmr.msrb.gmra.mxu1 %vm513_vm1, %v1848_v7  ;;  %v2031_v41 = vrot.slane %v2029_v33, 1  ;;  %v1951_v44 = vor.u32 %v1950_v35, %v1946_v34  ;;  %v2064_v6 = vmax.f32 %v2060_v2, 0.0  ;;  %v2065_v7 = vmax.f32 %v2061_v3, 0.0 }
  0xf1   : > { %2596 = vmatmul.msk.bf16.vlgmr.msrb.gmra.mxu2 %vm513_vm1, %v1849_v13  ;;  %2597 = vmatmul.msk.bf16.vlgmr.msrb.gmra.mxu3 %vm513_vm1, %v1850_v14 }
  0xf2   : > { %2117 = vmatpush.bf16.msrb.mxu2 %v2076_v19  ;;  %2133 = vmatpush.bf16.msrb.mxu3 %v2076_v19  ;;  %v2032_v50 = vor.u32 %v2031_v41, %v2027_v40  ;;  %v2068_v15 = vpack.c.bf16 %v2064_v6, %v2064_v6  ;;  %v2069_v16 = vpack.c.bf16 %v2065_v7, %v2065_v7 }
  0xf3   : > { %2085 = vmatpush.bf16.msrb.mxu0 %v2076_v19  ;;  %2101 = vmatpush.bf16.msrb.mxu1 %v2076_v19 }
  0xf4   : > { %v1080_v24 = vpop.f32.mrf.mxu2  ;;  %v1100_v25 = vpop.f32.mrf.mxu3 }
  0xf5   : > { %v1106_v28 = vadd.f32 %v1080_v24, %v1001_v54  ;;  %v1107_v29 = vadd.f32 %v1100_v25, %v1002_v55  ;;  %v1042_v30 = vpop.f32.mrf.mxu0  ;;  %v1062_v31 = vpop.f32.mrf.mxu1  ;;  %v2603_v54 = vld [vmem:[%s2864_s15 + $0x4] sm:$0x3]  ;;  %v2604_v55 = vld [vmem:[%s2864_s15 + $0x8] sm:$0x3] }
  0xf6   : > { %v2058_v60 = vunpack.c.l.bf16 %v2603_v54  ;;  %v2059_v61 = vunpack.c.l.bf16 %v2604_v55  ;;  %v2612_v24 = vld [vmem:[%s2849_s12 + $0x4] sm:$0x3]  ;;  %v2613_v25 = vld [vmem:[%s2849_s12 + $0x8] sm:$0x3]  ;;  %v2239_v30 = vunpack.c.l.bf16 %v2623_v21  ;;  %v2240_v31 = vunpack.c.l.bf16 %v2624_v22 }
  0xf7   : > { %v2148_v32 = vunpack.c.l.bf16 %v2612_v24  ;;  %v2149_v33 = vunpack.c.l.bf16 %v2613_v25 }
  0xf8   : > { %v2062_v4 = vmax.f32 %v2058_v60, 0.0  ;;  %v2063_v5 = vmax.f32 %v2059_v61, 0.0 }
  0xf9   : > { %v2152_v46 = vmax.f32 %v2148_v32, 0.0 }
  0xfa   : > { %v2066_v10 = vpack.c.bf16 %v2062_v4, %v2062_v4  ;;  %v2067_v11 = vpack.c.bf16 %v2063_v5, %v2063_v5 }
  0xfb   : > { %v2156_v56 = vpack.c.bf16 %v2152_v46, %v2152_v46 }
  0xfc   : > { %v1082_v42 = vpop.f32.mrf.mxu2  ;;  %v1102_v43 = vpop.f32.mrf.mxu3 }
  0xfd   : > { %v1142_v47 = vpop.f32.mrf.mxu0  ;;  %v1158_v48 = vpop.f32.mrf.mxu1 }
  0xfe   : > { %v1194_v51 = vadd.f32 %v1142_v47, %v1104_v17  ;;  %v1195_v52 = vadd.f32 %v1158_v48, %v1105_v18  ;;  %v2621_v17 = vld [vmem:[%s2864_s15 + $0x4] sm:$0x7]  ;;  %v2622_v18 = vld [vmem:[%s2864_s15 + $0x8] sm:$0x7]  ;;  %v2153_v47 = vmax.f32 %v2149_v33, 0.0 }
  0xff   : > { %v2237_v26 = vunpack.c.l.bf16 %v2621_v17  ;;  %v2238_v27 = vunpack.c.l.bf16 %v2622_v18 }
 0x100   : > { %2599 = vmatmul.msk.bf16.vlgmr.msra.gmra.mxu0 %vm513_vm1, %v1951_v44  ;;  %2600 = vmatmul.msk.bf16.vlgmr.msra.gmra.mxu1 %vm513_vm1, %v1980_v45  ;;  %v2243_v44 = vmax.f32 %v2239_v30, 0.0  ;;  %v2244_v45 = vmax.f32 %v2240_v31, 0.0  ;;  %v2157_v57 = vpack.c.bf16 %v2153_v47, %v2153_v47 }
 0x101   : > { %2601 = vmatmul.msk.bf16.vlgmr.msra.gmra.mxu2 %vm513_vm1, %v2006_v49  ;;  %2602 = vmatmul.msk.bf16.vlgmr.msra.gmra.mxu3 %vm513_vm1, %v2032_v50  ;;  %v2241_v38 = vmax.f32 %v2237_v26, 0.0  ;;  %v2242_v39 = vmax.f32 %v2238_v27, 0.0 }
 0x102   : > { %2207 = vmatpush.bf16.msra.mxu2 %v2166_v53  ;;  %2223 = vmatpush.bf16.msra.mxu3 %v2166_v53 }
 0x103   : > { %2175 = vmatpush.bf16.msra.mxu0 %v2166_v53  ;;  %2191 = vmatpush.bf16.msra.mxu1 %v2166_v53  ;;  %v2245_v48 = vpack.c.bf16 %v2241_v38, %v2241_v38  ;;  %v2246_v49 = vpack.c.bf16 %v2242_v39, %v2242_v39  ;;  %v2248_v53 = vpack.c.bf16 %v2244_v45, %v2244_v45 }
 0x104   : > { %v1174_v58 = vpop.f32.mrf.mxu2  ;;  %v1190_v59 = vpop.f32.mrf.mxu3 }
 0x105   : > { %v1196_v62 = vadd.f32 %v1174_v58, %v1106_v28  ;;  %v1197_v63 = vadd.f32 %v1190_v59, %v1107_v29  ;;  %v1144_v0 = vpop.f32.mrf.mxu0  ;;  %v1160_v1 = vpop.f32.mrf.mxu1  ;;  %v2614_v28 = vld [vmem:[%s2849_s12 + $0xc] sm:$0x3]  ;;  %v2615_v29 = vld [vmem:[%s2849_s12 + $0x10] sm:$0x3]  ;;  %v2252_v58 = vunpack.c.l.b16 %v2245_v48  ;;  %v2281_v59 = vunpack.c.l.b16 %v2246_v49 }
 0x106   : > { %v2150_v36 = vunpack.c.l.bf16 %v2614_v28  ;;  %v2151_v37 = vunpack.c.l.bf16 %v2615_v29  ;;  %v2333_v1 = vunpack.c.l.b16 %v2248_v53 }
 0x107   : > { %v2253_v4 = vpack.c.b16 %v2252_v58, %v2252_v58  ;;  %v2282_v5 = vpack.c.b16 %v2281_v59, %v2281_v59 }
 0x108   : > { %v2154_v50 = vmax.f32 %v2150_v36, 0.0  ;;  %v2334_v7 = vpack.c.b16 %v2333_v1, %v2333_v1 }
 0x109   : > { %v2255_v18 = vshrl.u32 %v2253_v4, 16 }
 0x10a   : > { %v2338_v17 = vshll.u32 %v2334_v7, 16  ;;  %v2336_v24 = vshrl.u32 %v2334_v7, 16 }
 0x10c   : > { %v1176_v8 = vpop.f32.mrf.mxu2  ;;  %v1192_v9 = vpop.f32.mrf.mxu3  ;;  %v2340_v25 = vrot.slane %v2338_v17, 1 }
 0x10d   : > { %v1241_v13 = vpop.f32.mrf.mxu0  ;;  %v1267_v14 = vpop.f32.mrf.mxu1 }
 0x10e   : > { %v1323_v19 = vadd.f32 %v1241_v13, %v1194_v51  ;;  %v1324_v20 = vadd.f32 %v1267_v14, %v1195_v52  ;;  %v2155_v51 = vmax.f32 %v2151_v37, 0.0  ;;  %v2247_v52 = vpack.c.bf16 %v2243_v44, %v2243_v44 }
 0x10f   : > { %v2341_v33 = vor.u32 %v2340_v25, %v2336_v24 }
 0x110   : > { %2608 = vmatmul.msk.bf16.vlgmr.msrb.gmra.mxu0 %vm513_vm1, %v2066_v10  ;;  %2609 = vmatmul.msk.bf16.vlgmr.msrb.gmra.mxu1 %vm513_vm1, %v2067_v11  ;;  %v2307_v0 = vunpack.c.l.b16 %v2247_v52  ;;  %v2257_v10 = vshll.u32 %v2253_v4, 16  ;;  %v2286_v11 = vshll.u32 %v2282_v5, 16 }
 0x111   : > { %2610 = vmatmul.msk.bf16.vlgmr.msrb.gmra.mxu2 %vm513_vm1, %v2068_v15  ;;  %2611 = vmatmul.msk.bf16.vlgmr.msrb.gmra.mxu3 %vm513_vm1, %v2069_v16 }
 0x112   : > { %2326 = vmatpush.bf16.msrb.mxu2 %v2265_v23  ;;  %2352 = vmatpush.bf16.msrb.mxu3 %v2265_v23  ;;  %v2308_v6 = vpack.c.b16 %v2307_v0, %v2307_v0  ;;  %v2288_v21 = vrot.slane %v2286_v11, 1 }
 0x113   : > { %2274 = vmatpush.bf16.msrb.mxu0 %v2265_v23  ;;  %2300 = vmatpush.bf16.msrb.mxu1 %v2265_v23 }
 0x114   : > { %v1293_v34 = vpop.f32.mrf.mxu2  ;;  %v1319_v35 = vpop.f32.mrf.mxu3  ;;  %v2312_v16 = vshll.u32 %v2308_v6, 16  ;;  %v2310_v22 = vshrl.u32 %v2308_v6, 16 }
 0x115   : > { %v1325_v40 = vadd.f32 %v1293_v34, %v1196_v62  ;;  %v1326_v41 = vadd.f32 %v1319_v35, %v1197_v63  ;;  %v1243_v42 = vpop.f32.mrf.mxu0  ;;  %v1269_v43 = vpop.f32.mrf.mxu1  ;;  %v2158_v62 = vpack.c.bf16 %v2154_v50, %v2154_v50  ;;  %v2159_v63 = vpack.c.bf16 %v2155_v51, %v2155_v51 }
 0x116   : > { %v2314_v23 = vrot.slane %v2312_v16, 1 }
 0x118   : > { %v2315_v32 = vor.u32 %v2314_v23, %v2310_v22 }
 0x11c   : > { %v1295_v54 = vpop.f32.mrf.mxu2  ;;  %v1321_v55 = vpop.f32.mrf.mxu3 }
 0x11d   : > { %v1364_v60 = vpop.f32.mrf.mxu0  ;;  %v1384_v61 = vpop.f32.mrf.mxu1 }
 0x11e   : > { %v2960_v2 = vadd.f32 %v1364_v60, %v1323_v19  ;;  %v2962_v3 = vadd.f32 %v1384_v61, %v1324_v20  ;;  %v2259_v19 = vrot.slane %v2257_v10, 1  ;;  %v2284_v20 = vshrl.u32 %v2282_v5, 16 }
 0x120   : > { %2617 = vmatmul.msk.bf16.vlgmr.msra.gmra.mxu0 %vm513_vm1, %v2156_v56  ;;  %2618 = vmatmul.msk.bf16.vlgmr.msra.gmra.mxu1 %vm513_vm1, %v2157_v57  ;;  %v2260_v28 = vor.u32 %v2259_v19, %v2255_v18  ;;  %v2289_v29 = vor.u32 %v2288_v21, %v2284_v20 }
 0x121   : > { %2619 = vmatmul.msk.bf16.vlgmr.msra.gmra.mxu2 %vm513_vm1, %v2158_v62  ;;  %2620 = vmatmul.msk.bf16.vlgmr.msra.gmra.mxu3 %vm513_vm1, %v2159_v63 }
 0x124   : > { %v1404_v8 = vpop.f32.mrf.mxu2  ;;  %v1424_v9 = vpop.f32.mrf.mxu3 }
 0x125   : > { %v2968_v12 = vadd.f32 %v1404_v8, %v1325_v40  ;;  %v2970_v13 = vadd.f32 %v1424_v9, %v1326_v41  ;;  %v1366_v14 = vpop.f32.mrf.mxu0  ;;  %v1386_v15 = vpop.f32.mrf.mxu1 }
 0x12c   : > { %v1406_v26 = vpop.f32.mrf.mxu2  ;;  %v1426_v27 = vpop.f32.mrf.mxu3 }
 0x12d   : > { %v1498_v30 = vpop.f32.mrf.mxu0  ;;  %v1514_v31 = vpop.f32.mrf.mxu1 }
 0x130   : > { %2626 = vmatmul.msk.bf16.vlgmr.msrb.gmra.mxu0 %vm513_vm1, %v2260_v28  ;;  %2627 = vmatmul.msk.bf16.vlgmr.msrb.gmra.mxu1 %vm513_vm1, %v2289_v29 }
 0x131   : > { %2628 = vmatmul.msk.bf16.vlgmr.msrb.gmra.mxu2 %vm513_vm1, %v2315_v32  ;;  %2629 = vmatmul.msk.bf16.vlgmr.msrb.gmra.mxu3 %vm513_vm1, %v2341_v33 }
 0x134   : > { %v1530_v34 = vpop.f32.mrf.mxu2  ;;  %v1546_v35 = vpop.f32.mrf.mxu3 }
 0x135   : > { %v1500_v36 = vpop.f32.mrf.mxu0  ;;  %v1516_v37 = vpop.f32.mrf.mxu1 }
 0x13c   : > { %v1532_v38 = vpop.f32.mrf.mxu2  ;;  %v1548_v39 = vpop.f32.mrf.mxu3 }
 0x13d   : > { %v1565_v40 = vpop.f32.mrf.mxu0  ;;  %v1581_v41 = vpop.f32.mrf.mxu1 }
 0x13e   : > { %v1566_v42 = vadd.f32 %v1565_v40, %v1498_v30  ;;  %v1582_v43 = vadd.f32 %v1581_v41, %v1514_v31 }
 0x144   : > { %v1597_v44 = vpop.f32.mrf.mxu2  ;;  %v1613_v45 = vpop.f32.mrf.mxu3 }
 0x145   : > { %v1598_v46 = vadd.f32 %v1597_v44, %v1530_v34  ;;  %v1614_v47 = vadd.f32 %v1613_v45, %v1546_v35  ;;  %v1567_v48 = vpop.f32.mrf.mxu0  ;;  %v1583_v49 = vpop.f32.mrf.mxu1 }
 0x14c   : > { %v1599_v50 = vpop.f32.mrf.mxu2  ;;  %v1615_v51 = vpop.f32.mrf.mxu3 }
 0x14d   : > { %v1660_v52 = vpop.f32.mrf.mxu0  ;;  %v1686_v53 = vpop.f32.mrf.mxu1  ;;  %v2643_v50 = vld [vmem:[%s3005_s2] ss:$0 sm:$0xff] }
 0x14e   : > { %v1742_v54 = vadd.f32 %v1660_v52, %v1566_v42  ;;  %v1743_v55 = vadd.f32 %v1686_v53, %v1582_v43 }
 0x154   : > { %v1712_v56 = vpop.f32.mrf.mxu2  ;;  %v1738_v57 = vpop.f32.mrf.mxu3 }
 0x155   : > { %v1744_v58 = vadd.f32 %v1712_v56, %v1598_v46  ;;  %v1745_v59 = vadd.f32 %v1738_v57, %v1614_v47  ;;  %v1662_v60 = vpop.f32.mrf.mxu0  ;;  %v1688_v61 = vpop.f32.mrf.mxu1  ;;  %v2645_v57 = vld [vmem:[%s3012_s9] ss:$0 sm:$0xff] }
 0x15c   : > { %v1714_v62 = vpop.f32.mrf.mxu2  ;;  %v1740_v63 = vpop.f32.mrf.mxu3 }
 0x15d   : > { %v1779_v0 = vpop.f32.mrf.mxu0  ;;  %v1795_v1 = vpop.f32.mrf.mxu1  ;;  %v1436_v62 = vmul.f32 %v2643_v50, %v2960_v2  ;;  %v2644_v63 = vld [vmem:[%s3006_s3] ss:$0 sm:$0xff] }
 0x15e   : > { %v1831_v4 = vadd.f32 %v1779_v0, %v1742_v54  ;;  %v1832_v5 = vadd.f32 %v1795_v1, %v1743_v55  ;;  %v1437_v0 = vmul.f32 %v2643_v50, %v2962_v3  ;;  %v1438_v3 = vmul.f32 %v2643_v50, %v2968_v12 }
 0x160   : > { %v1445_v2 = vadd.f32 %v2644_v63, %v1437_v0  ;;  %v1446_v12 = vadd.f32 %v2644_v63, %v1438_v3 }
 0x164   : > { %v1811_v6 = vpop.f32.mrf.mxu2  ;;  %v1827_v7 = vpop.f32.mrf.mxu3 }
 0x165   : > { %v1833_v8 = vadd.f32 %v1811_v6, %v1744_v58  ;;  %v1834_v9 = vadd.f32 %v1827_v7, %v1745_v59  ;;  %v1781_v10 = vpop.f32.mrf.mxu0  ;;  %v1797_v11 = vpop.f32.mrf.mxu1 }
 0x16c   : > { %v1813_v14 = vpop.f32.mrf.mxu2  ;;  %v1829_v15 = vpop.f32.mrf.mxu3 }
 0x16d   : > { %v1868_v16 = vpop.f32.mrf.mxu0  ;;  %v1884_v17 = vpop.f32.mrf.mxu1  ;;  %v1444_v14 = vadd.f32 %v2644_v63, %v1436_v62 }
 0x16e   : > { %v1920_v46 = vadd.f32 %v1868_v16, %v1831_v4  ;;  %v1921_v47 = vadd.f32 %v1884_v17, %v1832_v5  ;;  %v2646_v4 = vld [vmem:[%s3013_s10] ss:$0 sm:$0xff] }
 0x174   : > { %v1900_v18 = vpop.f32.mrf.mxu2  ;;  %v1916_v19 = vpop.f32.mrf.mxu3 }
 0x175   : > { %v1870_v20 = vpop.f32.mrf.mxu0  ;;  %v1886_v21 = vpop.f32.mrf.mxu1  ;;  %v1922_v58 = vadd.f32 %v1900_v18, %v1833_v8  ;;  %v1923_v59 = vadd.f32 %v1916_v19, %v1834_v9 }
 0x17c   : > { %v1902_v22 = vpop.f32.mrf.mxu2  ;;  %v1918_v23 = vpop.f32.mrf.mxu3 }
 0x17d   : > { %v1967_v24 = vpop.f32.mrf.mxu0  ;;  %v1993_v25 = vpop.f32.mrf.mxu1  ;;  %v1439_v23 = vmul.f32 %v2643_v50, %v2970_v13 }
 0x17e   : > { %v2049_v48 = vadd.f32 %v1967_v24, %v1920_v46  ;;  %v2050_v49 = vadd.f32 %v1993_v25, %v1921_v47 }
 0x184   : > { %v2019_v26 = vpop.f32.mrf.mxu2  ;;  %v2045_v27 = vpop.f32.mrf.mxu3 }
 0x185   : > { %v1969_v28 = vpop.f32.mrf.mxu0  ;;  %v1995_v29 = vpop.f32.mrf.mxu1  ;;  %v2051_v6 = vadd.f32 %v2019_v26, %v1922_v58  ;;  %v2052_v7 = vadd.f32 %v2045_v27, %v1923_v59 }
 0x18c   : > { %v2021_v30 = vpop.f32.mrf.mxu2  ;;  %v2047_v31 = vpop.f32.mrf.mxu3 }
 0x18d   : > { %v2087_v32 = vpop.f32.mrf.mxu0  ;;  %v2103_v33 = vpop.f32.mrf.mxu1 }
 0x18e   : > { %v2139_v51 = vadd.f32 %v2087_v32, %v2049_v48  ;;  %v2140_v52 = vadd.f32 %v2103_v33, %v2050_v49  ;;  %v1447_v32 = vadd.f32 %v2644_v63, %v1439_v23 }
 0x194   : > { %v2119_v34 = vpop.f32.mrf.mxu2  ;;  %v2135_v35 = vpop.f32.mrf.mxu3 }
 0x195   : > { %v2089_v36 = vpop.f32.mrf.mxu0  ;;  %v2105_v37 = vpop.f32.mrf.mxu1  ;;  %v2141_v10 = vadd.f32 %v2119_v34, %v2051_v6  ;;  %v2142_v11 = vadd.f32 %v2135_v35, %v2052_v7 }
 0x19c   : > { %v2121_v38 = vpop.f32.mrf.mxu2  ;;  %v2137_v39 = vpop.f32.mrf.mxu3 }
 0x19d   : > { %v2177_v40 = vpop.f32.mrf.mxu0  ;;  %v2193_v41 = vpop.f32.mrf.mxu1 }
 0x19e   : > { %v2229_v53 = vadd.f32 %v2177_v40, %v2139_v51  ;;  %v2230_v54 = vadd.f32 %v2193_v41, %v2140_v52 }
 0x1a4   : > { %v2209_v42 = vpop.f32.mrf.mxu2  ;;  %v2225_v43 = vpop.f32.mrf.mxu3 }
 0x1a5   : > { %v2179_v44 = vpop.f32.mrf.mxu0  ;;  %v2195_v45 = vpop.f32.mrf.mxu1  ;;  %v2231_v17 = vadd.f32 %v2209_v42, %v2141_v10  ;;  %v2232_v18 = vadd.f32 %v2225_v43, %v2142_v11 }
 0x1ac   : > { %v2211_v55 = vpop.f32.mrf.mxu2  ;;  %v2227_v56 = vpop.f32.mrf.mxu3 }
 0x1ad   : > { %v2276_v60 = vpop.f32.mrf.mxu0  ;;  %v2302_v61 = vpop.f32.mrf.mxu1 }
 0x1ae   : > { %v2358_v1 = vadd.f32 %v2276_v60, %v2229_v53  ;;  %v2359_v5 = vadd.f32 %v2302_v61, %v2230_v54 }
 0x1b0   : > { %v2366_v8 = vmul.f32 %v2645_v57, %v2358_v1  ;;  %v2367_v9 = vmul.f32 %v2645_v57, %v2359_v5 }
 0x1b2   : > { %v2374_v15 = vadd.f32 %v2646_v4, %v2366_v8  ;;  %v2375_v16 = vadd.f32 %v2646_v4, %v2367_v9 }
 0x1b4   : > { %v2378_v19 = vadd.f32 %v2374_v15, %v1444_v14  ;;  %v2379_v20 = vadd.f32 %v2375_v16, %v1445_v2  ;;  %v2328_v21 = vpop.f32.mrf.mxu2  ;;  %v2354_v22 = vpop.f32.mrf.mxu3 }
 0x1b5   : > { %v2360_v24 = vadd.f32 %v2328_v21, %v2231_v17  ;;  %v2361_v25 = vadd.f32 %v2354_v22, %v2232_v18  ;;  %v2278_v26 = vpop.f32.mrf.mxu0  ;;  %v2304_v27 = vpop.f32.mrf.mxu1 }
 0x1b6   : > { %v2382_v28 = vpack.c.bf16 %v2378_v19, %v2378_v19  ;;  %v2383_v29 = vpack.c.bf16 %v2379_v20, %v2379_v20 }
 0x1b7   : > { %v2368_v30 = vmul.f32 %v2645_v57, %v2360_v24  ;;  %v2369_v31 = vmul.f32 %v2645_v57, %v2361_v25 }
 0x1b8   : > { %2387 = vst.msk [vmem:[%s466_s26] sm:$0x3] %vm2386_vm2, %v2382_v28 }
 0x1b9   : > { %2388 = vst.msk [vmem:[%s466_s26 + $0x2] sm:$0x3] %vm2386_vm2, %v2383_v29  ;;  %v2376_v13 = vadd.f32 %v2646_v4, %v2368_v30  ;;  %v2377_v33 = vadd.f32 %v2646_v4, %v2369_v31 }
 0x1bb   : > { %v2380_v34 = vadd.f32 %v2376_v13, %v1446_v12  ;;  %v2381_v35 = vadd.f32 %v2377_v33, %v1447_v32 }
 0x1bc   : > { %v2330_v36 = vpop.f32.mrf.mxu2  ;;  %v2356_v37 = vpop.f32.mrf.mxu3 }
 0x1bd   : > { %v2384_v38 = vpack.c.bf16 %v2380_v34, %v2380_v34  ;;  %v2385_v39 = vpack.c.bf16 %v2381_v35, %v2381_v35 }
 0x1bf   : > { %2389 = vst.msk [vmem:[%s466_s26 + $0x4] sm:$0x3] %vm2386_vm2, %v2384_v38 }
 0x1c0   : > { %2390 = vst.msk [vmem:[%s466_s26 + $0x6] sm:$0x3] %vm2386_vm2, %v2385_v39 }
 0x1c1 PF: > { %s21_s17 = sadd.s32 1, %s2653_s17  }
 0x1c2   : > { %p18_p4 = scmp.ge.s32.totalorder %s21_s17, 4  }
 0x1c4   :  { %20 = sbr.rel (!%p18_p4) target bundleno = 1 (0x1), region = 126 }

</bundles_post_ra>
